<compile_context>
chip_gen: v7x
topology: tpu7x:2x2x1
jax: 0.10.0
libtpu: 0.0.40
codegen_flags: <defaults>
</compile_context>

<pallas_src>
import jax
import jax.numpy as jnp
from jax.experimental import pallas as pl
from jax.experimental.pallas import tpu as pltpu

IN_DIM = 36
HIDDEN = 512
OUT_DIM = 17
K_PAD = 128      # first-layer input padded to lane-aligned width
OUT_PAD = 128    # output padded to lane-dense width


def _mlp_kernel(x_ref, w1_ref, wmid_ref, w7_ref, b_ref, o_ref):
    """One batch tile of the full 7-layer MLP.

    x_ref:    (TB, 128)     bf16  zero-padded input (cols :36 valid)
    w1_ref:   (128, 512)    bf16  fc1 weight (rows 36: are zero)
    wmid_ref: (5, 512, 512) bf16  fc2..fc6 weights
    w7_ref:   (512, 128)    bf16  fc7 weight (cols 17: are zero)
    b_ref:    (8, 512)      f32   row k = bias of layer k (zero padded)
    o_ref:    (TB, 128)     f32   lane-dense output slab (cols :17 valid)
    """
    h = x_ref[...]

    # fc1 + ReLU
    y = jnp.dot(h, w1_ref[...], preferred_element_type=jnp.float32) + b_ref[0:1, :]
    h = jnp.maximum(y, 0.0).astype(jnp.bfloat16)

    # fc2..fc6 + ReLU. Dropout(0.25) between fc3/fc4 is identity in eval mode.
    # TODO(synk): training-mode dropout masking (pltpu.prng_random_bits) not implemented.
    for k in range(5):
        y = (jnp.dot(h, wmid_ref[k], preferred_element_type=jnp.float32)
             + b_ref[k + 1:k + 2, :])
        h = jnp.maximum(y, 0.0).astype(jnp.bfloat16)

    # fc7 (no ReLU), written as a lane-dense 128-wide slab.
    y = (jnp.dot(h, w7_ref[...], preferred_element_type=jnp.float32)
         + b_ref[6:7, :OUT_PAD])
    o_ref[...] = y.astype(o_ref.dtype)


def _prep_params(params):
    """Pack/pad f32 (in,out) weights into bf16 lane-aligned slabs + one f32 bias block."""
    w1, _ = params[0]
    w1p = (jnp.zeros((K_PAD, HIDDEN), jnp.bfloat16)
           .at[:IN_DIM, :].set(w1.astype(jnp.bfloat16)))
    wmid = jnp.stack([params[i][0].astype(jnp.bfloat16) for i in range(1, 6)], axis=0)
    w7, _ = params[6]
    w7p = (jnp.zeros((HIDDEN, OUT_PAD), jnp.bfloat16)
           .at[:, :OUT_DIM].set(w7.astype(jnp.bfloat16)))
    bpack = jnp.zeros((8, HIDDEN), jnp.float32)
    for i in range(7):
        b = params[i][1].astype(jnp.float32)
        bpack = bpack.at[i, :b.shape[0]].set(b)
    return w1p, wmid, w7p, bpack


@jax.jit
def net_forward(x, params):
    """x: (B, 6, 6) or (..., 36). Returns (B, 17) float32."""
    x2d = x.reshape(-1, IN_DIM).astype(jnp.float32)
    B = x2d.shape[0]

    # Batch tiling: up to 256 rows per tile, padded to a multiple of 8 / of TB.
    B8 = ((B + 7) // 8) * 8
    TB = min(256, B8)
    B_pad = ((B8 + TB - 1) // TB) * TB
    grid = (B_pad // TB,)

    xp = jnp.zeros((B_pad, K_PAD), jnp.bfloat16)
    xp = xp.at[:B, :IN_DIM].set(x2d.astype(jnp.bfloat16))

    w1p, wmid, w7p, bpack = _prep_params(params)

    out = pl.pallas_call(
        _mlp_kernel,
        out_shape=jax.ShapeDtypeStruct((B_pad, OUT_PAD), jnp.float32),
        grid=grid,
        in_specs=[
            pl.BlockSpec((TB, K_PAD), lambda i: (i, 0)),            # x tile (per grid step)
            pl.BlockSpec((K_PAD, HIDDEN), lambda i: (0, 0)),        # fc1 weight (resident)
            pl.BlockSpec((5, HIDDEN, HIDDEN), lambda i: (0, 0, 0)),  # fc2..fc6 weights (resident)
            pl.BlockSpec((HIDDEN, OUT_PAD), lambda i: (0, 0)),      # fc7 weight (resident)
            pl.BlockSpec((8, HIDDEN), lambda i: (0, 0)),            # packed biases (resident)
        ],
        out_specs=pl.BlockSpec((TB, OUT_PAD), lambda i: (i, 0)),
        compiler_params=pltpu.CompilerParams(
            dimension_semantics=("parallel",),   # lets v7x split batch tiles across its 2 TCs
            vmem_limit_bytes=32 << 20,           # honest limit; footprint is only a few MiB
        ),
    )(xp, w1p, wmid, w7p, bpack)

    return out[:B, :OUT_DIM]


def init_params(key):
    """Deterministic parameter init matching the nn.Linear shapes of Net."""
    dims = [(36, 512), (512, 512), (512, 512), (512, 512),
            (512, 512), (512, 512), (512, 17)]
    params = []
    for i, (fan_in, fan_out) in enumerate(dims):
        kw, kb, key = jax.random.split(jax.random.fold_in(key, i), 3)
        bound = 1.0 / jnp.sqrt(jnp.float32(fan_in))
        w = jax.random.uniform(kw, (fan_in, fan_out), jnp.float32, -bound, bound)
        b = jax.random.uniform(kb, (fan_out,), jnp.float32, -bound, bound)
        params.append((w, b))
    return params


if __name__ == "__main__":
    key = jax.random.PRNGKey(0)
    k_x, k_p = jax.random.split(key)

    # Small batch; input shaped (B, 6, 6) to exercise the view(-1, 36) path.
    x = jax.random.normal(k_x, (8, 6, 6), dtype=jnp.float32)
    params = init_params(k_p)

    y = net_forward(x, params)
    y = jax.block_until_ready(y)

    assert y.shape == (8, 17), y.shape
    assert y.dtype == jnp.float32, y.dtype

    # Reference: same forward with bf16-cast weights/activations, f32 accumulation.
    h = x.reshape(-1, IN_DIM).astype(jnp.bfloat16)
    ref = None
    for i, (w, b) in enumerate(params):
        ref = jnp.dot(h, w.astype(jnp.bfloat16),
                      preferred_element_type=jnp.float32) + b
        if i < len(params) - 1:
            h = jnp.maximum(ref, 0.0).astype(jnp.bfloat16)
    assert jnp.allclose(y, ref, atol=1e-2, rtol=2e-2), float(jnp.max(jnp.abs(y - ref)))

    print("KERNEL_OK")
</pallas_src>

<mosaic_0001>
module attributes {stable_mosaic.version = 11 : i64} {
  func.func @_mlp_kernel(%arg0: i32, %arg1: memref<8x128xbf16, #tpu.memory_space<vmem>>, %arg2: memref<128x512xbf16, #tpu.memory_space<vmem>>, %arg3: memref<5x512x512xbf16, #tpu.memory_space<vmem>>, %arg4: memref<512x128xbf16, #tpu.memory_space<vmem>>, %arg5: memref<8x512xf32, #tpu.memory_space<vmem>>, %arg6: memref<8x128xf32, #tpu.memory_space<vmem>>) attributes {dimension_semantics = [#tpu.dimension_semantics<parallel>], iteration_bounds = array<i64: 1>, scalar_prefetch = 0 : i64, scratch_operands = 0 : i64, tpu.core_type = #tpu.core_type<tc>, window_params = [{transform_indices = @transform_0, window_bounds = array<i64: 8, 128>}, {pipeline_mode = #tpu.pipeline_mode<synchronous>, transform_indices = @transform_1, window_bounds = array<i64: 128, 512>}, {pipeline_mode = #tpu.pipeline_mode<synchronous>, transform_indices = @transform_2, window_bounds = array<i64: 5, 512, 512>}, {pipeline_mode = #tpu.pipeline_mode<synchronous>, transform_indices = @transform_3, window_bounds = array<i64: 512, 128>}, {pipeline_mode = #tpu.pipeline_mode<synchronous>, transform_indices = @transform_4, window_bounds = array<i64: 8, 512>}, {transform_indices = @transform_5, window_bounds = array<i64: 8, 128>}]} {
    %c0 = arith.constant 0 : index
    %c0_0 = arith.constant 0 : index
    %0 = vector.load %arg1[%c0, %c0_0] : memref<8x128xbf16, #tpu.memory_space<vmem>>, vector<8x128xbf16>
    %c0_1 = arith.constant 0 : index
    %c0_2 = arith.constant 0 : index
    %1 = vector.load %arg2[%c0_1, %c0_2] : memref<128x512xbf16, #tpu.memory_space<vmem>>, vector<128x512xbf16>
    %cst = arith.constant dense<0.000000e+00> : vector<8x512xf32>
    %2 = tpu.matmul %0, %1, %cst {dimension_numbers = #tpu.dot_dimension_numbers<[1], [0], [0], [1], [0, 0, 1, 1], [], []>} : vector<8x128xbf16>, vector<128x512xbf16>, vector<8x512xf32> -> vector<8x512xf32>
    %c0_3 = arith.constant 0 : index
    %c0_4 = arith.constant 0 : index
    %3 = vector.load %arg5[%c0_3, %c0_4] : memref<8x512xf32, #tpu.memory_space<vmem>>, vector<1x512xf32>
    %4 = vector.broadcast %3 : vector<1x512xf32> to vector<8x512xf32>
    %5 = arith.addf %2, %4 : vector<8x512xf32>
    %cst_5 = arith.constant 0.000000e+00 : f32
    %6 = vector.broadcast %cst_5 : f32 to vector<8x512xf32>
    %7 = arith.maximumf %5, %6 : vector<8x512xf32>
    %8 = arith.truncf %7 : vector<8x512xf32> to vector<8x512xbf16>
    %c0_6 = arith.constant 0 : index
    %c0_7 = arith.constant 0 : index
    %c0_8 = arith.constant 0 : index
    %9 = vector.load %arg3[%c0_6, %c0_7, %c0_8] : memref<5x512x512xbf16, #tpu.memory_space<vmem>>, vector<1x512x512xbf16>
    %10 = vector.shape_cast %9 : vector<1x512x512xbf16> to vector<512x512xbf16>
    %cst_9 = arith.constant dense<0.000000e+00> : vector<8x512xf32>
    %11 = tpu.matmul %8, %10, %cst_9 {dimension_numbers = #tpu.dot_dimension_numbers<[1], [0], [0], [1], [0, 0, 1, 1], [], []>} : vector<8x512xbf16>, vector<512x512xbf16>, vector<8x512xf32> -> vector<8x512xf32>
    %c1 = arith.constant 1 : index
    %c0_10 = arith.constant 0 : index
    %12 = vector.load %arg5[%c1, %c0_10] : memref<8x512xf32, #tpu.memory_space<vmem>>, vector<1x512xf32>
    %13 = vector.broadcast %12 : vector<1x512xf32> to vector<8x512xf32>
    %14 = arith.addf %11, %13 : vector<8x512xf32>
    %cst_11 = arith.constant 0.000000e+00 : f32
    %15 = vector.broadcast %cst_11 : f32 to vector<8x512xf32>
    %16 = arith.maximumf %14, %15 : vector<8x512xf32>
    %17 = arith.truncf %16 : vector<8x512xf32> to vector<8x512xbf16>
    %c1_12 = arith.constant 1 : index
    %c0_13 = arith.constant 0 : index
    %c0_14 = arith.constant 0 : index
    %18 = vector.load %arg3[%c1_12, %c0_13, %c0_14] : memref<5x512x512xbf16, #tpu.memory_space<vmem>>, vector<1x512x512xbf16>
    %19 = vector.shape_cast %18 : vector<1x512x512xbf16> to vector<512x512xbf16>
    %cst_15 = arith.constant dense<0.000000e+00> : vector<8x512xf32>
    %20 = tpu.matmul %17, %19, %cst_15 {dimension_numbers = #tpu.dot_dimension_numbers<[1], [0], [0], [1], [0, 0, 1, 1], [], []>} : vector<8x512xbf16>, vector<512x512xbf16>, vector<8x512xf32> -> vector<8x512xf32>
    %c2 = arith.constant 2 : index
    %c0_16 = arith.constant 0 : index
    %21 = vector.load %arg5[%c2, %c0_16] : memref<8x512xf32, #tpu.memory_space<vmem>>, vector<1x512xf32>
    %22 = vector.broadcast %21 : vector<1x512xf32> to vector<8x512xf32>
    %23 = arith.addf %20, %22 : vector<8x512xf32>
    %cst_17 = arith.constant 0.000000e+00 : f32
    %24 = vector.broadcast %cst_17 : f32 to vector<8x512xf32>
    %25 = arith.maximumf %23, %24 : vector<8x512xf32>
    %26 = arith.truncf %25 : vector<8x512xf32> to vector<8x512xbf16>
    %c2_18 = arith.constant 2 : index
    %c0_19 = arith.constant 0 : index
    %c0_20 = arith.constant 0 : index
    %27 = vector.load %arg3[%c2_18, %c0_19, %c0_20] : memref<5x512x512xbf16, #tpu.memory_space<vmem>>, vector<1x512x512xbf16>
    %28 = vector.shape_cast %27 : vector<1x512x512xbf16> to vector<512x512xbf16>
    %cst_21 = arith.constant dense<0.000000e+00> : vector<8x512xf32>
    %29 = tpu.matmul %26, %28, %cst_21 {dimension_numbers = #tpu.dot_dimension_numbers<[1], [0], [0], [1], [0, 0, 1, 1], [], []>} : vector<8x512xbf16>, vector<512x512xbf16>, vector<8x512xf32> -> vector<8x512xf32>
    %c3 = arith.constant 3 : index
    %c0_22 = arith.constant 0 : index
    %30 = vector.load %arg5[%c3, %c0_22] : memref<8x512xf32, #tpu.memory_space<vmem>>, vector<1x512xf32>
    %31 = vector.broadcast %30 : vector<1x512xf32> to vector<8x512xf32>
    %32 = arith.addf %29, %31 : vector<8x512xf32>
    %cst_23 = arith.constant 0.000000e+00 : f32
    %33 = vector.broadcast %cst_23 : f32 to vector<8x512xf32>
    %34 = arith.maximumf %32, %33 : vector<8x512xf32>
    %35 = arith.truncf %34 : vector<8x512xf32> to vector<8x512xbf16>
    %c3_24 = arith.constant 3 : index
    %c0_25 = arith.constant 0 : index
    %c0_26 = arith.constant 0 : index
    %36 = vector.load %arg3[%c3_24, %c0_25, %c0_26] : memref<5x512x512xbf16, #tpu.memory_space<vmem>>, vector<1x512x512xbf16>
    %37 = vector.shape_cast %36 : vector<1x512x512xbf16> to vector<512x512xbf16>
    %cst_27 = arith.constant dense<0.000000e+00> : vector<8x512xf32>
    %38 = tpu.matmul %35, %37, %cst_27 {dimension_numbers = #tpu.dot_dimension_numbers<[1], [0], [0], [1], [0, 0, 1, 1], [], []>} : vector<8x512xbf16>, vector<512x512xbf16>, vector<8x512xf32> -> vector<8x512xf32>
    %c4 = arith.constant 4 : index
    %c0_28 = arith.constant 0 : index
    %39 = vector.load %arg5[%c4, %c0_28] : memref<8x512xf32, #tpu.memory_space<vmem>>, vector<1x512xf32>
    %40 = vector.broadcast %39 : vector<1x512xf32> to vector<8x512xf32>
    %41 = arith.addf %38, %40 : vector<8x512xf32>
    %cst_29 = arith.constant 0.000000e+00 : f32
    %42 = vector.broadcast %cst_29 : f32 to vector<8x512xf32>
    %43 = arith.maximumf %41, %42 : vector<8x512xf32>
    %44 = arith.truncf %43 : vector<8x512xf32> to vector<8x512xbf16>
    %c4_30 = arith.constant 4 : index
    %c0_31 = arith.constant 0 : index
    %c0_32 = arith.constant 0 : index
    %45 = vector.load %arg3[%c4_30, %c0_31, %c0_32] : memref<5x512x512xbf16, #tpu.memory_space<vmem>>, vector<1x512x512xbf16>
    %46 = vector.shape_cast %45 : vector<1x512x512xbf16> to vector<512x512xbf16>
    %cst_33 = arith.constant dense<0.000000e+00> : vector<8x512xf32>
    %47 = tpu.matmul %44, %46, %cst_33 {dimension_numbers = #tpu.dot_dimension_numbers<[1], [0], [0], [1], [0, 0, 1, 1], [], []>} : vector<8x512xbf16>, vector<512x512xbf16>, vector<8x512xf32> -> vector<8x512xf32>
    %c5 = arith.constant 5 : index
    %c0_34 = arith.constant 0 : index
    %48 = vector.load %arg5[%c5, %c0_34] : memref<8x512xf32, #tpu.memory_space<vmem>>, vector<1x512xf32>
    %49 = vector.broadcast %48 : vector<1x512xf32> to vector<8x512xf32>
    %50 = arith.addf %47, %49 : vector<8x512xf32>
    %cst_35 = arith.constant 0.000000e+00 : f32
    %51 = vector.broadcast %cst_35 : f32 to vector<8x512xf32>
    %52 = arith.maximumf %50, %51 : vector<8x512xf32>
    %53 = arith.truncf %52 : vector<8x512xf32> to vector<8x512xbf16>
    %c0_36 = arith.constant 0 : index
    %c0_37 = arith.constant 0 : index
    %54 = vector.load %arg4[%c0_36, %c0_37] : memref<512x128xbf16, #tpu.memory_space<vmem>>, vector<512x128xbf16>
    %cst_38 = arith.constant dense<0.000000e+00> : vector<8x128xf32>
    %55 = tpu.matmul %53, %54, %cst_38 {dimension_numbers = #tpu.dot_dimension_numbers<[1], [0], [0], [1], [0, 0, 1, 1], [], []>} : vector<8x512xbf16>, vector<512x128xbf16>, vector<8x128xf32> -> vector<8x128xf32>
    %c6 = arith.constant 6 : index
    %c0_39 = arith.constant 0 : index
    %56 = vector.load %arg5[%c6, %c0_39] : memref<8x512xf32, #tpu.memory_space<vmem>>, vector<1x128xf32>
    %57 = vector.broadcast %56 : vector<1x128xf32> to vector<8x128xf32>
    %58 = arith.addf %55, %57 : vector<8x128xf32>
    %c0_40 = arith.constant 0 : index
    %c0_41 = arith.constant 0 : index
    %59 = vector.load %arg6[%c0_40, %c0_41] : memref<8x128xf32, #tpu.memory_space<vmem>>, vector<8x128xf32>
    tpu.vector_store %arg6[%c0_40, %c0_41], %58 {strides = array<i32>} : memref<8x128xf32, #tpu.memory_space<vmem>>, vector<8x128xf32>,
    return
  }
  func.func @transform_0(%arg0: i32) -> (i32, i32) {
    %c0_i32 = arith.constant 0 : i32
    %c0_i32_0 = arith.constant 0 : i32
    return %arg0, %c0_i32 : i32, i32
  }
  func.func @transform_1(%arg0: i32) -> (i32, i32) {
    %c0_i32 = arith.constant 0 : i32
    %c0_i32_0 = arith.constant 0 : i32
    %c0_i32_1 = arith.constant 0 : i32
    return %c0_i32, %c0_i32_0 : i32, i32
  }
  func.func @transform_2(%arg0: i32) -> (i32, i32, i32) {
    %c0_i32 = arith.constant 0 : i32
    %c0_i32_0 = arith.constant 0 : i32
    %c0_i32_1 = arith.constant 0 : i32
    %c0_i32_2 = arith.constant 0 : i32
    return %c0_i32, %c0_i32_0, %c0_i32_1 : i32, i32, i32
  }
  func.func @transform_3(%arg0: i32) -> (i32, i32) {
    %c0_i32 = arith.constant 0 : i32
    %c0_i32_0 = arith.constant 0 : i32
    %c0_i32_1 = arith.constant 0 : i32
    return %c0_i32, %c0_i32_0 : i32, i32
  }
  func.func @transform_4(%arg0: i32) -> (i32, i32) {
    %c0_i32 = arith.constant 0 : i32
    %c0_i32_0 = arith.constant 0 : i32
    %c0_i32_1 = arith.constant 0 : i32
    return %c0_i32, %c0_i32_0 : i32, i32
  }
  func.func @transform_5(%arg0: i32) -> (i32, i32) {
    %c0_i32 = arith.constant 0 : i32
    %c0_i32_0 = arith.constant 0 : i32
    return %arg0, %c0_i32 : i32, i32
  }
}

</mosaic_0001>

<bundles_post_ra>
// kernel: net_forward.1
= control target key start
LH: loop header
LB: loop body
LE: loop exit
PB: predicated region body
PF: predicated region fallthrough
CT: control target
= control target key end

     0   :  { %v7889_v2 = vmov 0   ;;  %s10152_s0 = inlined_call_operand.vmem [shape: bf16[8,128], index: 0, kind: input, shape index: {}]   ;;  %s10153_s1 = inlined_call_operand.vmem [shape: bf16[128,512], index: 1, kind: input, shape index: {}]   ;;  %s10154_s2 = inlined_call_operand.vmem [shape: bf16[5,512,512], index: 2, kind: input, shape index: {}]   ;;  %s10155_s3 = inlined_call_operand.vmem [shape: bf16[512,128], index: 3, kind: input, shape index: {}]   ;;  %s10156_s4 = inlined_call_operand.vmem [shape: f32[8,512], index: 4, kind: input, shape index: {}]   ;;  %s10157_s5 = inlined_call_operand.hbm [shape: f32[8,128], index: 5, kind: output, shape index: {}]  }
   0x1   :  { %v6825_v0 = vld [vmem:[%s10153_s1 + $0x4] ss:$16 sps:$4 sm:$0xff]   ;;  %v6827_v1 = vld [vmem:[%s10153_s1] ss:$16 sps:$4 sm:$0xff]   ;;  %269 = vmatprep.mubr.bf16.mxu0 %v7889_v2  ;;  %310 = vmatprep.mubr.bf16.mxu1 %v7889_v2  ;;  %v6849_v10 = vld [vmem:[%s10153_s1 + $0xc] ss:$16 sps:$4 sm:$0xff]  }
   0x2   :  { %237 = vmatprep.subr.bf16.mxu0 %v6825_v0  ;;  %v6828_v3 = vld [vmem:[%s10153_s1 + $0x24] ss:$16 sps:$4 sm:$0xff]   ;;  %v6830_v4 = vld [vmem:[%s10153_s1 + $0x20] ss:$16 sps:$4 sm:$0xff]   ;;  %v6851_v11 = vld [vmem:[%s10153_s1 + $0x8] ss:$16 sps:$4 sm:$0xff]   ;;  %278 = vmatprep.subr.bf16.mxu1 %v6849_v10 }
   0x3   :  { %238 = vmatpush1.bf16.msra.mxu0 %v6827_v1  ;;  %v6831_v5 = vld [vmem:[%s10153_s1 + $0x44] ss:$16 sps:$4 sm:$0xff]   ;;  %v6833_v6 = vld [vmem:[%s10153_s1 + $0x40] ss:$16 sps:$4 sm:$0xff]   ;;  %v6852_v12 = vld [vmem:[%s10153_s1 + $0x2c] ss:$16 sps:$4 sm:$0xff]   ;;  %279 = vmatpush1.bf16.msra.mxu1 %v6851_v11 }
   0x4   :  { %239 = vmatprep.subr.bf16.mxu0 %v6828_v3  ;;  %v6834_v7 = vld [vmem:[%s10153_s1 + $0x64] ss:$16 sps:$4 sm:$0xff]   ;;  %v6836_v8 = vld [vmem:[%s10153_s1 + $0x60] ss:$16 sps:$4 sm:$0xff]   ;;  %v6854_v14 = vld [vmem:[%s10153_s1 + $0x28] ss:$16 sps:$4 sm:$0xff]   ;;  %280 = vmatprep.subr.bf16.mxu1 %v6852_v12 }
   0x5   :  { %v6837_v9 = vld [vmem:[%s10153_s1 + $0x84] ss:$16 sps:$4 sm:$0xff]   ;;  %v6839_v13 = vld [vmem:[%s10153_s1 + $0x80] ss:$16 sps:$4 sm:$0xff]   ;;  %v6855_v15 = vld [vmem:[%s10153_s1 + $0x4c] ss:$16 sps:$4 sm:$0xff]  }
   0x6   :  { %v6840_v16 = vld [vmem:[%s10153_s1 + $0xa4] ss:$16 sps:$4 sm:$0xff]   ;;  %v6842_v17 = vld [vmem:[%s10153_s1 + $0xa0] ss:$16 sps:$4 sm:$0xff]   ;;  %v6857_v18 = vld [vmem:[%s10153_s1 + $0x48] ss:$16 sps:$4 sm:$0xff]  }
   0x7   :  { %240 = vmatpush1.bf16.msra.mxu0 %v6830_v4  ;;  %281 = vmatpush1.bf16.msra.mxu1 %v6854_v14  ;;  %v6858_v19 = vld [vmem:[%s10153_s1 + $0x6c] ss:$16 sps:$4 sm:$0xff]   ;;  %v6843_v20 = vld [vmem:[%s10153_s1 + $0xc4] ss:$16 sps:$4 sm:$0xff]   ;;  %v6845_v21 = vld [vmem:[%s10153_s1 + $0xc0] ss:$16 sps:$4 sm:$0xff]  }
   0x8   :  { %241 = vmatprep.subr.bf16.mxu0 %v6831_v5  ;;  %282 = vmatprep.subr.bf16.mxu1 %v6855_v15  ;;  %v6860_v22 = vld [vmem:[%s10153_s1 + $0x68] ss:$16 sps:$4 sm:$0xff]   ;;  %v6861_v23 = vld [vmem:[%s10153_s1 + $0x8c] ss:$16 sps:$4 sm:$0xff]   ;;  %v6846_v24 = vld [vmem:[%s10153_s1 + $0xe4] ss:$16 sps:$4 sm:$0xff]  }
   0x9   :  { %v6848_v25 = vld [vmem:[%s10153_s1 + $0xe0] ss:$16 sps:$4 sm:$0xff]   ;;  %v6863_v26 = vld [vmem:[%s10153_s1 + $0x88] ss:$16 sps:$4 sm:$0xff]   ;;  %v6864_v27 = vld [vmem:[%s10153_s1 + $0xac] ss:$16 sps:$4 sm:$0xff]  }
   0xa   :  { %v6875_v28 = vld [vmem:[%s10154_s2 + $0x4] ss:$16 sps:$4 sm:$0xff]   ;;  %v22_v29 = vld [vmem:[%s10152_s0] sm:$0xf]  ;;  %v6866_v30 = vld [vmem:[%s10153_s1 + $0xa8] ss:$16 sps:$4 sm:$0xff]  }
   0xb   :  { %242 = vmatpush1.bf16.msra.mxu0 %v6833_v6  ;;  %283 = vmatpush1.bf16.msra.mxu1 %v6857_v18  ;;  %v6867_v31 = vld [vmem:[%s10153_s1 + $0xcc] ss:$16 sps:$4 sm:$0xff]   ;;  %v6873_v32 = vld [vmem:[%s10154_s2] ss:$16 sps:$4 sm:$0xff]   ;;  %v6881_v33 = vld [vmem:[%s10154_s2 + $0x24] ss:$16 sps:$4 sm:$0xff]  }
   0xc   :  { %243 = vmatprep.subr.bf16.mxu0 %v6834_v7  ;;  %284 = vmatprep.subr.bf16.mxu1 %v6858_v19  ;;  %v6869_v34 = vld [vmem:[%s10153_s1 + $0xc8] ss:$16 sps:$4 sm:$0xff]   ;;  %v6870_v35 = vld [vmem:[%s10153_s1 + $0xec] ss:$16 sps:$4 sm:$0xff]   ;;  %v6879_v36 = vld [vmem:[%s10154_s2 + $0x20] ss:$16 sps:$4 sm:$0xff]  }
   0xd   :  { %v6887_v37 = vld [vmem:[%s10154_s2 + $0x44] ss:$16 sps:$4 sm:$0xff]   ;;  %v6872_v38 = vld [vmem:[%s10153_s1 + $0xe8] ss:$16 sps:$4 sm:$0xff]   ;;  %v6878_v39 = vld [vmem:[%s10154_s2 + $0xc] ss:$16 sps:$4 sm:$0xff]  }
   0xe   :  { %v6885_v40 = vld [vmem:[%s10154_s2 + $0x40] ss:$16 sps:$4 sm:$0xff]   ;;  %v6893_v41 = vld [vmem:[%s10154_s2 + $0x64] ss:$16 sps:$4 sm:$0xff]   ;;  %v6876_v42 = vld [vmem:[%s10154_s2 + $0x8] ss:$16 sps:$4 sm:$0xff]  }
   0xf   :  { %244 = vmatpush1.bf16.msra.mxu0 %v6836_v8  ;;  %285 = vmatpush1.bf16.msra.mxu1 %v6860_v22  ;;  %v6884_v43 = vld [vmem:[%s10154_s2 + $0x2c] ss:$16 sps:$4 sm:$0xff]   ;;  %v6891_v44 = vld [vmem:[%s10154_s2 + $0x60] ss:$16 sps:$4 sm:$0xff]   ;;  %v6899_v45 = vld [vmem:[%s10154_s2 + $0x84] ss:$16 sps:$4 sm:$0xff]  }
  0x10   :  { %245 = vmatprep.subr.bf16.mxu0 %v6837_v9  ;;  %286 = vmatprep.subr.bf16.mxu1 %v6861_v23  ;;  %v6882_v46 = vld [vmem:[%s10154_s2 + $0x28] ss:$16 sps:$4 sm:$0xff]   ;;  %v6890_v47 = vld [vmem:[%s10154_s2 + $0x4c] ss:$16 sps:$4 sm:$0xff]   ;;  %v6897_v48 = vld [vmem:[%s10154_s2 + $0x80] ss:$16 sps:$4 sm:$0xff]  }
  0x11   :  { %v6905_v49 = vld [vmem:[%s10154_s2 + $0xa4] ss:$16 sps:$4 sm:$0xff]   ;;  %v6888_v50 = vld [vmem:[%s10154_s2 + $0x48] ss:$16 sps:$4 sm:$0xff]   ;;  %v6896_v51 = vld [vmem:[%s10154_s2 + $0x6c] ss:$16 sps:$4 sm:$0xff]  }
  0x12   :  { %v6903_v52 = vld [vmem:[%s10154_s2 + $0xa0] ss:$16 sps:$4 sm:$0xff]   ;;  %v6911_v53 = vld [vmem:[%s10154_s2 + $0xc4] ss:$16 sps:$4 sm:$0xff]   ;;  %v6894_v54 = vld [vmem:[%s10154_s2 + $0x68] ss:$16 sps:$4 sm:$0xff]  }
  0x13   :  { %246 = vmatpush1.bf16.msra.mxu0 %v6839_v13  ;;  %287 = vmatpush1.bf16.msra.mxu1 %v6863_v26  ;;  %v6902_v55 = vld [vmem:[%s10154_s2 + $0x8c] ss:$16 sps:$4 sm:$0xff]   ;;  %v6909_v56 = vld [vmem:[%s10154_s2 + $0xc0] ss:$16 sps:$4 sm:$0xff]   ;;  %v6917_v57 = vld [vmem:[%s10154_s2 + $0xe4] ss:$16 sps:$4 sm:$0xff]  }
  0x14   :  { %247 = vmatprep.subr.bf16.mxu0 %v6840_v16  ;;  %288 = vmatprep.subr.bf16.mxu1 %v6864_v27  ;;  %v6900_v58 = vld [vmem:[%s10154_s2 + $0x88] ss:$16 sps:$4 sm:$0xff]   ;;  %v6908_v59 = vld [vmem:[%s10154_s2 + $0xac] ss:$16 sps:$4 sm:$0xff]   ;;  %v6915_v60 = vld [vmem:[%s10154_s2 + $0xe0] ss:$16 sps:$4 sm:$0xff]  }
  0x15   :  { %v6923_v61 = vld [vmem:[%s10154_s2 + $0x104] ss:$16 sps:$4 sm:$0xff]   ;;  %v6906_v62 = vld [vmem:[%s10154_s2 + $0xa8] ss:$16 sps:$4 sm:$0xff]   ;;  %v6914_v63 = vld [vmem:[%s10154_s2 + $0xcc] ss:$16 sps:$4 sm:$0xff]  }
  0x16   :  { %v6921_v0 = vld [vmem:[%s10154_s2 + $0x100] ss:$16 sps:$4 sm:$0xff]   ;;  %v6929_v1 = vld [vmem:[%s10154_s2 + $0x124] ss:$16 sps:$4 sm:$0xff]   ;;  %v6912_v2 = vld [vmem:[%s10154_s2 + $0xc8] ss:$16 sps:$4 sm:$0xff]  }
  0x17   :  { %248 = vmatpush1.bf16.msra.mxu0 %v6842_v17  ;;  %289 = vmatpush1.bf16.msra.mxu1 %v6866_v30  ;;  %v6920_v3 = vld [vmem:[%s10154_s2 + $0xec] ss:$16 sps:$4 sm:$0xff]   ;;  %v6927_v4 = vld [vmem:[%s10154_s2 + $0x120] ss:$16 sps:$4 sm:$0xff]   ;;  %v6935_v5 = vld [vmem:[%s10154_s2 + $0x144] ss:$16 sps:$4 sm:$0xff]  }
  0x18   :  { %249 = vmatprep.subr.bf16.mxu0 %v6843_v20  ;;  %290 = vmatprep.subr.bf16.mxu1 %v6867_v31  ;;  %v6918_v6 = vld [vmem:[%s10154_s2 + $0xe8] ss:$16 sps:$4 sm:$0xff]   ;;  %v6926_v7 = vld [vmem:[%s10154_s2 + $0x10c] ss:$16 sps:$4 sm:$0xff]   ;;  %v6933_v8 = vld [vmem:[%s10154_s2 + $0x140] ss:$16 sps:$4 sm:$0xff]  }
  0x19   :  { %v6941_v9 = vld [vmem:[%s10154_s2 + $0x164] ss:$16 sps:$4 sm:$0xff]   ;;  %v6924_v10 = vld [vmem:[%s10154_s2 + $0x108] ss:$16 sps:$4 sm:$0xff]   ;;  %v6932_v11 = vld [vmem:[%s10154_s2 + $0x12c] ss:$16 sps:$4 sm:$0xff]  }
  0x1a   :  { %v6939_v12 = vld [vmem:[%s10154_s2 + $0x160] ss:$16 sps:$4 sm:$0xff]   ;;  %v6947_v13 = vld [vmem:[%s10154_s2 + $0x184] ss:$16 sps:$4 sm:$0xff]   ;;  %v6930_v14 = vld [vmem:[%s10154_s2 + $0x128] ss:$16 sps:$4 sm:$0xff]  }
  0x1b   :  { %250 = vmatpush1.bf16.msra.mxu0 %v6845_v21  ;;  %291 = vmatpush1.bf16.msra.mxu1 %v6869_v34  ;;  %v6938_v15 = vld [vmem:[%s10154_s2 + $0x14c] ss:$16 sps:$4 sm:$0xff]   ;;  %v6945_v16 = vld [vmem:[%s10154_s2 + $0x180] ss:$16 sps:$4 sm:$0xff]   ;;  %v6953_v17 = vld [vmem:[%s10154_s2 + $0x1a4] ss:$16 sps:$4 sm:$0xff]  }
  0x1c   :  { %251 = vmatprep.subr.bf16.mxu0 %v6846_v24  ;;  %292 = vmatprep.subr.bf16.mxu1 %v6870_v35  ;;  %v6936_v18 = vld [vmem:[%s10154_s2 + $0x148] ss:$16 sps:$4 sm:$0xff]   ;;  %v6944_v19 = vld [vmem:[%s10154_s2 + $0x16c] ss:$16 sps:$4 sm:$0xff]   ;;  %v6951_v20 = vld [vmem:[%s10154_s2 + $0x1a0] ss:$16 sps:$4 sm:$0xff]  }
  0x1d   :  { %v6942_v21 = vld [vmem:[%s10154_s2 + $0x168] ss:$16 sps:$4 sm:$0xff]   ;;  %v6950_v22 = vld [vmem:[%s10154_s2 + $0x18c] ss:$16 sps:$4 sm:$0xff]   ;;  %v6959_v26 = vld [vmem:[%s10154_s2 + $0x1c4] ss:$16 sps:$4 sm:$0xff]  }
  0x1e   :  { %v6948_v23 = vld [vmem:[%s10154_s2 + $0x188] ss:$16 sps:$4 sm:$0xff]   ;;  %v6956_v24 = vld [vmem:[%s10154_s2 + $0x1ac] ss:$16 sps:$4 sm:$0xff]   ;;  %v6965_v30 = vld [vmem:[%s10154_s2 + $0x1e4] ss:$16 sps:$4 sm:$0xff]  }
  0x1f   :  { %252 = vmatpush1.bf16.msra.mxu0 %v6848_v25  ;;  %293 = vmatpush1.bf16.msra.mxu1 %v6872_v38  ;;  %v6954_v25 = vld [vmem:[%s10154_s2 + $0x1a8] ss:$16 sps:$4 sm:$0xff]   ;;  %v6962_v27 = vld [vmem:[%s10154_s2 + $0x1cc] ss:$16 sps:$4 sm:$0xff]   ;;  %v6971_v34 = vld [vmem:[%s10154_s2 + $0x204] ss:$16 sps:$4 sm:$0xff]  }
  0x20   :  { %1118 = vmatprep.subr.bf16.mxu0 %v6875_v28  ;;  %1200 = vmatprep.subr.bf16.mxu1 %v6878_v39  ;;  %v6957_v28 = vld [vmem:[%s10154_s2 + $0x1c0] ss:$16 sps:$4 sm:$0xff]   ;;  %v6968_v31 = vld [vmem:[%s10154_s2 + $0x1ec] ss:$16 sps:$4 sm:$0xff]  }
  0x21   :  { %v6974_v35 = vld [vmem:[%s10154_s2 + $0x20c] ss:$16 sps:$4 sm:$0xff]   ;;  %v8226_v39 = vld [vmem:[%s10156_s4] ss:$8 sm:$0xf] }
  0x22   :  { %270 = vmatmul.mubr.bf16.vlgmr.msra.gmra.mrb[0].mxu0 %v22_v29  ;;  %311 = vmatmul.mubr.bf16.vlgmr.msra.gmra.mrb[0].mxu1 %v22_v29  ;;  %v6960_v29 = vld [vmem:[%s10154_s2 + $0x1c8] ss:$16 sps:$4 sm:$0xff]  }
  0x23   :  { %1119 = vmatpush1.bf16.msra.mxu0 %v6873_v32  ;;  %1201 = vmatpush1.bf16.msra.mxu1 %v6876_v42  ;;  %v6963_v32 = vld [vmem:[%s10154_s2 + $0x1e0] ss:$16 sps:$4 sm:$0xff]  }
  0x24   :  { %1120 = vmatprep.subr.bf16.mxu0 %v6881_v33  ;;  %1202 = vmatprep.subr.bf16.mxu1 %v6884_v43  ;;  %v6966_v33 = vld [vmem:[%s10154_s2 + $0x1e8] ss:$16 sps:$4 sm:$0xff]  }
  0x27   :  { %1121 = vmatpush1.bf16.msra.mxu0 %v6879_v36  ;;  %1203 = vmatpush1.bf16.msra.mxu1 %v6882_v46  ;;  %v57_v36 = vlaneseq }
  0x28   :  { %1122 = vmatprep.subr.bf16.mxu0 %v6887_v37  ;;  %1204 = vmatprep.subr.bf16.mxu1 %v6890_v47 }
  0x29   :  { %v8218_v37 = vshrl.u32 %v57_v36, 7  ;;  %v7026_v36 = vld [vmem:[%s10154_s2 + $0x328] ss:$16 sps:$4 sm:$0xff]  }
  0x2b   :  { %1123 = vmatpush1.bf16.msra.mxu0 %v6885_v40  ;;  %1205 = vmatpush1.bf16.msra.mxu1 %v6888_v50  ;;  %v8221_v38 = vsub.s32 0, %v8218_v37  ;;  %v8229_v40 = vsub.s32 1, %v8218_v37 }
  0x2c   :  { %1124 = vmatprep.subr.bf16.mxu0 %v6893_v41  ;;  %1206 = vmatprep.subr.bf16.mxu1 %v6896_v51  ;;  %v6969_v51 = vld [vmem:[%s10154_s2 + $0x200] ss:$16 sps:$4 sm:$0xff]  }
  0x2d   :  { %v60_v41 = vrot.slane %v8226_v39, %v8221_v38  ;;  %v64_v42 = vrot.slane %v8226_v39, %v8229_v40 }
  0x2f   :  { %1125 = vmatpush1.bf16.msra.mxu0 %v6891_v44  ;;  %1207 = vmatpush1.bf16.msra.mxu1 %v6894_v54  ;;  %v6980_v54 = vld [vmem:[%s10154_s2 + $0x22c] ss:$16 sps:$4 sm:$0xff]  }
  0x30   :  { %1126 = vmatprep.subr.bf16.mxu0 %v6899_v45  ;;  %1208 = vmatprep.subr.bf16.mxu1 %v6902_v55  ;;  %v8248_v55 = vsub.s32 3, %v8218_v37 }
  0x33   :  { %1127 = vmatpush1.bf16.msra.mxu0 %v6897_v48  ;;  %1209 = vmatpush1.bf16.msra.mxu1 %v6900_v58  ;;  %v6975_v58 = vld [vmem:[%s10154_s2 + $0x220] ss:$16 sps:$4 sm:$0xff]  }
  0x34   :  { %1128 = vmatprep.subr.bf16.mxu0 %v6905_v49  ;;  %1210 = vmatprep.subr.bf16.mxu1 %v6908_v59  ;;  %v6978_v59 = vld [vmem:[%s10154_s2 + $0x228] ss:$16 sps:$4 sm:$0xff]  }
  0x37   :  { %1129 = vmatpush1.bf16.msra.mxu0 %v6903_v52  ;;  %1211 = vmatpush1.bf16.msra.mxu1 %v6906_v62  ;;  %v6972_v52 = vld [vmem:[%s10154_s2 + $0x208] ss:$16 sps:$4 sm:$0xff]   ;;  %v72_v62 = vrot.slane %v8226_v39, %v8248_v55 }
  0x38   :  { %1130 = vmatprep.subr.bf16.mxu0 %v6911_v53  ;;  %1212 = vmatprep.subr.bf16.mxu1 %v6914_v63  ;;  %v6977_v53 = vld [vmem:[%s10154_s2 + $0x224] ss:$16 sps:$4 sm:$0xff]  }
  0x3b   :  { %1131 = vmatpush1.bf16.msra.mxu0 %v6909_v56  ;;  %1213 = vmatpush1.bf16.msra.mxu1 %v6912_v2 }
  0x3c   :  { %1132 = vmatprep.subr.bf16.mxu0 %v6917_v57  ;;  %1214 = vmatprep.subr.bf16.mxu1 %v6920_v3  ;;  %v6989_v3 = vld [vmem:[%s10154_s2 + $0x264] ss:$16 sps:$4 sm:$0xff]  }
  0x3f   :  { %1133 = vmatpush1.bf16.msra.mxu0 %v6915_v60  ;;  %1215 = vmatpush1.bf16.msra.mxu1 %v6918_v6  ;;  %v6983_v60 = vld [vmem:[%s10154_s2 + $0x244] ss:$16 sps:$4 sm:$0xff]  }
  0x40   :  { %1134 = vmatprep.subr.bf16.mxu0 %v6923_v61  ;;  %1216 = vmatprep.subr.bf16.mxu1 %v6926_v7  ;;  %v6986_v61 = vld [vmem:[%s10154_s2 + $0x24c] ss:$16 sps:$4 sm:$0xff]  }
  0x43   :  { %1135 = vmatpush1.bf16.msra.mxu0 %v6921_v0  ;;  %1217 = vmatpush1.bf16.msra.mxu1 %v6924_v10  ;;  %v6981_v0 = vld [vmem:[%s10154_s2 + $0x240] ss:$16 sps:$4 sm:$0xff]   ;;  %v6990_v10 = vld [vmem:[%s10154_s2 + $0x268] ss:$16 sps:$4 sm:$0xff]  }
  0x44   :  { %1136 = vmatprep.subr.bf16.mxu0 %v6929_v1  ;;  %1218 = vmatprep.subr.bf16.mxu1 %v6932_v11  ;;  %v6984_v1 = vld [vmem:[%s10154_s2 + $0x248] ss:$16 sps:$4 sm:$0xff]   ;;  %v6995_v11 = vld [vmem:[%s10154_s2 + $0x284] ss:$16 sps:$4 sm:$0xff]  }
  0x47   :  { %1137 = vmatpush1.bf16.msra.mxu0 %v6927_v4  ;;  %1219 = vmatpush1.bf16.msra.mxu1 %v6930_v14  ;;  %v6992_v4 = vld [vmem:[%s10154_s2 + $0x26c] ss:$16 sps:$4 sm:$0xff]   ;;  %v6993_v14 = vld [vmem:[%s10154_s2 + $0x280] ss:$16 sps:$4 sm:$0xff]  }
  0x48   :  { %1138 = vmatprep.subr.bf16.mxu0 %v6935_v5  ;;  %1220 = vmatprep.subr.bf16.mxu1 %v6938_v15  ;;  %v6996_v15 = vld [vmem:[%s10154_s2 + $0x288] ss:$16 sps:$4 sm:$0xff]  }
  0x4b   :  { %1139 = vmatpush1.bf16.msra.mxu0 %v6933_v8  ;;  %1221 = vmatpush1.bf16.msra.mxu1 %v6936_v18  ;;  %v6999_v18 = vld [vmem:[%s10154_s2 + $0x2a0] ss:$16 sps:$4 sm:$0xff]  }
  0x4c   :  { %1140 = vmatprep.subr.bf16.mxu0 %v6941_v9  ;;  %1222 = vmatprep.subr.bf16.mxu1 %v6944_v19  ;;  %v6987_v9 = vld [vmem:[%s10154_s2 + $0x260] ss:$16 sps:$4 sm:$0xff]   ;;  %v7002_v19 = vld [vmem:[%s10154_s2 + $0x2a8] ss:$16 sps:$4 sm:$0xff]  }
  0x4f   :  { %1141 = vmatpush1.bf16.msra.mxu0 %v6939_v12  ;;  %1223 = vmatpush1.bf16.msra.mxu1 %v6942_v21  ;;  %v6998_v12 = vld [vmem:[%s10154_s2 + $0x28c] ss:$16 sps:$4 sm:$0xff]  }
  0x50   :  { %1142 = vmatprep.subr.bf16.mxu0 %v6947_v13  ;;  %1224 = vmatprep.subr.bf16.mxu1 %v6950_v22  ;;  %v7010_v21 = vld [vmem:[%s10154_s2 + $0x2cc] ss:$16 sps:$4 sm:$0xff]   ;;  %v7005_v22 = vld [vmem:[%s10154_s2 + $0x2c0] ss:$16 sps:$4 sm:$0xff]  }
  0x53   :  { %1143 = vmatpush1.bf16.msra.mxu0 %v6945_v16  ;;  %1225 = vmatpush1.bf16.msra.mxu1 %v6948_v23  ;;  %v7001_v16 = vld [vmem:[%s10154_s2 + $0x2a4] ss:$16 sps:$4 sm:$0xff]   ;;  %v7008_v23 = vld [vmem:[%s10154_s2 + $0x2c8] ss:$16 sps:$4 sm:$0xff]  }
  0x54   :  { %1144 = vmatprep.subr.bf16.mxu0 %v6953_v17  ;;  %1226 = vmatprep.subr.bf16.mxu1 %v6956_v24  ;;  %v7004_v17 = vld [vmem:[%s10154_s2 + $0x2ac] ss:$16 sps:$4 sm:$0xff]   ;;  %v7013_v24 = vld [vmem:[%s10154_s2 + $0x2e4] ss:$16 sps:$4 sm:$0xff]  }
  0x57   :  { %1145 = vmatpush1.bf16.msra.mxu0 %v6951_v20  ;;  %1227 = vmatpush1.bf16.msra.mxu1 %v6954_v25  ;;  %v7007_v20 = vld [vmem:[%s10154_s2 + $0x2c4] ss:$16 sps:$4 sm:$0xff]   ;;  %v7016_v25 = vld [vmem:[%s10154_s2 + $0x2ec] ss:$16 sps:$4 sm:$0xff]  }
  0x58   :  { %1146 = vmatprep.subr.bf16.mxu0 %v6959_v26  ;;  %1228 = vmatprep.subr.bf16.mxu1 %v6962_v27  ;;  %v7011_v26 = vld [vmem:[%s10154_s2 + $0x2e0] ss:$16 sps:$4 sm:$0xff]   ;;  %v7014_v27 = vld [vmem:[%s10154_s2 + $0x2e8] ss:$16 sps:$4 sm:$0xff]  }
  0x5b   :  { %1147 = vmatpush1.bf16.msra.mxu0 %v6957_v28  ;;  %1229 = vmatpush1.bf16.msra.mxu1 %v6960_v29  ;;  %v7019_v28 = vld [vmem:[%s10154_s2 + $0x304] ss:$16 sps:$4 sm:$0xff]   ;;  %v7022_v29 = vld [vmem:[%s10154_s2 + $0x30c] ss:$16 sps:$4 sm:$0xff]  }
  0x5c   :  { %1148 = vmatprep.subr.bf16.mxu0 %v6965_v30  ;;  %1230 = vmatprep.subr.bf16.mxu1 %v6968_v31  ;;  %v7017_v30 = vld [vmem:[%s10154_s2 + $0x300] ss:$16 sps:$4 sm:$0xff]   ;;  %v7020_v31 = vld [vmem:[%s10154_s2 + $0x308] ss:$16 sps:$4 sm:$0xff]  }
  0x5f   :  { %1149 = vmatpush1.bf16.msra.mxu0 %v6963_v32  ;;  %1231 = vmatpush1.bf16.msra.mxu1 %v6966_v33  ;;  %v7025_v32 = vld [vmem:[%s10154_s2 + $0x324] ss:$16 sps:$4 sm:$0xff]   ;;  %v7028_v33 = vld [vmem:[%s10154_s2 + $0x32c] ss:$16 sps:$4 sm:$0xff]  }
  0x60   :  { %1159 = vmatprep.subr.bf16.mxu0 %v6971_v34  ;;  %1241 = vmatprep.subr.bf16.mxu1 %v6974_v35  ;;  %v8351_v34 = vsub.s32 2, %v8218_v37  ;;  %v7023_v35 = vld [vmem:[%s10154_s2 + $0x320] ss:$16 sps:$4 sm:$0xff]  }
  0x62   :  { %v68_v37 = vrot.slane %v8226_v39, %v8351_v34 }
  0xf5   :  { %v271_v43 = vpop.f32.mrb[0].mxu0  ;;  %v8264_v63 = vpop.f32.mrb[0].mxu1 }
  0xf6   :  { %v272_v44 = vadd.f32 %v271_v43, %v60_v41  ;;  %v273_v45 = vpop.f32.mrb[1].mxu0  ;;  %v314_v2 = vpop.f32.mrb[1].mxu1  ;;  %v7031_v41 = vld [vmem:[%s10154_s2 + $0x344] ss:$16 sps:$4 sm:$0xff]   ;;  %v7029_v43 = vld [vmem:[%s10154_s2 + $0x340] ss:$16 sps:$4 sm:$0xff]   ;;  %v313_v39 = vadd.f32 %v8264_v63, %v68_v37 }
  0xf7   :  { %v274_v46 = vadd.f32 %v273_v45, %v64_v42  ;;  %v275_v47 = vpop.f32.mrb[2].mxu0  ;;  %v315_v5 = vadd.f32 %v314_v2, %v72_v62  ;;  %v316_v6 = vpop.f32.mrb[2].mxu1  ;;  %v7034_v42 = vld [vmem:[%s10154_s2 + $0x34c] ss:$16 sps:$4 sm:$0xff]   ;;  %v7037_v45 = vld [vmem:[%s10154_s2 + $0x364] ss:$16 sps:$4 sm:$0xff]  }
  0xf8   :  { %v319_v48 = vmax.f32 %v272_v44, 0.0  ;;  %v276_v49 = vpop.f32.mrb[3].mxu0  ;;  %v317_v7 = vpop.f32.mrb[3].mxu1  ;;  %v7032_v44 = vld [vmem:[%s10154_s2 + $0x348] ss:$16 sps:$4 sm:$0xff]  }
  0xf9   :  { %v320_v50 = vmax.f32 %v274_v46, 0.0  ;;  %v322_v8 = vmax.f32 %v315_v5, 0.0  ;;  %v7040_v46 = vld [vmem:[%s10154_s2 + $0x36c] ss:$16 sps:$4 sm:$0xff]   ;;  %v7035_v47 = vld [vmem:[%s10154_s2 + $0x360] ss:$16 sps:$4 sm:$0xff]  }
  0xfa   :  { %v323_v57 = vpack.c.bf16 %v319_v48, %v319_v48  ;;  %v7038_v48 = vld [vmem:[%s10154_s2 + $0x368] ss:$16 sps:$4 sm:$0xff]   ;;  %v7043_v49 = vld [vmem:[%s10154_s2 + $0x384] ss:$16 sps:$4 sm:$0xff]   ;;  %v7065_v5 = vld [vmem:[%s10154_s2 + $0x400] ss:$16 sps:$4 sm:$0xff]  }
  0xfb   :  { %v324_v56 = vpack.c.bf16 %v320_v50, %v320_v50  ;;  %v326_v13 = vpack.c.bf16 %v322_v8, %v322_v8  ;;  %v7046_v50 = vld [vmem:[%s10154_s2 + $0x38c] ss:$16 sps:$4 sm:$0xff]   ;;  %v7056_v62 = vld [vmem:[%s10154_s2 + $0x3c8] ss:$16 sps:$4 sm:$0xff]   ;;  %v7061_v63 = vld [vmem:[%s10154_s2 + $0x3e4] ss:$16 sps:$4 sm:$0xff]  }
  0xfc   :  { %v7062_v2 = vld [vmem:[%s10154_s2 + $0x3e8] ss:$16 sps:$4 sm:$0xff]   ;;  %v7073_v7 = vld [vmem:[%s10154_s2 + $0x424] ss:$16 sps:$4 sm:$0xff]   ;;  %v7076_v8 = vld [vmem:[%s10154_s2 + $0x42c] ss:$16 sps:$4 sm:$0xff]  }
  0xfd   :  { %1150 = vmatprep.mubr.bf16.mxu0 %v324_v56  ;;  %1232 = vmatprep.mubr.bf16.mxu1 %v324_v56  ;;  %v7052_v56 = vld [vmem:[%s10154_s2 + $0x3ac] ss:$16 sps:$4 sm:$0xff]   ;;  %v7068_v6 = vld [vmem:[%s10154_s2 + $0x408] ss:$16 sps:$4 sm:$0xff]  }
  0xfe   :  { %1151 = vmatmul.mubr.bf16.vlgmr.msra.gmra.mrb[4].mxu0 %v323_v57  ;;  %1233 = vmatmul.mubr.bf16.vlgmr.msra.gmra.mrb[4].mxu1 %v323_v57  ;;  %v7047_v57 = vld [vmem:[%s10154_s2 + $0x3a0] ss:$16 sps:$4 sm:$0xff]  }
  0xff   :  { %1160 = vmatpush1.bf16.msra.mxu0 %v6969_v51  ;;  %1242 = vmatpush1.bf16.msra.mxu1 %v6972_v52  ;;  %v321_v51 = vmax.f32 %v313_v39, 0.0  ;;  %v7041_v52 = vld [vmem:[%s10154_s2 + $0x380] ss:$16 sps:$4 sm:$0xff]  }
 0x100   :  { %1161 = vmatprep.subr.bf16.mxu0 %v6977_v53  ;;  %1243 = vmatprep.subr.bf16.mxu1 %v6980_v54  ;;  %v7044_v53 = vld [vmem:[%s10154_s2 + $0x388] ss:$16 sps:$4 sm:$0xff]   ;;  %v7049_v54 = vld [vmem:[%s10154_s2 + $0x3a4] ss:$16 sps:$4 sm:$0xff]  }
 0x101   :  { %1191 = vmatprep.mubr.bf16.mxu0 %v326_v13  ;;  %1273 = vmatprep.mubr.bf16.mxu1 %v326_v13 }
 0x103   :  { %1162 = vmatpush1.bf16.msra.mxu0 %v6975_v58  ;;  %1244 = vmatpush1.bf16.msra.mxu1 %v6978_v59  ;;  %v7050_v58 = vld [vmem:[%s10154_s2 + $0x3a8] ss:$16 sps:$4 sm:$0xff]   ;;  %v7055_v59 = vld [vmem:[%s10154_s2 + $0x3c4] ss:$16 sps:$4 sm:$0xff]  }
 0x104   :  { %1163 = vmatprep.subr.bf16.mxu0 %v6983_v60  ;;  %1245 = vmatprep.subr.bf16.mxu1 %v6986_v61  ;;  %v7058_v60 = vld [vmem:[%s10154_s2 + $0x3cc] ss:$16 sps:$4 sm:$0xff]   ;;  %v7053_v61 = vld [vmem:[%s10154_s2 + $0x3c0] ss:$16 sps:$4 sm:$0xff]  }
 0x107   :  { %1164 = vmatpush1.bf16.msra.mxu0 %v6981_v0  ;;  %1246 = vmatpush1.bf16.msra.mxu1 %v6984_v1  ;;  %v7064_v0 = vld [vmem:[%s10154_s2 + $0x3ec] ss:$16 sps:$4 sm:$0xff]   ;;  %v7059_v1 = vld [vmem:[%s10154_s2 + $0x3e0] ss:$16 sps:$4 sm:$0xff]  }
 0x108   :  { %1165 = vmatprep.subr.bf16.mxu0 %v6989_v3  ;;  %1247 = vmatprep.subr.bf16.mxu1 %v6992_v4  ;;  %v7067_v3 = vld [vmem:[%s10154_s2 + $0x404] ss:$16 sps:$4 sm:$0xff]   ;;  %v7070_v4 = vld [vmem:[%s10154_s2 + $0x40c] ss:$16 sps:$4 sm:$0xff]  }
 0x10b   :  { %1166 = vmatpush1.bf16.msra.mxu0 %v6987_v9  ;;  %1248 = vmatpush1.bf16.msra.mxu1 %v6990_v10  ;;  %v325_v9 = vpack.c.bf16 %v321_v51, %v321_v51 }
 0x10c   :  { %1167 = vmatprep.subr.bf16.mxu0 %v6995_v11  ;;  %1249 = vmatprep.subr.bf16.mxu1 %v6998_v12 }
 0x10f   :  { %1168 = vmatpush1.bf16.msra.mxu0 %v6993_v14  ;;  %1250 = vmatpush1.bf16.msra.mxu1 %v6996_v15 }
 0x110   :  { %1169 = vmatprep.subr.bf16.mxu0 %v7001_v16  ;;  %1251 = vmatprep.subr.bf16.mxu1 %v7004_v17 }
 0x113   :  { %1170 = vmatpush1.bf16.msra.mxu0 %v6999_v18  ;;  %1252 = vmatpush1.bf16.msra.mxu1 %v7002_v19 }
 0x114   :  { %1171 = vmatprep.subr.bf16.mxu0 %v7007_v20  ;;  %1253 = vmatprep.subr.bf16.mxu1 %v7010_v21 }
 0x117   :  { %1172 = vmatpush1.bf16.msra.mxu0 %v7005_v22  ;;  %1254 = vmatpush1.bf16.msra.mxu1 %v7008_v23 }
 0x118   :  { %1173 = vmatprep.subr.bf16.mxu0 %v7013_v24  ;;  %1255 = vmatprep.subr.bf16.mxu1 %v7016_v25 }
 0x11b   :  { %1174 = vmatpush1.bf16.msra.mxu0 %v7011_v26  ;;  %1256 = vmatpush1.bf16.msra.mxu1 %v7014_v27 }
 0x11c   :  { %1175 = vmatprep.subr.bf16.mxu0 %v7019_v28  ;;  %1257 = vmatprep.subr.bf16.mxu1 %v7022_v29 }
 0x11f   :  { %1176 = vmatpush1.bf16.msra.mxu0 %v7017_v30  ;;  %1258 = vmatpush1.bf16.msra.mxu1 %v7020_v31 }
 0x120   :  { %1177 = vmatprep.subr.bf16.mxu0 %v7025_v32  ;;  %1259 = vmatprep.subr.bf16.mxu1 %v7028_v33 }
 0x123   :  { %1178 = vmatpush1.bf16.msra.mxu0 %v7023_v35  ;;  %1260 = vmatpush1.bf16.msra.mxu1 %v7026_v36 }
 0x124   :  { %1179 = vmatprep.subr.bf16.mxu0 %v7031_v41  ;;  %1261 = vmatprep.subr.bf16.mxu1 %v7034_v42 }
 0x127   :  { %1180 = vmatpush1.bf16.msra.mxu0 %v7029_v43  ;;  %1262 = vmatpush1.bf16.msra.mxu1 %v7032_v44 }
 0x128   :  { %1181 = vmatprep.subr.bf16.mxu0 %v7037_v45  ;;  %1263 = vmatprep.subr.bf16.mxu1 %v7040_v46 }
 0x12b   :  { %1182 = vmatpush1.bf16.msra.mxu0 %v7035_v47  ;;  %1264 = vmatpush1.bf16.msra.mxu1 %v7038_v48 }
 0x12c   :  { %1183 = vmatprep.subr.bf16.mxu0 %v7043_v49  ;;  %1265 = vmatprep.subr.bf16.mxu1 %v7046_v50 }
 0x12f   :  { %1184 = vmatpush1.bf16.msra.mxu0 %v7041_v52  ;;  %1266 = vmatpush1.bf16.msra.mxu1 %v7044_v53 }
 0x130   :  { %1185 = vmatprep.subr.bf16.mxu0 %v7049_v54  ;;  %1267 = vmatprep.subr.bf16.mxu1 %v7052_v56 }
 0x133   :  { %1186 = vmatpush1.bf16.msra.mxu0 %v7047_v57  ;;  %1268 = vmatpush1.bf16.msra.mxu1 %v7050_v58 }
 0x134   :  { %1187 = vmatprep.subr.bf16.mxu0 %v7055_v59  ;;  %1269 = vmatprep.subr.bf16.mxu1 %v7058_v60 }
 0x137   :  { %1188 = vmatpush1.bf16.msra.mxu0 %v7053_v61  ;;  %1270 = vmatpush1.bf16.msra.mxu1 %v7056_v62 }
 0x138   :  { %1189 = vmatprep.subr.bf16.mxu0 %v7061_v63  ;;  %1271 = vmatprep.subr.bf16.mxu1 %v7064_v0 }
 0x13b   :  { %1190 = vmatpush1.bf16.msra.mxu0 %v7059_v1  ;;  %1272 = vmatpush1.bf16.msra.mxu1 %v7062_v2 }
 0x13c   :  { %2082 = vmatprep.subr.bf16.mxu0 %v7067_v3  ;;  %2164 = vmatprep.subr.bf16.mxu1 %v7070_v4 }
 0x13e   :  { %1192 = vmatmul.mubr.bf16.vlgmr.msra.gmra.mrb[4].mxu0 %v325_v9  ;;  %1274 = vmatmul.mubr.bf16.vlgmr.msra.gmra.mrb[4].mxu1 %v325_v9 }
 0x13f   :  { %10 = vsyncpa [#allocation3], 0  ;;  %2083 = vmatpush1.bf16.msra.mxu0 %v7065_v5  ;;  %2165 = vmatpush1.bf16.msra.mxu1 %v7068_v6  ;;  %v7071_v10 = vld [vmem:[%s10154_s2 + $0x420] ss:$16 sps:$4 sm:$0xff]   ;;  %v7074_v11 = vld [vmem:[%s10154_s2 + $0x428] ss:$16 sps:$4 sm:$0xff]  }
 0x140   :  { %2084 = vmatprep.subr.bf16.mxu0 %v7073_v7  ;;  %2166 = vmatprep.subr.bf16.mxu1 %v7076_v8  ;;  %v7079_v12 = vld [vmem:[%s10154_s2 + $0x444] ss:$16 sps:$4 sm:$0xff]   ;;  %v7082_v13 = vld [vmem:[%s10154_s2 + $0x44c] ss:$16 sps:$4 sm:$0xff]   ;;  %v7077_v14 = vld [vmem:[%s10154_s2 + $0x440] ss:$16 sps:$4 sm:$0xff]  }
 0x141   :  { %v7080_v15 = vld [vmem:[%s10154_s2 + $0x448] ss:$16 sps:$4 sm:$0xff]   ;;  %v7085_v16 = vld [vmem:[%s10154_s2 + $0x464] ss:$16 sps:$4 sm:$0xff]   ;;  %v7088_v17 = vld [vmem:[%s10154_s2 + $0x46c] ss:$16 sps:$4 sm:$0xff]  }
 0x142   :  { %v7083_v18 = vld [vmem:[%s10154_s2 + $0x460] ss:$16 sps:$4 sm:$0xff]   ;;  %v7086_v19 = vld [vmem:[%s10154_s2 + $0x468] ss:$16 sps:$4 sm:$0xff]   ;;  %v7091_v20 = vld [vmem:[%s10154_s2 + $0x484] ss:$16 sps:$4 sm:$0xff]  }
 0x143   :  { %2085 = vmatpush1.bf16.msra.mxu0 %v7071_v10  ;;  %2167 = vmatpush1.bf16.msra.mxu1 %v7074_v11  ;;  %v7094_v21 = vld [vmem:[%s10154_s2 + $0x48c] ss:$16 sps:$4 sm:$0xff]   ;;  %v7089_v22 = vld [vmem:[%s10154_s2 + $0x480] ss:$16 sps:$4 sm:$0xff]   ;;  %v7092_v23 = vld [vmem:[%s10154_s2 + $0x488] ss:$16 sps:$4 sm:$0xff]  }
 0x144   :  { %2086 = vmatprep.subr.bf16.mxu0 %v7079_v12  ;;  %2168 = vmatprep.subr.bf16.mxu1 %v7082_v13  ;;  %v7097_v24 = vld [vmem:[%s10154_s2 + $0x4a4] ss:$16 sps:$4 sm:$0xff]   ;;  %v7100_v25 = vld [vmem:[%s10154_s2 + $0x4ac] ss:$16 sps:$4 sm:$0xff]   ;;  %v7095_v26 = vld [vmem:[%s10154_s2 + $0x4a0] ss:$16 sps:$4 sm:$0xff]  }
 0x145   :  { %v7098_v27 = vld [vmem:[%s10154_s2 + $0x4a8] ss:$16 sps:$4 sm:$0xff]   ;;  %v7103_v28 = vld [vmem:[%s10154_s2 + $0x4c4] ss:$16 sps:$4 sm:$0xff]   ;;  %v7106_v29 = vld [vmem:[%s10154_s2 + $0x4cc] ss:$16 sps:$4 sm:$0xff]  }
 0x146   :  { %v7101_v30 = vld [vmem:[%s10154_s2 + $0x4c0] ss:$16 sps:$4 sm:$0xff]   ;;  %v7104_v31 = vld [vmem:[%s10154_s2 + $0x4c8] ss:$16 sps:$4 sm:$0xff]   ;;  %v7109_v32 = vld [vmem:[%s10154_s2 + $0x4e4] ss:$16 sps:$4 sm:$0xff]  }
 0x147   :  { %2087 = vmatpush1.bf16.msra.mxu0 %v7077_v14  ;;  %2169 = vmatpush1.bf16.msra.mxu1 %v7080_v15  ;;  %v7112_v33 = vld [vmem:[%s10154_s2 + $0x4ec] ss:$16 sps:$4 sm:$0xff]   ;;  %v7107_v35 = vld [vmem:[%s10154_s2 + $0x4e0] ss:$16 sps:$4 sm:$0xff]   ;;  %v7110_v36 = vld [vmem:[%s10154_s2 + $0x4e8] ss:$16 sps:$4 sm:$0xff]  }
 0x148   :  { %2088 = vmatprep.subr.bf16.mxu0 %v7085_v16  ;;  %2170 = vmatprep.subr.bf16.mxu1 %v7088_v17  ;;  %v7115_v41 = vld [vmem:[%s10154_s2 + $0x504] ss:$16 sps:$4 sm:$0xff]   ;;  %v7118_v42 = vld [vmem:[%s10154_s2 + $0x50c] ss:$16 sps:$4 sm:$0xff]   ;;  %v7113_v37 = vld [vmem:[%s10154_s2 + $0x500] ss:$16 sps:$4 sm:$0xff]  }
 0x149   :  { %v7116_v43 = vld [vmem:[%s10154_s2 + $0x508] ss:$16 sps:$4 sm:$0xff]   ;;  %v7121_v44 = vld [vmem:[%s10154_s2 + $0x524] ss:$16 sps:$4 sm:$0xff]   ;;  %v7124_v45 = vld [vmem:[%s10154_s2 + $0x52c] ss:$16 sps:$4 sm:$0xff]  }
 0x14a   :  { %v7119_v46 = vld [vmem:[%s10154_s2 + $0x520] ss:$16 sps:$4 sm:$0xff]   ;;  %v7122_v39 = vld [vmem:[%s10154_s2 + $0x528] ss:$16 sps:$4 sm:$0xff]   ;;  %v7127_v47 = vld [vmem:[%s10154_s2 + $0x544] ss:$16 sps:$4 sm:$0xff]  }
 0x14b   :  { %2089 = vmatpush1.bf16.msra.mxu0 %v7083_v18  ;;  %2171 = vmatpush1.bf16.msra.mxu1 %v7086_v19  ;;  %v7130_v48 = vld [vmem:[%s10154_s2 + $0x54c] ss:$16 sps:$4 sm:$0xff]   ;;  %v7125_v49 = vld [vmem:[%s10154_s2 + $0x540] ss:$16 sps:$4 sm:$0xff]   ;;  %v7128_v50 = vld [vmem:[%s10154_s2 + $0x548] ss:$16 sps:$4 sm:$0xff]  }
 0x14c   :  { %2090 = vmatprep.subr.bf16.mxu0 %v7091_v20  ;;  %2172 = vmatprep.subr.bf16.mxu1 %v7094_v21  ;;  %v7133_v51 = vld [vmem:[%s10154_s2 + $0x564] ss:$16 sps:$4 sm:$0xff]   ;;  %v7136_v52 = vld [vmem:[%s10154_s2 + $0x56c] ss:$16 sps:$4 sm:$0xff]   ;;  %v7131_v53 = vld [vmem:[%s10154_s2 + $0x560] ss:$16 sps:$4 sm:$0xff]  }
 0x14d   :  { %v7134_v54 = vld [vmem:[%s10154_s2 + $0x568] ss:$16 sps:$4 sm:$0xff]   ;;  %v7139_v56 = vld [vmem:[%s10154_s2 + $0x584] ss:$16 sps:$4 sm:$0xff]   ;;  %v7142_v57 = vld [vmem:[%s10154_s2 + $0x58c] ss:$16 sps:$4 sm:$0xff]  }
 0x14e   :  { %v7137_v58 = vld [vmem:[%s10154_s2 + $0x580] ss:$16 sps:$4 sm:$0xff]   ;;  %v7140_v59 = vld [vmem:[%s10154_s2 + $0x588] ss:$16 sps:$4 sm:$0xff]   ;;  %v7145_v60 = vld [vmem:[%s10154_s2 + $0x5a4] ss:$16 sps:$4 sm:$0xff]  }
 0x14f   :  { %2091 = vmatpush1.bf16.msra.mxu0 %v7089_v22  ;;  %2173 = vmatpush1.bf16.msra.mxu1 %v7092_v23  ;;  %v7148_v61 = vld [vmem:[%s10154_s2 + $0x5ac] ss:$16 sps:$4 sm:$0xff]   ;;  %v7143_v62 = vld [vmem:[%s10154_s2 + $0x5a0] ss:$16 sps:$4 sm:$0xff]   ;;  %v7146_v63 = vld [vmem:[%s10154_s2 + $0x5a8] ss:$16 sps:$4 sm:$0xff]  }
 0x150   :  { %2092 = vmatprep.subr.bf16.mxu0 %v7097_v24  ;;  %2174 = vmatprep.subr.bf16.mxu1 %v7100_v25  ;;  %v7151_v0 = vld [vmem:[%s10154_s2 + $0x5c4] ss:$16 sps:$4 sm:$0xff]   ;;  %v7154_v1 = vld [vmem:[%s10154_s2 + $0x5cc] ss:$16 sps:$4 sm:$0xff]   ;;  %v7149_v2 = vld [vmem:[%s10154_s2 + $0x5c0] ss:$16 sps:$4 sm:$0xff]  }
 0x151   :  { %v7152_v3 = vld [vmem:[%s10154_s2 + $0x5c8] ss:$16 sps:$4 sm:$0xff]   ;;  %v7157_v4 = vld [vmem:[%s10154_s2 + $0x5e4] ss:$16 sps:$4 sm:$0xff]   ;;  %v7160_v5 = vld [vmem:[%s10154_s2 + $0x5ec] ss:$16 sps:$4 sm:$0xff]  }
 0x152   :  { %v7155_v6 = vld [vmem:[%s10154_s2 + $0x5e0] ss:$16 sps:$4 sm:$0xff]   ;;  %v7158_v7 = vld [vmem:[%s10154_s2 + $0x5e8] ss:$16 sps:$4 sm:$0xff]   ;;  %v7163_v8 = vld [vmem:[%s10154_s2 + $0x604] ss:$16 sps:$4 sm:$0xff]  }
 0x153   :  { %2093 = vmatpush1.bf16.msra.mxu0 %v7095_v26  ;;  %2175 = vmatpush1.bf16.msra.mxu1 %v7098_v27  ;;  %v7166_v9 = vld [vmem:[%s10154_s2 + $0x60c] ss:$16 sps:$4 sm:$0xff]   ;;  %v8635_v10 = vld [vmem:[%s10156_s4 + $0x1] ss:$8 sm:$0xf]  ;;  %s7890_s12 = smov [#allocation2]  }
 0x154   :  { %2094 = vmatprep.subr.bf16.mxu0 %v7103_v28  ;;  %2176 = vmatprep.subr.bf16.mxu1 %v7106_v29  ;;  %v461_v11 = vrot.slane %v8635_v10, %v8221_v38  ;;  %v465_v12 = vrot.slane %v8635_v10, %v8229_v40  ;;  %v473_v13 = vrot.slane %v8635_v10, %v8248_v55  ;;  %v7161_v29 = vld [vmem:[%s10154_s2 + $0x600] ss:$16 sps:$4 sm:$0xff]   ;;  %s5490_s13 = sshll.u32 %s7890_s12, 4  ;;  %s5491_s13 = int_to_ptr.vmem [resolvable:$true] %s5490_s13 }
 0x155   :  { %s7865_s14 = scalar_lea.vmem %s5491_s13, 128  ;;  %p7870_p1 = scmp.lt.s32.totalorder %s5491_s13, %s5491_s13 }
 0x156   :  { %p7866_p0 = scmp.ne.s32.totalorder %s5491_s13, %s7865_s14  ;;  %p7871_p2 = scmp.lt.s32.totalorder %s7865_s14, %s7865_s14 }
 0x157   :  { %2095 = vmatpush1.bf16.msra.mxu0 %v7101_v30  ;;  %2177 = vmatpush1.bf16.msra.mxu1 %v7104_v31  ;;  %v7164_v30 = vld [vmem:[%s10154_s2 + $0x608] ss:$16 sps:$4 sm:$0xff]  }
 0x158   :  { %2096 = vmatprep.subr.bf16.mxu0 %v7109_v32  ;;  %2178 = vmatprep.subr.bf16.mxu1 %v7112_v33  ;;  %v7169_v32 = vld [vmem:[%s10154_s2 + $0x624] ss:$16 sps:$4 sm:$0xff]   ;;  %v7172_v33 = vld [vmem:[%s10154_s2 + $0x62c] ss:$16 sps:$4 sm:$0xff]   ;;  %p7872_p3 = por %p7871_p2, %p7870_p1 }
 0x15a   :  { %p7873_p4 = pnand %p7872_p3, %p7866_p0 }
 0x15b   :  { %2097 = vmatpush1.bf16.msra.mxu0 %v7107_v35  ;;  %2179 = vmatpush1.bf16.msra.mxu1 %v7110_v36  ;;  %v7167_v36 = vld [vmem:[%s10154_s2 + $0x620] ss:$16 sps:$4 sm:$0xff]  }
 0x15c   :  { %2098 = vmatprep.subr.bf16.mxu0 %v7115_v41  ;;  %2180 = vmatprep.subr.bf16.mxu1 %v7118_v42  ;;  %v7170_v41 = vld [vmem:[%s10154_s2 + $0x628] ss:$16 sps:$4 sm:$0xff]   ;;  %v7175_v42 = vld [vmem:[%s10154_s2 + $0x644] ss:$16 sps:$4 sm:$0xff]  }
 0x15f   :  { %2099 = vmatpush1.bf16.msra.mxu0 %v7113_v37  ;;  %2181 = vmatpush1.bf16.msra.mxu1 %v7116_v43  ;;  %v7178_v37 = vld [vmem:[%s10154_s2 + $0x64c] ss:$16 sps:$4 sm:$0xff]   ;;  %v7173_v43 = vld [vmem:[%s10154_s2 + $0x640] ss:$16 sps:$4 sm:$0xff]  }
 0x160   :  { %2100 = vmatprep.subr.bf16.mxu0 %v7121_v44  ;;  %2182 = vmatprep.subr.bf16.mxu1 %v7124_v45  ;;  %v7176_v44 = vld [vmem:[%s10154_s2 + $0x648] ss:$16 sps:$4 sm:$0xff]   ;;  %v7181_v45 = vld [vmem:[%s10154_s2 + $0x664] ss:$16 sps:$4 sm:$0xff]  }
 0x163   :  { %2101 = vmatpush1.bf16.msra.mxu0 %v7119_v46  ;;  %2183 = vmatpush1.bf16.msra.mxu1 %v7122_v39  ;;  %v7184_v46 = vld [vmem:[%s10154_s2 + $0x66c] ss:$16 sps:$4 sm:$0xff]   ;;  %v7179_v39 = vld [vmem:[%s10154_s2 + $0x660] ss:$16 sps:$4 sm:$0xff]  }
 0x164   :  { %2102 = vmatprep.subr.bf16.mxu0 %v7127_v47  ;;  %2184 = vmatprep.subr.bf16.mxu1 %v7130_v48  ;;  %v7182_v47 = vld [vmem:[%s10154_s2 + $0x668] ss:$16 sps:$4 sm:$0xff]   ;;  %v7187_v48 = vld [vmem:[%s10154_s2 + $0x684] ss:$16 sps:$4 sm:$0xff]  }
 0x167   :  { %2103 = vmatpush1.bf16.msra.mxu0 %v7125_v49  ;;  %2185 = vmatpush1.bf16.msra.mxu1 %v7128_v50  ;;  %v7190_v49 = vld [vmem:[%s10154_s2 + $0x68c] ss:$16 sps:$4 sm:$0xff]   ;;  %v7185_v50 = vld [vmem:[%s10154_s2 + $0x680] ss:$16 sps:$4 sm:$0xff]  }
 0x168   :  { %2104 = vmatprep.subr.bf16.mxu0 %v7133_v51  ;;  %2186 = vmatprep.subr.bf16.mxu1 %v7136_v52  ;;  %v7188_v51 = vld [vmem:[%s10154_s2 + $0x688] ss:$16 sps:$4 sm:$0xff]   ;;  %v7193_v52 = vld [vmem:[%s10154_s2 + $0x6a4] ss:$16 sps:$4 sm:$0xff]  }
 0x16b   :  { %2105 = vmatpush1.bf16.msra.mxu0 %v7131_v53  ;;  %2187 = vmatpush1.bf16.msra.mxu1 %v7134_v54  ;;  %v7196_v53 = vld [vmem:[%s10154_s2 + $0x6ac] ss:$16 sps:$4 sm:$0xff]   ;;  %v7191_v54 = vld [vmem:[%s10154_s2 + $0x6a0] ss:$16 sps:$4 sm:$0xff]  }
 0x16c   :  { %2106 = vmatprep.subr.bf16.mxu0 %v7139_v56  ;;  %2188 = vmatprep.subr.bf16.mxu1 %v7142_v57  ;;  %v7194_v56 = vld [vmem:[%s10154_s2 + $0x6a8] ss:$16 sps:$4 sm:$0xff]   ;;  %v7199_v57 = vld [vmem:[%s10154_s2 + $0x6c4] ss:$16 sps:$4 sm:$0xff]  }
 0x16f   :  { %2107 = vmatpush1.bf16.msra.mxu0 %v7137_v58  ;;  %2189 = vmatpush1.bf16.msra.mxu1 %v7140_v59  ;;  %v7202_v58 = vld [vmem:[%s10154_s2 + $0x6cc] ss:$16 sps:$4 sm:$0xff]   ;;  %v7197_v59 = vld [vmem:[%s10154_s2 + $0x6c0] ss:$16 sps:$4 sm:$0xff]  }
 0x170   :  { %2108 = vmatprep.subr.bf16.mxu0 %v7145_v60  ;;  %2190 = vmatprep.subr.bf16.mxu1 %v7148_v61  ;;  %v7200_v60 = vld [vmem:[%s10154_s2 + $0x6c8] ss:$16 sps:$4 sm:$0xff]   ;;  %v7205_v61 = vld [vmem:[%s10154_s2 + $0x6e4] ss:$16 sps:$4 sm:$0xff]  }
 0x173   :  { %2109 = vmatpush1.bf16.msra.mxu0 %v7143_v62  ;;  %2191 = vmatpush1.bf16.msra.mxu1 %v7146_v63  ;;  %v7208_v62 = vld [vmem:[%s10154_s2 + $0x6ec] ss:$16 sps:$4 sm:$0xff]   ;;  %v7203_v63 = vld [vmem:[%s10154_s2 + $0x6e0] ss:$16 sps:$4 sm:$0xff]  }
 0x174   :  { %2110 = vmatprep.subr.bf16.mxu0 %v7151_v0  ;;  %2192 = vmatprep.subr.bf16.mxu1 %v7154_v1  ;;  %v7206_v0 = vld [vmem:[%s10154_s2 + $0x6e8] ss:$16 sps:$4 sm:$0xff]   ;;  %v7211_v1 = vld [vmem:[%s10154_s2 + $0x704] ss:$16 sps:$4 sm:$0xff]  }
 0x177   :  { %2111 = vmatpush1.bf16.msra.mxu0 %v7149_v2  ;;  %2193 = vmatpush1.bf16.msra.mxu1 %v7152_v3  ;;  %v7214_v2 = vld [vmem:[%s10154_s2 + $0x70c] ss:$16 sps:$4 sm:$0xff]   ;;  %v7209_v3 = vld [vmem:[%s10154_s2 + $0x700] ss:$16 sps:$4 sm:$0xff]  }
 0x178   :  { %2112 = vmatprep.subr.bf16.mxu0 %v7157_v4  ;;  %2194 = vmatprep.subr.bf16.mxu1 %v7160_v5  ;;  %v7212_v4 = vld [vmem:[%s10154_s2 + $0x708] ss:$16 sps:$4 sm:$0xff]   ;;  %v7217_v5 = vld [vmem:[%s10154_s2 + $0x724] ss:$16 sps:$4 sm:$0xff]  }
 0x17b   :  { %2113 = vmatpush1.bf16.msra.mxu0 %v7155_v6  ;;  %2195 = vmatpush1.bf16.msra.mxu1 %v7158_v7  ;;  %v7220_v6 = vld [vmem:[%s10154_s2 + $0x72c] ss:$16 sps:$4 sm:$0xff]   ;;  %v7215_v7 = vld [vmem:[%s10154_s2 + $0x720] ss:$16 sps:$4 sm:$0xff]  }
 0x17c   :  { %2123 = vmatprep.subr.bf16.mxu0 %v7163_v8  ;;  %2205 = vmatprep.subr.bf16.mxu1 %v7166_v9  ;;  %v7218_v8 = vld [vmem:[%s10154_s2 + $0x728] ss:$16 sps:$4 sm:$0xff]   ;;  %v7223_v9 = vld [vmem:[%s10154_s2 + $0x744] ss:$16 sps:$4 sm:$0xff]  }
 0x211   :  { %v1193_v14 = vpop.f32.mrb[4].mxu0  ;;  %v8643_v15 = vpop.f32.mrb[4].mxu1 }
 0x212   :  { %v6763_v16 = vadd.f32 %v1193_v14, %v461_v11  ;;  %v1195_v17 = vpop.f32.mrb[5].mxu0  ;;  %v1277_v18 = vpop.f32.mrb[5].mxu1  ;;  %v7226_v11 = vld [vmem:[%s10154_s2 + $0x74c] ss:$16 sps:$4 sm:$0xff]   ;;  %v7229_v14 = vld [vmem:[%s10154_s2 + $0x764] ss:$16 sps:$4 sm:$0xff]  }
 0x213   :  { %v6764_v19 = vadd.f32 %v1195_v17, %v465_v12  ;;  %v6766_v20 = vadd.f32 %v1277_v18, %v473_v13  ;;  %v1197_v21 = vpop.f32.mrb[6].mxu0  ;;  %v1279_v22 = vpop.f32.mrb[6].mxu1  ;;  %v7221_v12 = vld [vmem:[%s10154_s2 + $0x740] ss:$16 sps:$4 sm:$0xff]   ;;  %v7224_v13 = vld [vmem:[%s10154_s2 + $0x748] ss:$16 sps:$4 sm:$0xff]  }
 0x214   :  { %v1282_v23 = vmax.f32 %v6763_v16, 0.0  ;;  %v1198_v24 = vpop.f32.mrb[7].mxu0  ;;  %v1280_v25 = vpop.f32.mrb[7].mxu1  ;;  %v7232_v16 = vld [vmem:[%s10154_s2 + $0x76c] ss:$16 sps:$4 sm:$0xff]  }
 0x215   :  { %v1283_v26 = vmax.f32 %v6764_v19, 0.0  ;;  %v1285_v27 = vmax.f32 %v6766_v20, 0.0  ;;  %v7227_v17 = vld [vmem:[%s10154_s2 + $0x760] ss:$16 sps:$4 sm:$0xff]   ;;  %v7230_v18 = vld [vmem:[%s10154_s2 + $0x768] ss:$16 sps:$4 sm:$0xff]  }
 0x216   :  { %v1286_v31 = vpack.c.bf16 %v1282_v23, %v1282_v23  ;;  %v7235_v19 = vld [vmem:[%s10154_s2 + $0x784] ss:$16 sps:$4 sm:$0xff]   ;;  %v7238_v20 = vld [vmem:[%s10154_s2 + $0x78c] ss:$16 sps:$4 sm:$0xff]   ;;  %v7233_v21 = vld [vmem:[%s10154_s2 + $0x780] ss:$16 sps:$4 sm:$0xff]  }
 0x217   :  { %v1287_v28 = vpack.c.bf16 %v1283_v26, %v1283_v26  ;;  %v1289_v35 = vpack.c.bf16 %v1285_v27, %v1285_v27  ;;  %v7236_v22 = vld [vmem:[%s10154_s2 + $0x788] ss:$16 sps:$4 sm:$0xff]   ;;  %v7241_v23 = vld [vmem:[%s10154_s2 + $0x7a4] ss:$16 sps:$4 sm:$0xff]   ;;  %v7244_v24 = vld [vmem:[%s10154_s2 + $0x7ac] ss:$16 sps:$4 sm:$0xff]   ;;  %v469_v27 = vrot.slane %v8635_v10, %v8351_v34 }
 0x218   :  { %v7239_v25 = vld [vmem:[%s10154_s2 + $0x7a0] ss:$16 sps:$4 sm:$0xff]   ;;  %v7242_v26 = vld [vmem:[%s10154_s2 + $0x7a8] ss:$16 sps:$4 sm:$0xff]  }
 0x219   :  { %2114 = vmatprep.mubr.bf16.mxu0 %v1287_v28  ;;  %2196 = vmatprep.mubr.bf16.mxu1 %v1287_v28  ;;  %v7247_v28 = vld [vmem:[%s10154_s2 + $0x7c4] ss:$16 sps:$4 sm:$0xff]   ;;  %v7248_v10 = vld [vmem:[%s10154_s2 + $0x7c8] ss:$16 sps:$4 sm:$0xff]  }
 0x21a   :  { %2115 = vmatmul.mubr.bf16.vlgmr.msra.gmra.mrb[8].mxu0 %v1286_v31  ;;  %2197 = vmatmul.mubr.bf16.vlgmr.msra.gmra.mrb[8].mxu1 %v1286_v31  ;;  %v6765_v31 = vadd.f32 %v8643_v15, %v469_v27  ;;  %v7254_v15 = vld [vmem:[%s10154_s2 + $0x7e8] ss:$16 sps:$4 sm:$0xff]   ;;  %v7331_v27 = vld [vmem:[%s10154_s2 + $0x984] ss:$16 sps:$4 sm:$0xff]  }
 0x21b   :  { %2124 = vmatpush1.bf16.msra.mxu0 %v7161_v29  ;;  %2206 = vmatpush1.bf16.msra.mxu1 %v7164_v30  ;;  %v7250_v29 = vld [vmem:[%s10154_s2 + $0x7cc] ss:$16 sps:$4 sm:$0xff]   ;;  %v7245_v30 = vld [vmem:[%s10154_s2 + $0x7c0] ss:$16 sps:$4 sm:$0xff]  }
 0x21c   :  { %2155 = vmatprep.mubr.bf16.mxu0 %v1289_v35  ;;  %2237 = vmatprep.mubr.bf16.mxu1 %v1289_v35  ;;  %v7251_v35 = vld [vmem:[%s10154_s2 + $0x7e0] ss:$16 sps:$4 sm:$0xff]  }
 0x21d   :  { %2125 = vmatprep.subr.bf16.mxu0 %v7169_v32  ;;  %2207 = vmatprep.subr.bf16.mxu1 %v7172_v33  ;;  %v7253_v32 = vld [vmem:[%s10154_s2 + $0x7e4] ss:$16 sps:$4 sm:$0xff]   ;;  %v7256_v33 = vld [vmem:[%s10154_s2 + $0x7ec] ss:$16 sps:$4 sm:$0xff]  }
 0x21f   :  { %2126 = vmatpush1.bf16.msra.mxu0 %v7167_v36  ;;  %2208 = vmatpush1.bf16.msra.mxu1 %v7170_v41  ;;  %v1284_v36 = vmax.f32 %v6765_v31, 0.0  ;;  %v7259_v41 = vld [vmem:[%s10154_s2 + $0x804] ss:$16 sps:$4 sm:$0xff]   ;;  %v7340_v31 = vld [vmem:[%s10154_s2 + $0x9ac] ss:$16 sps:$4 sm:$0xff]  }
 0x220   :  { %2127 = vmatprep.subr.bf16.mxu0 %v7175_v42  ;;  %2209 = vmatprep.subr.bf16.mxu1 %v7178_v37  ;;  %v7262_v42 = vld [vmem:[%s10154_s2 + $0x80c] ss:$16 sps:$4 sm:$0xff]   ;;  %v7257_v37 = vld [vmem:[%s10154_s2 + $0x800] ss:$16 sps:$4 sm:$0xff]  }
 0x223   :  { %2128 = vmatpush1.bf16.msra.mxu0 %v7173_v43  ;;  %2210 = vmatpush1.bf16.msra.mxu1 %v7176_v44  ;;  %v7260_v43 = vld [vmem:[%s10154_s2 + $0x808] ss:$16 sps:$4 sm:$0xff]   ;;  %v1288_v44 = vpack.c.bf16 %v1284_v36, %v1284_v36  ;;  %v7341_v36 = vld [vmem:[%s10154_s2 + $0x9c0] ss:$16 sps:$4 sm:$0xff]  }
 0x224   :  { %2129 = vmatprep.subr.bf16.mxu0 %v7181_v45  ;;  %2211 = vmatprep.subr.bf16.mxu1 %v7184_v46  ;;  %v7265_v45 = vld [vmem:[%s10154_s2 + $0x824] ss:$16 sps:$4 sm:$0xff]   ;;  %v7268_v46 = vld [vmem:[%s10154_s2 + $0x82c] ss:$16 sps:$4 sm:$0xff]  }
 0x227   :  { %2130 = vmatpush1.bf16.msra.mxu0 %v7179_v39  ;;  %2212 = vmatpush1.bf16.msra.mxu1 %v7182_v47  ;;  %v7263_v39 = vld [vmem:[%s10154_s2 + $0x820] ss:$16 sps:$4 sm:$0xff]   ;;  %v7266_v47 = vld [vmem:[%s10154_s2 + $0x828] ss:$16 sps:$4 sm:$0xff]  }
 0x228   :  { %2131 = vmatprep.subr.bf16.mxu0 %v7187_v48  ;;  %2213 = vmatprep.subr.bf16.mxu1 %v7190_v49  ;;  %v7271_v48 = vld [vmem:[%s10154_s2 + $0x844] ss:$16 sps:$4 sm:$0xff]   ;;  %v7274_v49 = vld [vmem:[%s10154_s2 + $0x84c] ss:$16 sps:$4 sm:$0xff]  }
 0x22b   :  { %2132 = vmatpush1.bf16.msra.mxu0 %v7185_v50  ;;  %2214 = vmatpush1.bf16.msra.mxu1 %v7188_v51  ;;  %v7269_v50 = vld [vmem:[%s10154_s2 + $0x840] ss:$16 sps:$4 sm:$0xff]   ;;  %v7272_v51 = vld [vmem:[%s10154_s2 + $0x848] ss:$16 sps:$4 sm:$0xff]  }
 0x22c   :  { %2133 = vmatprep.subr.bf16.mxu0 %v7193_v52  ;;  %2215 = vmatprep.subr.bf16.mxu1 %v7196_v53  ;;  %v7277_v52 = vld [vmem:[%s10154_s2 + $0x864] ss:$16 sps:$4 sm:$0xff]   ;;  %v7280_v53 = vld [vmem:[%s10154_s2 + $0x86c] ss:$16 sps:$4 sm:$0xff]  }
 0x22f   :  { %2134 = vmatpush1.bf16.msra.mxu0 %v7191_v54  ;;  %2216 = vmatpush1.bf16.msra.mxu1 %v7194_v56  ;;  %v7275_v54 = vld [vmem:[%s10154_s2 + $0x860] ss:$16 sps:$4 sm:$0xff]   ;;  %v7278_v56 = vld [vmem:[%s10154_s2 + $0x868] ss:$16 sps:$4 sm:$0xff]  }
 0x230   :  { %2135 = vmatprep.subr.bf16.mxu0 %v7199_v57  ;;  %2217 = vmatprep.subr.bf16.mxu1 %v7202_v58  ;;  %v7283_v57 = vld [vmem:[%s10154_s2 + $0x884] ss:$16 sps:$4 sm:$0xff]   ;;  %v7286_v58 = vld [vmem:[%s10154_s2 + $0x88c] ss:$16 sps:$4 sm:$0xff]  }
 0x233   :  { %2136 = vmatpush1.bf16.msra.mxu0 %v7197_v59  ;;  %2218 = vmatpush1.bf16.msra.mxu1 %v7200_v60  ;;  %v7281_v59 = vld [vmem:[%s10154_s2 + $0x880] ss:$16 sps:$4 sm:$0xff]   ;;  %v7284_v60 = vld [vmem:[%s10154_s2 + $0x888] ss:$16 sps:$4 sm:$0xff]  }
 0x234   :  { %2137 = vmatprep.subr.bf16.mxu0 %v7205_v61  ;;  %2219 = vmatprep.subr.bf16.mxu1 %v7208_v62  ;;  %v7289_v61 = vld [vmem:[%s10154_s2 + $0x8a4] ss:$16 sps:$4 sm:$0xff]   ;;  %v7292_v62 = vld [vmem:[%s10154_s2 + $0x8ac] ss:$16 sps:$4 sm:$0xff]  }
 0x237   :  { %2138 = vmatpush1.bf16.msra.mxu0 %v7203_v63  ;;  %2220 = vmatpush1.bf16.msra.mxu1 %v7206_v0  ;;  %v7287_v63 = vld [vmem:[%s10154_s2 + $0x8a0] ss:$16 sps:$4 sm:$0xff]   ;;  %v7290_v0 = vld [vmem:[%s10154_s2 + $0x8a8] ss:$16 sps:$4 sm:$0xff]  }
 0x238   :  { %2139 = vmatprep.subr.bf16.mxu0 %v7211_v1  ;;  %2221 = vmatprep.subr.bf16.mxu1 %v7214_v2  ;;  %v7295_v1 = vld [vmem:[%s10154_s2 + $0x8c4] ss:$16 sps:$4 sm:$0xff]   ;;  %v7298_v2 = vld [vmem:[%s10154_s2 + $0x8cc] ss:$16 sps:$4 sm:$0xff]  }
 0x23b   :  { %2140 = vmatpush1.bf16.msra.mxu0 %v7209_v3  ;;  %2222 = vmatpush1.bf16.msra.mxu1 %v7212_v4  ;;  %v7293_v3 = vld [vmem:[%s10154_s2 + $0x8c0] ss:$16 sps:$4 sm:$0xff]   ;;  %v7296_v4 = vld [vmem:[%s10154_s2 + $0x8c8] ss:$16 sps:$4 sm:$0xff]  }
 0x23c   :  { %2141 = vmatprep.subr.bf16.mxu0 %v7217_v5  ;;  %2223 = vmatprep.subr.bf16.mxu1 %v7220_v6  ;;  %v7301_v5 = vld [vmem:[%s10154_s2 + $0x8e4] ss:$16 sps:$4 sm:$0xff]   ;;  %v7304_v6 = vld [vmem:[%s10154_s2 + $0x8ec] ss:$16 sps:$4 sm:$0xff]  }
 0x23f   :  { %2142 = vmatpush1.bf16.msra.mxu0 %v7215_v7  ;;  %2224 = vmatpush1.bf16.msra.mxu1 %v7218_v8  ;;  %v7299_v7 = vld [vmem:[%s10154_s2 + $0x8e0] ss:$16 sps:$4 sm:$0xff]   ;;  %v7302_v8 = vld [vmem:[%s10154_s2 + $0x8e8] ss:$16 sps:$4 sm:$0xff]  }
 0x240   :  { %2143 = vmatprep.subr.bf16.mxu0 %v7223_v9  ;;  %2225 = vmatprep.subr.bf16.mxu1 %v7226_v11  ;;  %v7307_v9 = vld [vmem:[%s10154_s2 + $0x904] ss:$16 sps:$4 sm:$0xff]   ;;  %v7310_v11 = vld [vmem:[%s10154_s2 + $0x90c] ss:$16 sps:$4 sm:$0xff]  }
 0x243   :  { %2144 = vmatpush1.bf16.msra.mxu0 %v7221_v12  ;;  %2226 = vmatpush1.bf16.msra.mxu1 %v7224_v13  ;;  %v7305_v12 = vld [vmem:[%s10154_s2 + $0x900] ss:$16 sps:$4 sm:$0xff]   ;;  %v7308_v13 = vld [vmem:[%s10154_s2 + $0x908] ss:$16 sps:$4 sm:$0xff]  }
 0x244   :  { %2145 = vmatprep.subr.bf16.mxu0 %v7229_v14  ;;  %2227 = vmatprep.subr.bf16.mxu1 %v7232_v16  ;;  %v7313_v14 = vld [vmem:[%s10154_s2 + $0x924] ss:$16 sps:$4 sm:$0xff]   ;;  %v7316_v16 = vld [vmem:[%s10154_s2 + $0x92c] ss:$16 sps:$4 sm:$0xff]  }
 0x247   :  { %2146 = vmatpush1.bf16.msra.mxu0 %v7227_v17  ;;  %2228 = vmatpush1.bf16.msra.mxu1 %v7230_v18  ;;  %v7311_v17 = vld [vmem:[%s10154_s2 + $0x920] ss:$16 sps:$4 sm:$0xff]   ;;  %v7314_v18 = vld [vmem:[%s10154_s2 + $0x928] ss:$16 sps:$4 sm:$0xff]  }
 0x248   :  { %2147 = vmatprep.subr.bf16.mxu0 %v7235_v19  ;;  %2229 = vmatprep.subr.bf16.mxu1 %v7238_v20  ;;  %v7319_v19 = vld [vmem:[%s10154_s2 + $0x944] ss:$16 sps:$4 sm:$0xff]   ;;  %v7322_v20 = vld [vmem:[%s10154_s2 + $0x94c] ss:$16 sps:$4 sm:$0xff]  }
 0x24b   :  { %2148 = vmatpush1.bf16.msra.mxu0 %v7233_v21  ;;  %2230 = vmatpush1.bf16.msra.mxu1 %v7236_v22  ;;  %v7317_v21 = vld [vmem:[%s10154_s2 + $0x940] ss:$16 sps:$4 sm:$0xff]   ;;  %v7320_v22 = vld [vmem:[%s10154_s2 + $0x948] ss:$16 sps:$4 sm:$0xff]  }
 0x24c   :  { %2149 = vmatprep.subr.bf16.mxu0 %v7241_v23  ;;  %2231 = vmatprep.subr.bf16.mxu1 %v7244_v24  ;;  %v7325_v23 = vld [vmem:[%s10154_s2 + $0x964] ss:$16 sps:$4 sm:$0xff]   ;;  %v7328_v24 = vld [vmem:[%s10154_s2 + $0x96c] ss:$16 sps:$4 sm:$0xff]  }
 0x24f   :  { %2150 = vmatpush1.bf16.msra.mxu0 %v7239_v25  ;;  %2232 = vmatpush1.bf16.msra.mxu1 %v7242_v26  ;;  %v7323_v25 = vld [vmem:[%s10154_s2 + $0x960] ss:$16 sps:$4 sm:$0xff]   ;;  %v7326_v26 = vld [vmem:[%s10154_s2 + $0x968] ss:$16 sps:$4 sm:$0xff]  }
 0x250   :  { %2151 = vmatprep.subr.bf16.mxu0 %v7247_v28  ;;  %2233 = vmatprep.subr.bf16.mxu1 %v7250_v29  ;;  %v7334_v28 = vld [vmem:[%s10154_s2 + $0x98c] ss:$16 sps:$4 sm:$0xff]   ;;  %v7329_v29 = vld [vmem:[%s10154_s2 + $0x980] ss:$16 sps:$4 sm:$0xff]  }
 0x253   :  { %2152 = vmatpush1.bf16.msra.mxu0 %v7245_v30  ;;  %2234 = vmatpush1.bf16.msra.mxu1 %v7248_v10  ;;  %v7332_v30 = vld [vmem:[%s10154_s2 + $0x988] ss:$16 sps:$4 sm:$0xff]   ;;  %v7337_v10 = vld [vmem:[%s10154_s2 + $0x9a4] ss:$16 sps:$4 sm:$0xff]  }
 0x254   :  { %2153 = vmatprep.subr.bf16.mxu0 %v7253_v32  ;;  %2235 = vmatprep.subr.bf16.mxu1 %v7256_v33  ;;  %v7335_v32 = vld [vmem:[%s10154_s2 + $0x9a0] ss:$16 sps:$4 sm:$0xff]   ;;  %v7338_v33 = vld [vmem:[%s10154_s2 + $0x9a8] ss:$16 sps:$4 sm:$0xff]  }
 0x257   :  { %2154 = vmatpush1.bf16.msra.mxu0 %v7251_v35  ;;  %2236 = vmatpush1.bf16.msra.mxu1 %v7254_v15  ;;  %v7343_v35 = vld [vmem:[%s10154_s2 + $0x9c4] ss:$16 sps:$4 sm:$0xff]   ;;  %v7346_v15 = vld [vmem:[%s10154_s2 + $0x9cc] ss:$16 sps:$4 sm:$0xff]  }
 0x258   :  { %3046 = vmatprep.subr.bf16.mxu0 %v7259_v41  ;;  %3128 = vmatprep.subr.bf16.mxu1 %v7262_v42  ;;  %v7344_v41 = vld [vmem:[%s10154_s2 + $0x9c8] ss:$16 sps:$4 sm:$0xff]   ;;  %v7349_v42 = vld [vmem:[%s10154_s2 + $0x9e4] ss:$16 sps:$4 sm:$0xff]  }
 0x25a   :  { %2156 = vmatmul.mubr.bf16.vlgmr.msra.gmra.mrb[8].mxu0 %v1288_v44  ;;  %2238 = vmatmul.mubr.bf16.vlgmr.msra.gmra.mrb[8].mxu1 %v1288_v44  ;;  %v7350_v44 = vld [vmem:[%s10154_s2 + $0x9e8] ss:$16 sps:$4 sm:$0xff]  }
 0x25b   :  { %3047 = vmatpush1.bf16.msra.mxu0 %v7257_v37  ;;  %3129 = vmatpush1.bf16.msra.mxu1 %v7260_v43  ;;  %v7352_v37 = vld [vmem:[%s10154_s2 + $0x9ec] ss:$16 sps:$4 sm:$0xff]   ;;  %v7347_v43 = vld [vmem:[%s10154_s2 + $0x9e0] ss:$16 sps:$4 sm:$0xff]  }
 0x25c   :  { %3048 = vmatprep.subr.bf16.mxu0 %v7265_v45  ;;  %3130 = vmatprep.subr.bf16.mxu1 %v7268_v46  ;;  %v7355_v45 = vld [vmem:[%s10154_s2 + $0xa04] ss:$16 sps:$4 sm:$0xff]   ;;  %v7358_v46 = vld [vmem:[%s10154_s2 + $0xa0c] ss:$16 sps:$4 sm:$0xff]  }
 0x25f   :  { %3049 = vmatpush1.bf16.msra.mxu0 %v7263_v39  ;;  %3131 = vmatpush1.bf16.msra.mxu1 %v7266_v47  ;;  %v9035_v39 = vld [vmem:[%s10156_s4 + $0x2] ss:$8 sm:$0xf] }
 0x260   :  { %3050 = vmatprep.subr.bf16.mxu0 %v7271_v48  ;;  %3132 = vmatprep.subr.bf16.mxu1 %v7274_v49  ;;  %v1425_v47 = vrot.slane %v9035_v39, %v8221_v38  ;;  %v1429_v48 = vrot.slane %v9035_v39, %v8229_v40  ;;  %v1437_v49 = vrot.slane %v9035_v39, %v8248_v55 }
 0x263   :  { %3051 = vmatpush1.bf16.msra.mxu0 %v7269_v50  ;;  %3133 = vmatpush1.bf16.msra.mxu1 %v7272_v51 }
 0x264   :  { %3052 = vmatprep.subr.bf16.mxu0 %v7277_v52  ;;  %3134 = vmatprep.subr.bf16.mxu1 %v7280_v53 }
 0x267   :  { %3053 = vmatpush1.bf16.msra.mxu0 %v7275_v54  ;;  %3135 = vmatpush1.bf16.msra.mxu1 %v7278_v56 }
 0x268   :  { %3054 = vmatprep.subr.bf16.mxu0 %v7283_v57  ;;  %3136 = vmatprep.subr.bf16.mxu1 %v7286_v58 }
 0x26b   :  { %3055 = vmatpush1.bf16.msra.mxu0 %v7281_v59  ;;  %3137 = vmatpush1.bf16.msra.mxu1 %v7284_v60 }
 0x26c   :  { %3056 = vmatprep.subr.bf16.mxu0 %v7289_v61  ;;  %3138 = vmatprep.subr.bf16.mxu1 %v7292_v62 }
 0x26f   :  { %3057 = vmatpush1.bf16.msra.mxu0 %v7287_v63  ;;  %3139 = vmatpush1.bf16.msra.mxu1 %v7290_v0 }
 0x270   :  { %3058 = vmatprep.subr.bf16.mxu0 %v7295_v1  ;;  %3140 = vmatprep.subr.bf16.mxu1 %v7298_v2  ;;  %v7353_v2 = vld [vmem:[%s10154_s2 + $0xa00] ss:$16 sps:$4 sm:$0xff]  }
 0x273   :  { %3059 = vmatpush1.bf16.msra.mxu0 %v7293_v3  ;;  %3141 = vmatpush1.bf16.msra.mxu1 %v7296_v4  ;;  %v7356_v3 = vld [vmem:[%s10154_s2 + $0xa08] ss:$16 sps:$4 sm:$0xff]  }
 0x274   :  { %3060 = vmatprep.subr.bf16.mxu0 %v7301_v5  ;;  %3142 = vmatprep.subr.bf16.mxu1 %v7304_v6  ;;  %v7361_v5 = vld [vmem:[%s10154_s2 + $0xa24] ss:$16 sps:$4 sm:$0xff]   ;;  %v7364_v6 = vld [vmem:[%s10154_s2 + $0xa2c] ss:$16 sps:$4 sm:$0xff]  }
 0x277   :  { %3061 = vmatpush1.bf16.msra.mxu0 %v7299_v7  ;;  %3143 = vmatpush1.bf16.msra.mxu1 %v7302_v8  ;;  %v7359_v8 = vld [vmem:[%s10154_s2 + $0xa20] ss:$16 sps:$4 sm:$0xff]  }
 0x278   :  { %3062 = vmatprep.subr.bf16.mxu0 %v7307_v9  ;;  %3144 = vmatprep.subr.bf16.mxu1 %v7310_v11  ;;  %v7362_v9 = vld [vmem:[%s10154_s2 + $0xa28] ss:$16 sps:$4 sm:$0xff]   ;;  %v7367_v11 = vld [vmem:[%s10154_s2 + $0xa44] ss:$16 sps:$4 sm:$0xff]  }
 0x27b   :  { %3063 = vmatpush1.bf16.msra.mxu0 %v7305_v12  ;;  %3145 = vmatpush1.bf16.msra.mxu1 %v7308_v13  ;;  %v7370_v12 = vld [vmem:[%s10154_s2 + $0xa4c] ss:$16 sps:$4 sm:$0xff]   ;;  %v7365_v13 = vld [vmem:[%s10154_s2 + $0xa40] ss:$16 sps:$4 sm:$0xff]  }
 0x27c   :  { %3064 = vmatprep.subr.bf16.mxu0 %v7313_v14  ;;  %3146 = vmatprep.subr.bf16.mxu1 %v7316_v16  ;;  %v7368_v14 = vld [vmem:[%s10154_s2 + $0xa48] ss:$16 sps:$4 sm:$0xff]   ;;  %v7373_v16 = vld [vmem:[%s10154_s2 + $0xa64] ss:$16 sps:$4 sm:$0xff]  }
 0x27f   :  { %3065 = vmatpush1.bf16.msra.mxu0 %v7311_v17  ;;  %3147 = vmatpush1.bf16.msra.mxu1 %v7314_v18  ;;  %v7376_v17 = vld [vmem:[%s10154_s2 + $0xa6c] ss:$16 sps:$4 sm:$0xff]   ;;  %v7371_v18 = vld [vmem:[%s10154_s2 + $0xa60] ss:$16 sps:$4 sm:$0xff]  }
 0x280   :  { %3066 = vmatprep.subr.bf16.mxu0 %v7319_v19  ;;  %3148 = vmatprep.subr.bf16.mxu1 %v7322_v20  ;;  %v7374_v19 = vld [vmem:[%s10154_s2 + $0xa68] ss:$16 sps:$4 sm:$0xff]   ;;  %v7379_v20 = vld [vmem:[%s10154_s2 + $0xa84] ss:$16 sps:$4 sm:$0xff]  }
 0x283   :  { %3067 = vmatpush1.bf16.msra.mxu0 %v7317_v21  ;;  %3149 = vmatpush1.bf16.msra.mxu1 %v7320_v22  ;;  %v7382_v21 = vld [vmem:[%s10154_s2 + $0xa8c] ss:$16 sps:$4 sm:$0xff]   ;;  %v7377_v22 = vld [vmem:[%s10154_s2 + $0xa80] ss:$16 sps:$4 sm:$0xff]  }
 0x284   :  { %3068 = vmatprep.subr.bf16.mxu0 %v7325_v23  ;;  %3150 = vmatprep.subr.bf16.mxu1 %v7328_v24  ;;  %v7380_v23 = vld [vmem:[%s10154_s2 + $0xa88] ss:$16 sps:$4 sm:$0xff]   ;;  %v7385_v24 = vld [vmem:[%s10154_s2 + $0xaa4] ss:$16 sps:$4 sm:$0xff]  }
 0x287   :  { %3069 = vmatpush1.bf16.msra.mxu0 %v7323_v25  ;;  %3151 = vmatpush1.bf16.msra.mxu1 %v7326_v26  ;;  %v7388_v25 = vld [vmem:[%s10154_s2 + $0xaac] ss:$16 sps:$4 sm:$0xff]   ;;  %v7383_v26 = vld [vmem:[%s10154_s2 + $0xaa0] ss:$16 sps:$4 sm:$0xff]  }
 0x288   :  { %3070 = vmatprep.subr.bf16.mxu0 %v7331_v27  ;;  %3152 = vmatprep.subr.bf16.mxu1 %v7334_v28  ;;  %v7386_v27 = vld [vmem:[%s10154_s2 + $0xaa8] ss:$16 sps:$4 sm:$0xff]   ;;  %v7391_v28 = vld [vmem:[%s10154_s2 + $0xac4] ss:$16 sps:$4 sm:$0xff]  }
 0x28b   :  { %3071 = vmatpush1.bf16.msra.mxu0 %v7329_v29  ;;  %3153 = vmatpush1.bf16.msra.mxu1 %v7332_v30  ;;  %v7394_v29 = vld [vmem:[%s10154_s2 + $0xacc] ss:$16 sps:$4 sm:$0xff]   ;;  %v7389_v30 = vld [vmem:[%s10154_s2 + $0xac0] ss:$16 sps:$4 sm:$0xff]  }
 0x28c   :  { %3072 = vmatprep.subr.bf16.mxu0 %v7337_v10  ;;  %3154 = vmatprep.subr.bf16.mxu1 %v7340_v31  ;;  %v7392_v10 = vld [vmem:[%s10154_s2 + $0xac8] ss:$16 sps:$4 sm:$0xff]   ;;  %v7397_v31 = vld [vmem:[%s10154_s2 + $0xae4] ss:$16 sps:$4 sm:$0xff]  }
 0x28f   :  { %3073 = vmatpush1.bf16.msra.mxu0 %v7335_v32  ;;  %3155 = vmatpush1.bf16.msra.mxu1 %v7338_v33  ;;  %v7400_v32 = vld [vmem:[%s10154_s2 + $0xaec] ss:$16 sps:$4 sm:$0xff]   ;;  %v7395_v33 = vld [vmem:[%s10154_s2 + $0xae0] ss:$16 sps:$4 sm:$0xff]  }
 0x290   :  { %3074 = vmatprep.subr.bf16.mxu0 %v7343_v35  ;;  %3156 = vmatprep.subr.bf16.mxu1 %v7346_v15  ;;  %v7398_v35 = vld [vmem:[%s10154_s2 + $0xae8] ss:$16 sps:$4 sm:$0xff]   ;;  %v7403_v15 = vld [vmem:[%s10154_s2 + $0xb04] ss:$16 sps:$4 sm:$0xff]  }
 0x293   :  { %3075 = vmatpush1.bf16.msra.mxu0 %v7341_v36  ;;  %3157 = vmatpush1.bf16.msra.mxu1 %v7344_v41  ;;  %v7406_v36 = vld [vmem:[%s10154_s2 + $0xb0c] ss:$16 sps:$4 sm:$0xff]   ;;  %v7401_v41 = vld [vmem:[%s10154_s2 + $0xb00] ss:$16 sps:$4 sm:$0xff]  }
 0x294   :  { %3076 = vmatprep.subr.bf16.mxu0 %v7349_v42  ;;  %3158 = vmatprep.subr.bf16.mxu1 %v7352_v37  ;;  %v7404_v42 = vld [vmem:[%s10154_s2 + $0xb08] ss:$16 sps:$4 sm:$0xff]   ;;  %v7409_v37 = vld [vmem:[%s10154_s2 + $0xb24] ss:$16 sps:$4 sm:$0xff]  }
 0x297   :  { %3077 = vmatpush1.bf16.msra.mxu0 %v7347_v43  ;;  %3159 = vmatpush1.bf16.msra.mxu1 %v7350_v44  ;;  %v7412_v43 = vld [vmem:[%s10154_s2 + $0xb2c] ss:$16 sps:$4 sm:$0xff]   ;;  %v7407_v44 = vld [vmem:[%s10154_s2 + $0xb20] ss:$16 sps:$4 sm:$0xff]  }
 0x298   :  { %3087 = vmatprep.subr.bf16.mxu0 %v7355_v45  ;;  %3169 = vmatprep.subr.bf16.mxu1 %v7358_v46  ;;  %v7410_v45 = vld [vmem:[%s10154_s2 + $0xb28] ss:$16 sps:$4 sm:$0xff]   ;;  %v7415_v46 = vld [vmem:[%s10154_s2 + $0xb44] ss:$16 sps:$4 sm:$0xff]  }
 0x32d   :  { %v2157_v50 = vpop.f32.mrb[8].mxu0  ;;  %v9043_v51 = vpop.f32.mrb[8].mxu1 }
 0x32e   :  { %v6767_v52 = vadd.f32 %v2157_v50, %v1425_v47  ;;  %v2159_v53 = vpop.f32.mrb[9].mxu0  ;;  %v2241_v54 = vpop.f32.mrb[9].mxu1  ;;  %v7418_v47 = vld [vmem:[%s10154_s2 + $0xb4c] ss:$16 sps:$4 sm:$0xff]   ;;  %v7421_v50 = vld [vmem:[%s10154_s2 + $0xb64] ss:$16 sps:$4 sm:$0xff]  }
 0x32f   :  { %v6768_v56 = vadd.f32 %v2159_v53, %v1429_v48  ;;  %v6770_v57 = vadd.f32 %v2241_v54, %v1437_v49  ;;  %v2161_v58 = vpop.f32.mrb[10].mxu0  ;;  %v2243_v59 = vpop.f32.mrb[10].mxu1  ;;  %v7413_v48 = vld [vmem:[%s10154_s2 + $0xb40] ss:$16 sps:$4 sm:$0xff]   ;;  %v7416_v49 = vld [vmem:[%s10154_s2 + $0xb48] ss:$16 sps:$4 sm:$0xff]  }
 0x330   :  { %v2246_v60 = vmax.f32 %v6767_v52, 0.0  ;;  %v2162_v61 = vpop.f32.mrb[11].mxu0  ;;  %v2244_v62 = vpop.f32.mrb[11].mxu1  ;;  %v7424_v52 = vld [vmem:[%s10154_s2 + $0xb6c] ss:$16 sps:$4 sm:$0xff]  }
 0x331   :  { %v2247_v63 = vmax.f32 %v6768_v56, 0.0  ;;  %v2249_v0 = vmax.f32 %v6770_v57, 0.0  ;;  %v7419_v53 = vld [vmem:[%s10154_s2 + $0xb60] ss:$16 sps:$4 sm:$0xff]   ;;  %v7422_v54 = vld [vmem:[%s10154_s2 + $0xb68] ss:$16 sps:$4 sm:$0xff]  }
 0x332   :  { %v2250_v4 = vpack.c.bf16 %v2246_v60, %v2246_v60  ;;  %v7427_v56 = vld [vmem:[%s10154_s2 + $0xb84] ss:$16 sps:$4 sm:$0xff]   ;;  %v7430_v57 = vld [vmem:[%s10154_s2 + $0xb8c] ss:$16 sps:$4 sm:$0xff]   ;;  %v7425_v58 = vld [vmem:[%s10154_s2 + $0xb80] ss:$16 sps:$4 sm:$0xff]  }
 0x333   :  { %v2251_v1 = vpack.c.bf16 %v2247_v63, %v2247_v63  ;;  %v2253_v7 = vpack.c.bf16 %v2249_v0, %v2249_v0  ;;  %v7428_v59 = vld [vmem:[%s10154_s2 + $0xb88] ss:$16 sps:$4 sm:$0xff]   ;;  %v7433_v60 = vld [vmem:[%s10154_s2 + $0xba4] ss:$16 sps:$4 sm:$0xff]   ;;  %v7436_v61 = vld [vmem:[%s10154_s2 + $0xbac] ss:$16 sps:$4 sm:$0xff]   ;;  %v1433_v0 = vrot.slane %v9035_v39, %v8351_v34 }
 0x334   :  { %v7431_v62 = vld [vmem:[%s10154_s2 + $0xba0] ss:$16 sps:$4 sm:$0xff]   ;;  %v7434_v63 = vld [vmem:[%s10154_s2 + $0xba8] ss:$16 sps:$4 sm:$0xff]  }
 0x335   :  { %3078 = vmatprep.mubr.bf16.mxu0 %v2251_v1  ;;  %3160 = vmatprep.mubr.bf16.mxu1 %v2251_v1  ;;  %v7439_v1 = vld [vmem:[%s10154_s2 + $0xbc4] ss:$16 sps:$4 sm:$0xff]   ;;  %v7440_v39 = vld [vmem:[%s10154_s2 + $0xbc8] ss:$16 sps:$4 sm:$0xff]  }
 0x336   :  { %3079 = vmatmul.mubr.bf16.vlgmr.msra.gmra.mrb[12].mxu0 %v2250_v4  ;;  %3161 = vmatmul.mubr.bf16.vlgmr.msra.gmra.mrb[12].mxu1 %v2250_v4  ;;  %v6769_v4 = vadd.f32 %v9043_v51, %v1433_v0  ;;  %v7446_v51 = vld [vmem:[%s10154_s2 + $0xbe8] ss:$16 sps:$4 sm:$0xff]   ;;  %v7523_v0 = vld [vmem:[%s10154_s2 + $0xd84] ss:$16 sps:$4 sm:$0xff]  }
 0x337   :  { %3088 = vmatpush1.bf16.msra.mxu0 %v7353_v2  ;;  %3170 = vmatpush1.bf16.msra.mxu1 %v7356_v3  ;;  %v7442_v2 = vld [vmem:[%s10154_s2 + $0xbcc] ss:$16 sps:$4 sm:$0xff]   ;;  %v7437_v3 = vld [vmem:[%s10154_s2 + $0xbc0] ss:$16 sps:$4 sm:$0xff]  }
 0x338   :  { %3119 = vmatprep.mubr.bf16.mxu0 %v2253_v7  ;;  %3201 = vmatprep.mubr.bf16.mxu1 %v2253_v7  ;;  %v7443_v7 = vld [vmem:[%s10154_s2 + $0xbe0] ss:$16 sps:$4 sm:$0xff]  }
 0x339   :  { %3089 = vmatprep.subr.bf16.mxu0 %v7361_v5  ;;  %3171 = vmatprep.subr.bf16.mxu1 %v7364_v6  ;;  %v7445_v5 = vld [vmem:[%s10154_s2 + $0xbe4] ss:$16 sps:$4 sm:$0xff]   ;;  %v7448_v6 = vld [vmem:[%s10154_s2 + $0xbec] ss:$16 sps:$4 sm:$0xff]  }
 0x33b   :  { %3090 = vmatpush1.bf16.msra.mxu0 %v7359_v8  ;;  %3172 = vmatpush1.bf16.msra.mxu1 %v7362_v9  ;;  %v2248_v8 = vmax.f32 %v6769_v4, 0.0  ;;  %v7451_v9 = vld [vmem:[%s10154_s2 + $0xc04] ss:$16 sps:$4 sm:$0xff]   ;;  %v7532_v4 = vld [vmem:[%s10154_s2 + $0xdac] ss:$16 sps:$4 sm:$0xff]  }
 0x33c   :  { %3091 = vmatprep.subr.bf16.mxu0 %v7367_v11  ;;  %3173 = vmatprep.subr.bf16.mxu1 %v7370_v12  ;;  %v7454_v11 = vld [vmem:[%s10154_s2 + $0xc0c] ss:$16 sps:$4 sm:$0xff]   ;;  %v7449_v12 = vld [vmem:[%s10154_s2 + $0xc00] ss:$16 sps:$4 sm:$0xff]  }
 0x33f   :  { %3092 = vmatpush1.bf16.msra.mxu0 %v7365_v13  ;;  %3174 = vmatpush1.bf16.msra.mxu1 %v7368_v14  ;;  %v7452_v13 = vld [vmem:[%s10154_s2 + $0xc08] ss:$16 sps:$4 sm:$0xff]   ;;  %v2252_v14 = vpack.c.bf16 %v2248_v8, %v2248_v8  ;;  %v7533_v8 = vld [vmem:[%s10154_s2 + $0xdc0] ss:$16 sps:$4 sm:$0xff]  }
 0x340   :  { %3093 = vmatprep.subr.bf16.mxu0 %v7373_v16  ;;  %3175 = vmatprep.subr.bf16.mxu1 %v7376_v17  ;;  %v7457_v16 = vld [vmem:[%s10154_s2 + $0xc24] ss:$16 sps:$4 sm:$0xff]   ;;  %v7460_v17 = vld [vmem:[%s10154_s2 + $0xc2c] ss:$16 sps:$4 sm:$0xff]  }
 0x343   :  { %3094 = vmatpush1.bf16.msra.mxu0 %v7371_v18  ;;  %3176 = vmatpush1.bf16.msra.mxu1 %v7374_v19  ;;  %v7455_v18 = vld [vmem:[%s10154_s2 + $0xc20] ss:$16 sps:$4 sm:$0xff]   ;;  %v7458_v19 = vld [vmem:[%s10154_s2 + $0xc28] ss:$16 sps:$4 sm:$0xff]  }
 0x344   :  { %3095 = vmatprep.subr.bf16.mxu0 %v7379_v20  ;;  %3177 = vmatprep.subr.bf16.mxu1 %v7382_v21  ;;  %v7463_v20 = vld [vmem:[%s10154_s2 + $0xc44] ss:$16 sps:$4 sm:$0xff]   ;;  %v7466_v21 = vld [vmem:[%s10154_s2 + $0xc4c] ss:$16 sps:$4 sm:$0xff]  }
 0x347   :  { %3096 = vmatpush1.bf16.msra.mxu0 %v7377_v22  ;;  %3178 = vmatpush1.bf16.msra.mxu1 %v7380_v23  ;;  %v7461_v22 = vld [vmem:[%s10154_s2 + $0xc40] ss:$16 sps:$4 sm:$0xff]   ;;  %v7464_v23 = vld [vmem:[%s10154_s2 + $0xc48] ss:$16 sps:$4 sm:$0xff]  }
 0x348   :  { %3097 = vmatprep.subr.bf16.mxu0 %v7385_v24  ;;  %3179 = vmatprep.subr.bf16.mxu1 %v7388_v25  ;;  %v7469_v24 = vld [vmem:[%s10154_s2 + $0xc64] ss:$16 sps:$4 sm:$0xff]   ;;  %v7472_v25 = vld [vmem:[%s10154_s2 + $0xc6c] ss:$16 sps:$4 sm:$0xff]  }
 0x34b   :  { %3098 = vmatpush1.bf16.msra.mxu0 %v7383_v26  ;;  %3180 = vmatpush1.bf16.msra.mxu1 %v7386_v27  ;;  %v7467_v26 = vld [vmem:[%s10154_s2 + $0xc60] ss:$16 sps:$4 sm:$0xff]   ;;  %v7470_v27 = vld [vmem:[%s10154_s2 + $0xc68] ss:$16 sps:$4 sm:$0xff]  }
 0x34c   :  { %3099 = vmatprep.subr.bf16.mxu0 %v7391_v28  ;;  %3181 = vmatprep.subr.bf16.mxu1 %v7394_v29  ;;  %v7475_v28 = vld [vmem:[%s10154_s2 + $0xc84] ss:$16 sps:$4 sm:$0xff]   ;;  %v7478_v29 = vld [vmem:[%s10154_s2 + $0xc8c] ss:$16 sps:$4 sm:$0xff]  }
 0x34f   :  { %3100 = vmatpush1.bf16.msra.mxu0 %v7389_v30  ;;  %3182 = vmatpush1.bf16.msra.mxu1 %v7392_v10  ;;  %v7473_v30 = vld [vmem:[%s10154_s2 + $0xc80] ss:$16 sps:$4 sm:$0xff]   ;;  %v7476_v10 = vld [vmem:[%s10154_s2 + $0xc88] ss:$16 sps:$4 sm:$0xff]  }
 0x350   :  { %3101 = vmatprep.subr.bf16.mxu0 %v7397_v31  ;;  %3183 = vmatprep.subr.bf16.mxu1 %v7400_v32  ;;  %v7481_v31 = vld [vmem:[%s10154_s2 + $0xca4] ss:$16 sps:$4 sm:$0xff]   ;;  %v7484_v32 = vld [vmem:[%s10154_s2 + $0xcac] ss:$16 sps:$4 sm:$0xff]  }
 0x353   :  { %3102 = vmatpush1.bf16.msra.mxu0 %v7395_v33  ;;  %3184 = vmatpush1.bf16.msra.mxu1 %v7398_v35  ;;  %v7479_v33 = vld [vmem:[%s10154_s2 + $0xca0] ss:$16 sps:$4 sm:$0xff]   ;;  %v7482_v35 = vld [vmem:[%s10154_s2 + $0xca8] ss:$16 sps:$4 sm:$0xff]  }
 0x354   :  { %3103 = vmatprep.subr.bf16.mxu0 %v7403_v15  ;;  %3185 = vmatprep.subr.bf16.mxu1 %v7406_v36  ;;  %v7487_v15 = vld [vmem:[%s10154_s2 + $0xcc4] ss:$16 sps:$4 sm:$0xff]   ;;  %v7490_v36 = vld [vmem:[%s10154_s2 + $0xccc] ss:$16 sps:$4 sm:$0xff]  }
 0x357   :  { %3104 = vmatpush1.bf16.msra.mxu0 %v7401_v41  ;;  %3186 = vmatpush1.bf16.msra.mxu1 %v7404_v42  ;;  %v7485_v41 = vld [vmem:[%s10154_s2 + $0xcc0] ss:$16 sps:$4 sm:$0xff]   ;;  %v7488_v42 = vld [vmem:[%s10154_s2 + $0xcc8] ss:$16 sps:$4 sm:$0xff]  }
 0x358   :  { %3105 = vmatprep.subr.bf16.mxu0 %v7409_v37  ;;  %3187 = vmatprep.subr.bf16.mxu1 %v7412_v43  ;;  %v7493_v37 = vld [vmem:[%s10154_s2 + $0xce4] ss:$16 sps:$4 sm:$0xff]   ;;  %v7496_v43 = vld [vmem:[%s10154_s2 + $0xcec] ss:$16 sps:$4 sm:$0xff]  }
 0x35b   :  { %3106 = vmatpush1.bf16.msra.mxu0 %v7407_v44  ;;  %3188 = vmatpush1.bf16.msra.mxu1 %v7410_v45  ;;  %v7491_v44 = vld [vmem:[%s10154_s2 + $0xce0] ss:$16 sps:$4 sm:$0xff]   ;;  %v7494_v45 = vld [vmem:[%s10154_s2 + $0xce8] ss:$16 sps:$4 sm:$0xff]  }
 0x35c   :  { %3107 = vmatprep.subr.bf16.mxu0 %v7415_v46  ;;  %3189 = vmatprep.subr.bf16.mxu1 %v7418_v47  ;;  %v7499_v46 = vld [vmem:[%s10154_s2 + $0xd04] ss:$16 sps:$4 sm:$0xff]   ;;  %v7502_v47 = vld [vmem:[%s10154_s2 + $0xd0c] ss:$16 sps:$4 sm:$0xff]  }
 0x35f   :  { %3108 = vmatpush1.bf16.msra.mxu0 %v7413_v48  ;;  %3190 = vmatpush1.bf16.msra.mxu1 %v7416_v49  ;;  %v7497_v48 = vld [vmem:[%s10154_s2 + $0xd00] ss:$16 sps:$4 sm:$0xff]   ;;  %v7500_v49 = vld [vmem:[%s10154_s2 + $0xd08] ss:$16 sps:$4 sm:$0xff]  }
 0x360   :  { %3109 = vmatprep.subr.bf16.mxu0 %v7421_v50  ;;  %3191 = vmatprep.subr.bf16.mxu1 %v7424_v52  ;;  %v7505_v50 = vld [vmem:[%s10154_s2 + $0xd24] ss:$16 sps:$4 sm:$0xff]   ;;  %v7508_v52 = vld [vmem:[%s10154_s2 + $0xd2c] ss:$16 sps:$4 sm:$0xff]  }
 0x363   :  { %3110 = vmatpush1.bf16.msra.mxu0 %v7419_v53  ;;  %3192 = vmatpush1.bf16.msra.mxu1 %v7422_v54  ;;  %v7503_v53 = vld [vmem:[%s10154_s2 + $0xd20] ss:$16 sps:$4 sm:$0xff]   ;;  %v7506_v54 = vld [vmem:[%s10154_s2 + $0xd28] ss:$16 sps:$4 sm:$0xff]  }
 0x364   :  { %3111 = vmatprep.subr.bf16.mxu0 %v7427_v56  ;;  %3193 = vmatprep.subr.bf16.mxu1 %v7430_v57  ;;  %v7511_v56 = vld [vmem:[%s10154_s2 + $0xd44] ss:$16 sps:$4 sm:$0xff]   ;;  %v7514_v57 = vld [vmem:[%s10154_s2 + $0xd4c] ss:$16 sps:$4 sm:$0xff]  }
 0x367   :  { %3112 = vmatpush1.bf16.msra.mxu0 %v7425_v58  ;;  %3194 = vmatpush1.bf16.msra.mxu1 %v7428_v59  ;;  %v7509_v58 = vld [vmem:[%s10154_s2 + $0xd40] ss:$16 sps:$4 sm:$0xff]   ;;  %v7512_v59 = vld [vmem:[%s10154_s2 + $0xd48] ss:$16 sps:$4 sm:$0xff]  }
 0x368   :  { %3113 = vmatprep.subr.bf16.mxu0 %v7433_v60  ;;  %3195 = vmatprep.subr.bf16.mxu1 %v7436_v61  ;;  %v7517_v60 = vld [vmem:[%s10154_s2 + $0xd64] ss:$16 sps:$4 sm:$0xff]   ;;  %v7520_v61 = vld [vmem:[%s10154_s2 + $0xd6c] ss:$16 sps:$4 sm:$0xff]  }
 0x36b   :  { %3114 = vmatpush1.bf16.msra.mxu0 %v7431_v62  ;;  %3196 = vmatpush1.bf16.msra.mxu1 %v7434_v63  ;;  %v7515_v62 = vld [vmem:[%s10154_s2 + $0xd60] ss:$16 sps:$4 sm:$0xff]   ;;  %v7518_v63 = vld [vmem:[%s10154_s2 + $0xd68] ss:$16 sps:$4 sm:$0xff]  }
 0x36c   :  { %3115 = vmatprep.subr.bf16.mxu0 %v7439_v1  ;;  %3197 = vmatprep.subr.bf16.mxu1 %v7442_v2  ;;  %v7526_v1 = vld [vmem:[%s10154_s2 + $0xd8c] ss:$16 sps:$4 sm:$0xff]   ;;  %v7521_v2 = vld [vmem:[%s10154_s2 + $0xd80] ss:$16 sps:$4 sm:$0xff]  }
 0x36f   :  { %3116 = vmatpush1.bf16.msra.mxu0 %v7437_v3  ;;  %3198 = vmatpush1.bf16.msra.mxu1 %v7440_v39  ;;  %v7524_v3 = vld [vmem:[%s10154_s2 + $0xd88] ss:$16 sps:$4 sm:$0xff]   ;;  %v7529_v39 = vld [vmem:[%s10154_s2 + $0xda4] ss:$16 sps:$4 sm:$0xff]  }
 0x370   :  { %3117 = vmatprep.subr.bf16.mxu0 %v7445_v5  ;;  %3199 = vmatprep.subr.bf16.mxu1 %v7448_v6  ;;  %v7527_v5 = vld [vmem:[%s10154_s2 + $0xda0] ss:$16 sps:$4 sm:$0xff]   ;;  %v7530_v6 = vld [vmem:[%s10154_s2 + $0xda8] ss:$16 sps:$4 sm:$0xff]  }
 0x373   :  { %3118 = vmatpush1.bf16.msra.mxu0 %v7443_v7  ;;  %3200 = vmatpush1.bf16.msra.mxu1 %v7446_v51  ;;  %v7535_v7 = vld [vmem:[%s10154_s2 + $0xdc4] ss:$16 sps:$4 sm:$0xff]   ;;  %v7538_v51 = vld [vmem:[%s10154_s2 + $0xdcc] ss:$16 sps:$4 sm:$0xff]  }
 0x374   :  { %4010 = vmatprep.subr.bf16.mxu0 %v7451_v9  ;;  %4092 = vmatprep.subr.bf16.mxu1 %v7454_v11  ;;  %v7536_v9 = vld [vmem:[%s10154_s2 + $0xdc8] ss:$16 sps:$4 sm:$0xff]   ;;  %v7541_v11 = vld [vmem:[%s10154_s2 + $0xde4] ss:$16 sps:$4 sm:$0xff]  }
 0x376   :  { %3120 = vmatmul.mubr.bf16.vlgmr.msra.gmra.mrb[12].mxu0 %v2252_v14  ;;  %3202 = vmatmul.mubr.bf16.vlgmr.msra.gmra.mrb[12].mxu1 %v2252_v14  ;;  %v7542_v14 = vld [vmem:[%s10154_s2 + $0xde8] ss:$16 sps:$4 sm:$0xff]  }
 0x377   :  { %4011 = vmatpush1.bf16.msra.mxu0 %v7449_v12  ;;  %4093 = vmatpush1.bf16.msra.mxu1 %v7452_v13  ;;  %v7544_v12 = vld [vmem:[%s10154_s2 + $0xdec] ss:$16 sps:$4 sm:$0xff]   ;;  %v7539_v13 = vld [vmem:[%s10154_s2 + $0xde0] ss:$16 sps:$4 sm:$0xff]  }
 0x378   :  { %4012 = vmatprep.subr.bf16.mxu0 %v7457_v16  ;;  %4094 = vmatprep.subr.bf16.mxu1 %v7460_v17  ;;  %v7547_v16 = vld [vmem:[%s10154_s2 + $0xe04] ss:$16 sps:$4 sm:$0xff]   ;;  %v7550_v17 = vld [vmem:[%s10154_s2 + $0xe0c] ss:$16 sps:$4 sm:$0xff]  }
 0x37b   :  { %4013 = vmatpush1.bf16.msra.mxu0 %v7455_v18  ;;  %4095 = vmatpush1.bf16.msra.mxu1 %v7458_v19  ;;  %v9435_v18 = vld [vmem:[%s10156_s4 + $0x3] ss:$8 sm:$0xf] }
 0x37c   :  { %4014 = vmatprep.subr.bf16.mxu0 %v7463_v20  ;;  %4096 = vmatprep.subr.bf16.mxu1 %v7466_v21  ;;  %v2389_v19 = vrot.slane %v9435_v18, %v8221_v38  ;;  %v2393_v20 = vrot.slane %v9435_v18, %v8229_v40  ;;  %v2401_v21 = vrot.slane %v9435_v18, %v8248_v55 }
 0x37f   :  { %4015 = vmatpush1.bf16.msra.mxu0 %v7461_v22  ;;  %4097 = vmatpush1.bf16.msra.mxu1 %v7464_v23 }
 0x380   :  { %4016 = vmatprep.subr.bf16.mxu0 %v7469_v24  ;;  %4098 = vmatprep.subr.bf16.mxu1 %v7472_v25 }
 0x383   :  { %4017 = vmatpush1.bf16.msra.mxu0 %v7467_v26  ;;  %4099 = vmatpush1.bf16.msra.mxu1 %v7470_v27 }
 0x384   :  { %4018 = vmatprep.subr.bf16.mxu0 %v7475_v28  ;;  %4100 = vmatprep.subr.bf16.mxu1 %v7478_v29 }
 0x387   :  { %4019 = vmatpush1.bf16.msra.mxu0 %v7473_v30  ;;  %4101 = vmatpush1.bf16.msra.mxu1 %v7476_v10 }
 0x388   :  { %4020 = vmatprep.subr.bf16.mxu0 %v7481_v31  ;;  %4102 = vmatprep.subr.bf16.mxu1 %v7484_v32 }
 0x38b   :  { %4021 = vmatpush1.bf16.msra.mxu0 %v7479_v33  ;;  %4103 = vmatpush1.bf16.msra.mxu1 %v7482_v35 }
 0x38c   :  { %4022 = vmatprep.subr.bf16.mxu0 %v7487_v15  ;;  %4104 = vmatprep.subr.bf16.mxu1 %v7490_v36  ;;  %v7545_v36 = vld [vmem:[%s10154_s2 + $0xe00] ss:$16 sps:$4 sm:$0xff]  }
 0x38f   :  { %4023 = vmatpush1.bf16.msra.mxu0 %v7485_v41  ;;  %4105 = vmatpush1.bf16.msra.mxu1 %v7488_v42  ;;  %v7548_v41 = vld [vmem:[%s10154_s2 + $0xe08] ss:$16 sps:$4 sm:$0xff]  }
 0x390   :  { %4024 = vmatprep.subr.bf16.mxu0 %v7493_v37  ;;  %4106 = vmatprep.subr.bf16.mxu1 %v7496_v43  ;;  %v7553_v37 = vld [vmem:[%s10154_s2 + $0xe24] ss:$16 sps:$4 sm:$0xff]   ;;  %v7556_v43 = vld [vmem:[%s10154_s2 + $0xe2c] ss:$16 sps:$4 sm:$0xff]  }
 0x393   :  { %4025 = vmatpush1.bf16.msra.mxu0 %v7491_v44  ;;  %4107 = vmatpush1.bf16.msra.mxu1 %v7494_v45  ;;  %v7551_v45 = vld [vmem:[%s10154_s2 + $0xe20] ss:$16 sps:$4 sm:$0xff]  }
 0x394   :  { %4026 = vmatprep.subr.bf16.mxu0 %v7499_v46  ;;  %4108 = vmatprep.subr.bf16.mxu1 %v7502_v47  ;;  %v7554_v46 = vld [vmem:[%s10154_s2 + $0xe28] ss:$16 sps:$4 sm:$0xff]   ;;  %v7559_v47 = vld [vmem:[%s10154_s2 + $0xe44] ss:$16 sps:$4 sm:$0xff]  }
 0x397   :  { %4027 = vmatpush1.bf16.msra.mxu0 %v7497_v48  ;;  %4109 = vmatpush1.bf16.msra.mxu1 %v7500_v49  ;;  %v7562_v48 = vld [vmem:[%s10154_s2 + $0xe4c] ss:$16 sps:$4 sm:$0xff]   ;;  %v7557_v49 = vld [vmem:[%s10154_s2 + $0xe40] ss:$16 sps:$4 sm:$0xff]  }
 0x398   :  { %4028 = vmatprep.subr.bf16.mxu0 %v7505_v50  ;;  %4110 = vmatprep.subr.bf16.mxu1 %v7508_v52  ;;  %v7560_v50 = vld [vmem:[%s10154_s2 + $0xe48] ss:$16 sps:$4 sm:$0xff]   ;;  %v7565_v52 = vld [vmem:[%s10154_s2 + $0xe64] ss:$16 sps:$4 sm:$0xff]  }
 0x39b   :  { %4029 = vmatpush1.bf16.msra.mxu0 %v7503_v53  ;;  %4111 = vmatpush1.bf16.msra.mxu1 %v7506_v54  ;;  %v7568_v53 = vld [vmem:[%s10154_s2 + $0xe6c] ss:$16 sps:$4 sm:$0xff]   ;;  %v7563_v54 = vld [vmem:[%s10154_s2 + $0xe60] ss:$16 sps:$4 sm:$0xff]  }
 0x39c   :  { %4030 = vmatprep.subr.bf16.mxu0 %v7511_v56  ;;  %4112 = vmatprep.subr.bf16.mxu1 %v7514_v57  ;;  %v7566_v56 = vld [vmem:[%s10154_s2 + $0xe68] ss:$16 sps:$4 sm:$0xff]   ;;  %v7571_v57 = vld [vmem:[%s10154_s2 + $0xe84] ss:$16 sps:$4 sm:$0xff]  }
 0x39f   :  { %4031 = vmatpush1.bf16.msra.mxu0 %v7509_v58  ;;  %4113 = vmatpush1.bf16.msra.mxu1 %v7512_v59  ;;  %v7574_v58 = vld [vmem:[%s10154_s2 + $0xe8c] ss:$16 sps:$4 sm:$0xff]   ;;  %v7569_v59 = vld [vmem:[%s10154_s2 + $0xe80] ss:$16 sps:$4 sm:$0xff]  }
 0x3a0   :  { %4032 = vmatprep.subr.bf16.mxu0 %v7517_v60  ;;  %4114 = vmatprep.subr.bf16.mxu1 %v7520_v61  ;;  %v7572_v60 = vld [vmem:[%s10154_s2 + $0xe88] ss:$16 sps:$4 sm:$0xff]   ;;  %v7577_v61 = vld [vmem:[%s10154_s2 + $0xea4] ss:$16 sps:$4 sm:$0xff]  }
 0x3a3   :  { %4033 = vmatpush1.bf16.msra.mxu0 %v7515_v62  ;;  %4115 = vmatpush1.bf16.msra.mxu1 %v7518_v63  ;;  %v7580_v62 = vld [vmem:[%s10154_s2 + $0xeac] ss:$16 sps:$4 sm:$0xff]   ;;  %v7575_v63 = vld [vmem:[%s10154_s2 + $0xea0] ss:$16 sps:$4 sm:$0xff]  }
 0x3a4   :  { %4034 = vmatprep.subr.bf16.mxu0 %v7523_v0  ;;  %4116 = vmatprep.subr.bf16.mxu1 %v7526_v1  ;;  %v7578_v0 = vld [vmem:[%s10154_s2 + $0xea8] ss:$16 sps:$4 sm:$0xff]   ;;  %v7583_v1 = vld [vmem:[%s10154_s2 + $0xec4] ss:$16 sps:$4 sm:$0xff]  }
 0x3a7   :  { %4035 = vmatpush1.bf16.msra.mxu0 %v7521_v2  ;;  %4117 = vmatpush1.bf16.msra.mxu1 %v7524_v3  ;;  %v7586_v2 = vld [vmem:[%s10154_s2 + $0xecc] ss:$16 sps:$4 sm:$0xff]   ;;  %v7581_v3 = vld [vmem:[%s10154_s2 + $0xec0] ss:$16 sps:$4 sm:$0xff]  }
 0x3a8   :  { %4036 = vmatprep.subr.bf16.mxu0 %v7529_v39  ;;  %4118 = vmatprep.subr.bf16.mxu1 %v7532_v4  ;;  %v7584_v39 = vld [vmem:[%s10154_s2 + $0xec8] ss:$16 sps:$4 sm:$0xff]   ;;  %v7589_v4 = vld [vmem:[%s10154_s2 + $0xee4] ss:$16 sps:$4 sm:$0xff]  }
 0x3ab   :  { %4037 = vmatpush1.bf16.msra.mxu0 %v7527_v5  ;;  %4119 = vmatpush1.bf16.msra.mxu1 %v7530_v6  ;;  %v7592_v5 = vld [vmem:[%s10154_s2 + $0xeec] ss:$16 sps:$4 sm:$0xff]   ;;  %v7587_v6 = vld [vmem:[%s10154_s2 + $0xee0] ss:$16 sps:$4 sm:$0xff]  }
 0x3ac   :  { %4038 = vmatprep.subr.bf16.mxu0 %v7535_v7  ;;  %4120 = vmatprep.subr.bf16.mxu1 %v7538_v51  ;;  %v7590_v7 = vld [vmem:[%s10154_s2 + $0xee8] ss:$16 sps:$4 sm:$0xff]   ;;  %v7595_v51 = vld [vmem:[%s10154_s2 + $0xf04] ss:$16 sps:$4 sm:$0xff]  }
 0x3af   :  { %4039 = vmatpush1.bf16.msra.mxu0 %v7533_v8  ;;  %4121 = vmatpush1.bf16.msra.mxu1 %v7536_v9  ;;  %v7598_v8 = vld [vmem:[%s10154_s2 + $0xf0c] ss:$16 sps:$4 sm:$0xff]   ;;  %v7593_v9 = vld [vmem:[%s10154_s2 + $0xf00] ss:$16 sps:$4 sm:$0xff]  }
 0x3b0   :  { %4040 = vmatprep.subr.bf16.mxu0 %v7541_v11  ;;  %4122 = vmatprep.subr.bf16.mxu1 %v7544_v12  ;;  %v7596_v11 = vld [vmem:[%s10154_s2 + $0xf08] ss:$16 sps:$4 sm:$0xff]   ;;  %v7601_v12 = vld [vmem:[%s10154_s2 + $0xf24] ss:$16 sps:$4 sm:$0xff]  }
 0x3b3   :  { %4041 = vmatpush1.bf16.msra.mxu0 %v7539_v13  ;;  %4123 = vmatpush1.bf16.msra.mxu1 %v7542_v14  ;;  %v7604_v13 = vld [vmem:[%s10154_s2 + $0xf2c] ss:$16 sps:$4 sm:$0xff]   ;;  %v7599_v14 = vld [vmem:[%s10154_s2 + $0xf20] ss:$16 sps:$4 sm:$0xff]  }
 0x3b4   :  { %4051 = vmatprep.subr.bf16.mxu0 %v7547_v16  ;;  %4133 = vmatprep.subr.bf16.mxu1 %v7550_v17  ;;  %v7602_v16 = vld [vmem:[%s10154_s2 + $0xf28] ss:$16 sps:$4 sm:$0xff]   ;;  %v7607_v17 = vld [vmem:[%s10154_s2 + $0xf44] ss:$16 sps:$4 sm:$0xff]  }
 0x449   :  { %v3121_v22 = vpop.f32.mrb[12].mxu0  ;;  %v9443_v23 = vpop.f32.mrb[12].mxu1 }
 0x44a   :  { %v6771_v24 = vadd.f32 %v3121_v22, %v2389_v19  ;;  %v3123_v25 = vpop.f32.mrb[13].mxu0  ;;  %v3205_v26 = vpop.f32.mrb[13].mxu1  ;;  %v7610_v19 = vld [vmem:[%s10154_s2 + $0xf4c] ss:$16 sps:$4 sm:$0xff]   ;;  %v7613_v22 = vld [vmem:[%s10154_s2 + $0xf64] ss:$16 sps:$4 sm:$0xff]  }
 0x44b   :  { %v6772_v27 = vadd.f32 %v3123_v25, %v2393_v20  ;;  %v6774_v28 = vadd.f32 %v3205_v26, %v2401_v21  ;;  %v3125_v29 = vpop.f32.mrb[14].mxu0  ;;  %v3207_v30 = vpop.f32.mrb[14].mxu1  ;;  %v7605_v20 = vld [vmem:[%s10154_s2 + $0xf40] ss:$16 sps:$4 sm:$0xff]   ;;  %v7608_v21 = vld [vmem:[%s10154_s2 + $0xf48] ss:$16 sps:$4 sm:$0xff]  }
 0x44c   :  { %v3210_v10 = vmax.f32 %v6771_v24, 0.0  ;;  %v3126_v31 = vpop.f32.mrb[15].mxu0  ;;  %v3208_v32 = vpop.f32.mrb[15].mxu1  ;;  %v7616_v24 = vld [vmem:[%s10154_s2 + $0xf6c] ss:$16 sps:$4 sm:$0xff]  }
 0x44d   :  { %v3211_v33 = vmax.f32 %v6772_v27, 0.0  ;;  %v3213_v35 = vmax.f32 %v6774_v28, 0.0  ;;  %v7611_v25 = vld [vmem:[%s10154_s2 + $0xf60] ss:$16 sps:$4 sm:$0xff]   ;;  %v7614_v26 = vld [vmem:[%s10154_s2 + $0xf68] ss:$16 sps:$4 sm:$0xff]  }
 0x44e   :  { %v3214_v42 = vpack.c.bf16 %v3210_v10, %v3210_v10  ;;  %v7619_v27 = vld [vmem:[%s10154_s2 + $0xf84] ss:$16 sps:$4 sm:$0xff]   ;;  %v7622_v28 = vld [vmem:[%s10154_s2 + $0xf8c] ss:$16 sps:$4 sm:$0xff]   ;;  %v7617_v29 = vld [vmem:[%s10154_s2 + $0xf80] ss:$16 sps:$4 sm:$0xff]  }
 0x44f   :  { %v3215_v15 = vpack.c.bf16 %v3211_v33, %v3211_v33  ;;  %v3217_v44 = vpack.c.bf16 %v3213_v35, %v3213_v35  ;;  %v7620_v30 = vld [vmem:[%s10154_s2 + $0xf88] ss:$16 sps:$4 sm:$0xff]   ;;  %v7625_v10 = vld [vmem:[%s10154_s2 + $0xfa4] ss:$16 sps:$4 sm:$0xff]   ;;  %v7628_v31 = vld [vmem:[%s10154_s2 + $0xfac] ss:$16 sps:$4 sm:$0xff]   ;;  %v2397_v35 = vrot.slane %v9435_v18, %v8351_v34 }
 0x450   :  { %v7623_v32 = vld [vmem:[%s10154_s2 + $0xfa0] ss:$16 sps:$4 sm:$0xff]   ;;  %v7626_v33 = vld [vmem:[%s10154_s2 + $0xfa8] ss:$16 sps:$4 sm:$0xff]  }
 0x451   :  { %4042 = vmatprep.mubr.bf16.mxu0 %v3215_v15  ;;  %4124 = vmatprep.mubr.bf16.mxu1 %v3215_v15  ;;  %v7631_v15 = vld [vmem:[%s10154_s2 + $0xfc4] ss:$16 sps:$4 sm:$0xff]   ;;  %v7632_v18 = vld [vmem:[%s10154_s2 + $0xfc8] ss:$16 sps:$4 sm:$0xff]  }
 0x452   :  { %4043 = vmatmul.mubr.bf16.vlgmr.msra.gmra.mrb[16].mxu0 %v3214_v42  ;;  %4125 = vmatmul.mubr.bf16.vlgmr.msra.gmra.mrb[16].mxu1 %v3214_v42  ;;  %v6773_v42 = vadd.f32 %v9443_v23, %v2397_v35  ;;  %v7638_v23 = vld [vmem:[%s10154_s2 + $0xfe8] ss:$16 sps:$4 sm:$0xff]   ;;  %v7715_v35 = vld [vmem:[%s10154_s2 + $0x1184] ss:$16 sps:$4 sm:$0xff]  }
 0x453   :  { %4052 = vmatpush1.bf16.msra.mxu0 %v7545_v36  ;;  %4134 = vmatpush1.bf16.msra.mxu1 %v7548_v41  ;;  %v7634_v36 = vld [vmem:[%s10154_s2 + $0xfcc] ss:$16 sps:$4 sm:$0xff]   ;;  %v7629_v41 = vld [vmem:[%s10154_s2 + $0xfc0] ss:$16 sps:$4 sm:$0xff]  }
 0x454   :  { %4083 = vmatprep.mubr.bf16.mxu0 %v3217_v44  ;;  %4165 = vmatprep.mubr.bf16.mxu1 %v3217_v44  ;;  %v7635_v44 = vld [vmem:[%s10154_s2 + $0xfe0] ss:$16 sps:$4 sm:$0xff]  }
 0x455   :  { %4053 = vmatprep.subr.bf16.mxu0 %v7553_v37  ;;  %4135 = vmatprep.subr.bf16.mxu1 %v7556_v43  ;;  %v7637_v37 = vld [vmem:[%s10154_s2 + $0xfe4] ss:$16 sps:$4 sm:$0xff]   ;;  %v7640_v43 = vld [vmem:[%s10154_s2 + $0xfec] ss:$16 sps:$4 sm:$0xff]  }
 0x457   :  { %4054 = vmatpush1.bf16.msra.mxu0 %v7551_v45  ;;  %4136 = vmatpush1.bf16.msra.mxu1 %v7554_v46  ;;  %v3212_v45 = vmax.f32 %v6773_v42, 0.0  ;;  %v7643_v46 = vld [vmem:[%s10154_s2 + $0x1004] ss:$16 sps:$4 sm:$0xff]   ;;  %v7724_v42 = vld [vmem:[%s10154_s2 + $0x11ac] ss:$16 sps:$4 sm:$0xff]  }
 0x458   :  { %4055 = vmatprep.subr.bf16.mxu0 %v7559_v47  ;;  %4137 = vmatprep.subr.bf16.mxu1 %v7562_v48  ;;  %v7646_v47 = vld [vmem:[%s10154_s2 + $0x100c] ss:$16 sps:$4 sm:$0xff]   ;;  %v7641_v48 = vld [vmem:[%s10154_s2 + $0x1000] ss:$16 sps:$4 sm:$0xff]  }
 0x45b   :  { %4056 = vmatpush1.bf16.msra.mxu0 %v7557_v49  ;;  %4138 = vmatpush1.bf16.msra.mxu1 %v7560_v50  ;;  %v7644_v49 = vld [vmem:[%s10154_s2 + $0x1008] ss:$16 sps:$4 sm:$0xff]   ;;  %v3216_v50 = vpack.c.bf16 %v3212_v45, %v3212_v45  ;;  %v7725_v45 = vld [vmem:[%s10154_s2 + $0x11c0] ss:$16 sps:$4 sm:$0xff]  }
 0x45c   :  { %4057 = vmatprep.subr.bf16.mxu0 %v7565_v52  ;;  %4139 = vmatprep.subr.bf16.mxu1 %v7568_v53  ;;  %v7649_v52 = vld [vmem:[%s10154_s2 + $0x1024] ss:$16 sps:$4 sm:$0xff]   ;;  %v7652_v53 = vld [vmem:[%s10154_s2 + $0x102c] ss:$16 sps:$4 sm:$0xff]  }
 0x45f   :  { %4058 = vmatpush1.bf16.msra.mxu0 %v7563_v54  ;;  %4140 = vmatpush1.bf16.msra.mxu1 %v7566_v56  ;;  %v7647_v54 = vld [vmem:[%s10154_s2 + $0x1020] ss:$16 sps:$4 sm:$0xff]   ;;  %v7650_v56 = vld [vmem:[%s10154_s2 + $0x1028] ss:$16 sps:$4 sm:$0xff]  }
 0x460   :  { %4059 = vmatprep.subr.bf16.mxu0 %v7571_v57  ;;  %4141 = vmatprep.subr.bf16.mxu1 %v7574_v58  ;;  %v7655_v57 = vld [vmem:[%s10154_s2 + $0x1044] ss:$16 sps:$4 sm:$0xff]   ;;  %v7658_v58 = vld [vmem:[%s10154_s2 + $0x104c] ss:$16 sps:$4 sm:$0xff]  }
 0x463   :  { %4060 = vmatpush1.bf16.msra.mxu0 %v7569_v59  ;;  %4142 = vmatpush1.bf16.msra.mxu1 %v7572_v60  ;;  %v7653_v59 = vld [vmem:[%s10154_s2 + $0x1040] ss:$16 sps:$4 sm:$0xff]   ;;  %v7656_v60 = vld [vmem:[%s10154_s2 + $0x1048] ss:$16 sps:$4 sm:$0xff]  }
 0x464   :  { %4061 = vmatprep.subr.bf16.mxu0 %v7577_v61  ;;  %4143 = vmatprep.subr.bf16.mxu1 %v7580_v62  ;;  %v7661_v61 = vld [vmem:[%s10154_s2 + $0x1064] ss:$16 sps:$4 sm:$0xff]   ;;  %v7664_v62 = vld [vmem:[%s10154_s2 + $0x106c] ss:$16 sps:$4 sm:$0xff]  }
 0x467   :  { %4062 = vmatpush1.bf16.msra.mxu0 %v7575_v63  ;;  %4144 = vmatpush1.bf16.msra.mxu1 %v7578_v0  ;;  %v7659_v63 = vld [vmem:[%s10154_s2 + $0x1060] ss:$16 sps:$4 sm:$0xff]   ;;  %v7662_v0 = vld [vmem:[%s10154_s2 + $0x1068] ss:$16 sps:$4 sm:$0xff]  }
 0x468   :  { %4063 = vmatprep.subr.bf16.mxu0 %v7583_v1  ;;  %4145 = vmatprep.subr.bf16.mxu1 %v7586_v2  ;;  %v7667_v1 = vld [vmem:[%s10154_s2 + $0x1084] ss:$16 sps:$4 sm:$0xff]   ;;  %v7670_v2 = vld [vmem:[%s10154_s2 + $0x108c] ss:$16 sps:$4 sm:$0xff]  }
 0x46b   :  { %4064 = vmatpush1.bf16.msra.mxu0 %v7581_v3  ;;  %4146 = vmatpush1.bf16.msra.mxu1 %v7584_v39  ;;  %v7665_v3 = vld [vmem:[%s10154_s2 + $0x1080] ss:$16 sps:$4 sm:$0xff]   ;;  %v7668_v39 = vld [vmem:[%s10154_s2 + $0x1088] ss:$16 sps:$4 sm:$0xff]  }
 0x46c   :  { %4065 = vmatprep.subr.bf16.mxu0 %v7589_v4  ;;  %4147 = vmatprep.subr.bf16.mxu1 %v7592_v5  ;;  %v7673_v4 = vld [vmem:[%s10154_s2 + $0x10a4] ss:$16 sps:$4 sm:$0xff]   ;;  %v7676_v5 = vld [vmem:[%s10154_s2 + $0x10ac] ss:$16 sps:$4 sm:$0xff]  }
 0x46f   :  { %4066 = vmatpush1.bf16.msra.mxu0 %v7587_v6  ;;  %4148 = vmatpush1.bf16.msra.mxu1 %v7590_v7  ;;  %v7671_v6 = vld [vmem:[%s10154_s2 + $0x10a0] ss:$16 sps:$4 sm:$0xff]   ;;  %v7674_v7 = vld [vmem:[%s10154_s2 + $0x10a8] ss:$16 sps:$4 sm:$0xff]  }
 0x470   :  { %4067 = vmatprep.subr.bf16.mxu0 %v7595_v51  ;;  %4149 = vmatprep.subr.bf16.mxu1 %v7598_v8  ;;  %v7679_v51 = vld [vmem:[%s10154_s2 + $0x10c4] ss:$16 sps:$4 sm:$0xff]   ;;  %v7682_v8 = vld [vmem:[%s10154_s2 + $0x10cc] ss:$16 sps:$4 sm:$0xff]  }
 0x473   :  { %4068 = vmatpush1.bf16.msra.mxu0 %v7593_v9  ;;  %4150 = vmatpush1.bf16.msra.mxu1 %v7596_v11  ;;  %v7677_v9 = vld [vmem:[%s10154_s2 + $0x10c0] ss:$16 sps:$4 sm:$0xff]   ;;  %v7680_v11 = vld [vmem:[%s10154_s2 + $0x10c8] ss:$16 sps:$4 sm:$0xff]  }
 0x474   :  { %4069 = vmatprep.subr.bf16.mxu0 %v7601_v12  ;;  %4151 = vmatprep.subr.bf16.mxu1 %v7604_v13  ;;  %v7685_v12 = vld [vmem:[%s10154_s2 + $0x10e4] ss:$16 sps:$4 sm:$0xff]   ;;  %v7688_v13 = vld [vmem:[%s10154_s2 + $0x10ec] ss:$16 sps:$4 sm:$0xff]  }
 0x477   :  { %4070 = vmatpush1.bf16.msra.mxu0 %v7599_v14  ;;  %4152 = vmatpush1.bf16.msra.mxu1 %v7602_v16  ;;  %v7683_v14 = vld [vmem:[%s10154_s2 + $0x10e0] ss:$16 sps:$4 sm:$0xff]   ;;  %v7686_v16 = vld [vmem:[%s10154_s2 + $0x10e8] ss:$16 sps:$4 sm:$0xff]  }
 0x478   :  { %4071 = vmatprep.subr.bf16.mxu0 %v7607_v17  ;;  %4153 = vmatprep.subr.bf16.mxu1 %v7610_v19  ;;  %v7691_v17 = vld [vmem:[%s10154_s2 + $0x1104] ss:$16 sps:$4 sm:$0xff]   ;;  %v7694_v19 = vld [vmem:[%s10154_s2 + $0x110c] ss:$16 sps:$4 sm:$0xff]  }
 0x47b   :  { %4072 = vmatpush1.bf16.msra.mxu0 %v7605_v20  ;;  %4154 = vmatpush1.bf16.msra.mxu1 %v7608_v21  ;;  %v7689_v20 = vld [vmem:[%s10154_s2 + $0x1100] ss:$16 sps:$4 sm:$0xff]   ;;  %v7692_v21 = vld [vmem:[%s10154_s2 + $0x1108] ss:$16 sps:$4 sm:$0xff]  }
 0x47c   :  { %4073 = vmatprep.subr.bf16.mxu0 %v7613_v22  ;;  %4155 = vmatprep.subr.bf16.mxu1 %v7616_v24  ;;  %v7697_v22 = vld [vmem:[%s10154_s2 + $0x1124] ss:$16 sps:$4 sm:$0xff]   ;;  %v7700_v24 = vld [vmem:[%s10154_s2 + $0x112c] ss:$16 sps:$4 sm:$0xff]  }
 0x47f   :  { %4074 = vmatpush1.bf16.msra.mxu0 %v7611_v25  ;;  %4156 = vmatpush1.bf16.msra.mxu1 %v7614_v26  ;;  %v7695_v25 = vld [vmem:[%s10154_s2 + $0x1120] ss:$16 sps:$4 sm:$0xff]   ;;  %v7698_v26 = vld [vmem:[%s10154_s2 + $0x1128] ss:$16 sps:$4 sm:$0xff]  }
 0x480   :  { %4075 = vmatprep.subr.bf16.mxu0 %v7619_v27  ;;  %4157 = vmatprep.subr.bf16.mxu1 %v7622_v28  ;;  %v7703_v27 = vld [vmem:[%s10154_s2 + $0x1144] ss:$16 sps:$4 sm:$0xff]   ;;  %v7706_v28 = vld [vmem:[%s10154_s2 + $0x114c] ss:$16 sps:$4 sm:$0xff]  }
 0x483   :  { %4076 = vmatpush1.bf16.msra.mxu0 %v7617_v29  ;;  %4158 = vmatpush1.bf16.msra.mxu1 %v7620_v30  ;;  %v7701_v29 = vld [vmem:[%s10154_s2 + $0x1140] ss:$16 sps:$4 sm:$0xff]   ;;  %v7704_v30 = vld [vmem:[%s10154_s2 + $0x1148] ss:$16 sps:$4 sm:$0xff]  }
 0x484   :  { %4077 = vmatprep.subr.bf16.mxu0 %v7625_v10  ;;  %4159 = vmatprep.subr.bf16.mxu1 %v7628_v31  ;;  %v7709_v10 = vld [vmem:[%s10154_s2 + $0x1164] ss:$16 sps:$4 sm:$0xff]   ;;  %v7712_v31 = vld [vmem:[%s10154_s2 + $0x116c] ss:$16 sps:$4 sm:$0xff]  }
 0x487   :  { %4078 = vmatpush1.bf16.msra.mxu0 %v7623_v32  ;;  %4160 = vmatpush1.bf16.msra.mxu1 %v7626_v33  ;;  %v7707_v32 = vld [vmem:[%s10154_s2 + $0x1160] ss:$16 sps:$4 sm:$0xff]   ;;  %v7710_v33 = vld [vmem:[%s10154_s2 + $0x1168] ss:$16 sps:$4 sm:$0xff]  }
 0x488   :  { %4079 = vmatprep.subr.bf16.mxu0 %v7631_v15  ;;  %4161 = vmatprep.subr.bf16.mxu1 %v7634_v36  ;;  %v7718_v15 = vld [vmem:[%s10154_s2 + $0x118c] ss:$16 sps:$4 sm:$0xff]   ;;  %v7713_v36 = vld [vmem:[%s10154_s2 + $0x1180] ss:$16 sps:$4 sm:$0xff]  }
 0x48b   :  { %4080 = vmatpush1.bf16.msra.mxu0 %v7629_v41  ;;  %4162 = vmatpush1.bf16.msra.mxu1 %v7632_v18  ;;  %v7716_v41 = vld [vmem:[%s10154_s2 + $0x1188] ss:$16 sps:$4 sm:$0xff]   ;;  %v7721_v18 = vld [vmem:[%s10154_s2 + $0x11a4] ss:$16 sps:$4 sm:$0xff]  }
 0x48c   :  { %4081 = vmatprep.subr.bf16.mxu0 %v7637_v37  ;;  %4163 = vmatprep.subr.bf16.mxu1 %v7640_v43  ;;  %v7719_v37 = vld [vmem:[%s10154_s2 + $0x11a0] ss:$16 sps:$4 sm:$0xff]   ;;  %v7722_v43 = vld [vmem:[%s10154_s2 + $0x11a8] ss:$16 sps:$4 sm:$0xff]  }
 0x48f   :  { %4082 = vmatpush1.bf16.msra.mxu0 %v7635_v44  ;;  %4164 = vmatpush1.bf16.msra.mxu1 %v7638_v23  ;;  %v7727_v44 = vld [vmem:[%s10154_s2 + $0x11c4] ss:$16 sps:$4 sm:$0xff]   ;;  %v7730_v23 = vld [vmem:[%s10154_s2 + $0x11cc] ss:$16 sps:$4 sm:$0xff]  }
 0x490   :  { %4974 = vmatprep.subr.bf16.mxu0 %v7643_v46  ;;  %5056 = vmatprep.subr.bf16.mxu1 %v7646_v47  ;;  %v7728_v46 = vld [vmem:[%s10154_s2 + $0x11c8] ss:$16 sps:$4 sm:$0xff]   ;;  %v7733_v47 = vld [vmem:[%s10154_s2 + $0x11e4] ss:$16 sps:$4 sm:$0xff]  }
 0x492   :  { %4084 = vmatmul.mubr.bf16.vlgmr.msra.gmra.mrb[16].mxu0 %v3216_v50  ;;  %4166 = vmatmul.mubr.bf16.vlgmr.msra.gmra.mrb[16].mxu1 %v3216_v50  ;;  %v7734_v50 = vld [vmem:[%s10154_s2 + $0x11e8] ss:$16 sps:$4 sm:$0xff]  }
 0x493   :  { %4975 = vmatpush1.bf16.msra.mxu0 %v7641_v48  ;;  %5057 = vmatpush1.bf16.msra.mxu1 %v7644_v49  ;;  %v7736_v48 = vld [vmem:[%s10154_s2 + $0x11ec] ss:$16 sps:$4 sm:$0xff]   ;;  %v7731_v49 = vld [vmem:[%s10154_s2 + $0x11e0] ss:$16 sps:$4 sm:$0xff]  }
 0x494   :  { %4976 = vmatprep.subr.bf16.mxu0 %v7649_v52  ;;  %5058 = vmatprep.subr.bf16.mxu1 %v7652_v53  ;;  %v7739_v52 = vld [vmem:[%s10154_s2 + $0x1204] ss:$16 sps:$4 sm:$0xff]   ;;  %v7742_v53 = vld [vmem:[%s10154_s2 + $0x120c] ss:$16 sps:$4 sm:$0xff]  }
 0x497   :  { %4977 = vmatpush1.bf16.msra.mxu0 %v7647_v54  ;;  %5059 = vmatpush1.bf16.msra.mxu1 %v7650_v56  ;;  %v9835_v54 = vld [vmem:[%s10156_s4 + $0x4] ss:$8 sm:$0xf] }
 0x498   :  { %4978 = vmatprep.subr.bf16.mxu0 %v7655_v57  ;;  %5060 = vmatprep.subr.bf16.mxu1 %v7658_v58  ;;  %v3353_v56 = vrot.slane %v9835_v54, %v8221_v38  ;;  %v3357_v57 = vrot.slane %v9835_v54, %v8229_v40  ;;  %v3365_v58 = vrot.slane %v9835_v54, %v8248_v55 }
 0x49b   :  { %4979 = vmatpush1.bf16.msra.mxu0 %v7653_v59  ;;  %5061 = vmatpush1.bf16.msra.mxu1 %v7656_v60 }
 0x49c   :  { %4980 = vmatprep.subr.bf16.mxu0 %v7661_v61  ;;  %5062 = vmatprep.subr.bf16.mxu1 %v7664_v62 }
 0x49f   :  { %4981 = vmatpush1.bf16.msra.mxu0 %v7659_v63  ;;  %5063 = vmatpush1.bf16.msra.mxu1 %v7662_v0 }
 0x4a0   :  { %4982 = vmatprep.subr.bf16.mxu0 %v7667_v1  ;;  %5064 = vmatprep.subr.bf16.mxu1 %v7670_v2 }
 0x4a3   :  { %4983 = vmatpush1.bf16.msra.mxu0 %v7665_v3  ;;  %5065 = vmatpush1.bf16.msra.mxu1 %v7668_v39 }
 0x4a4   :  { %4984 = vmatprep.subr.bf16.mxu0 %v7673_v4  ;;  %5066 = vmatprep.subr.bf16.mxu1 %v7676_v5 }
 0x4a7   :  { %4985 = vmatpush1.bf16.msra.mxu0 %v7671_v6  ;;  %5067 = vmatpush1.bf16.msra.mxu1 %v7674_v7 }
 0x4a8   :  { %4986 = vmatprep.subr.bf16.mxu0 %v7679_v51  ;;  %5068 = vmatprep.subr.bf16.mxu1 %v7682_v8  ;;  %v7737_v8 = vld [vmem:[%s10154_s2 + $0x1200] ss:$16 sps:$4 sm:$0xff]  }
 0x4ab   :  { %4987 = vmatpush1.bf16.msra.mxu0 %v7677_v9  ;;  %5069 = vmatpush1.bf16.msra.mxu1 %v7680_v11  ;;  %v7740_v9 = vld [vmem:[%s10154_s2 + $0x1208] ss:$16 sps:$4 sm:$0xff]  }
 0x4ac   :  { %4988 = vmatprep.subr.bf16.mxu0 %v7685_v12  ;;  %5070 = vmatprep.subr.bf16.mxu1 %v7688_v13  ;;  %v7745_v12 = vld [vmem:[%s10154_s2 + $0x1224] ss:$16 sps:$4 sm:$0xff]   ;;  %v7748_v13 = vld [vmem:[%s10154_s2 + $0x122c] ss:$16 sps:$4 sm:$0xff]  }
 0x4af   :  { %4989 = vmatpush1.bf16.msra.mxu0 %v7683_v14  ;;  %5071 = vmatpush1.bf16.msra.mxu1 %v7686_v16  ;;  %v7743_v16 = vld [vmem:[%s10154_s2 + $0x1220] ss:$16 sps:$4 sm:$0xff]  }
 0x4b0   :  { %4990 = vmatprep.subr.bf16.mxu0 %v7691_v17  ;;  %5072 = vmatprep.subr.bf16.mxu1 %v7694_v19  ;;  %v7746_v17 = vld [vmem:[%s10154_s2 + $0x1228] ss:$16 sps:$4 sm:$0xff]   ;;  %v7751_v19 = vld [vmem:[%s10154_s2 + $0x1244] ss:$16 sps:$4 sm:$0xff]  }
 0x4b3   :  { %4991 = vmatpush1.bf16.msra.mxu0 %v7689_v20  ;;  %5073 = vmatpush1.bf16.msra.mxu1 %v7692_v21  ;;  %v7754_v20 = vld [vmem:[%s10154_s2 + $0x124c] ss:$16 sps:$4 sm:$0xff]   ;;  %v7749_v21 = vld [vmem:[%s10154_s2 + $0x1240] ss:$16 sps:$4 sm:$0xff]  }
 0x4b4   :  { %4992 = vmatprep.subr.bf16.mxu0 %v7697_v22  ;;  %5074 = vmatprep.subr.bf16.mxu1 %v7700_v24  ;;  %v7752_v22 = vld [vmem:[%s10154_s2 + $0x1248] ss:$16 sps:$4 sm:$0xff]   ;;  %v7757_v24 = vld [vmem:[%s10154_s2 + $0x1264] ss:$16 sps:$4 sm:$0xff]  }
 0x4b7   :  { %4993 = vmatpush1.bf16.msra.mxu0 %v7695_v25  ;;  %5075 = vmatpush1.bf16.msra.mxu1 %v7698_v26  ;;  %v7760_v25 = vld [vmem:[%s10154_s2 + $0x126c] ss:$16 sps:$4 sm:$0xff]   ;;  %v7755_v26 = vld [vmem:[%s10154_s2 + $0x1260] ss:$16 sps:$4 sm:$0xff]  }
 0x4b8   :  { %4994 = vmatprep.subr.bf16.mxu0 %v7703_v27  ;;  %5076 = vmatprep.subr.bf16.mxu1 %v7706_v28  ;;  %v7758_v27 = vld [vmem:[%s10154_s2 + $0x1268] ss:$16 sps:$4 sm:$0xff]   ;;  %v7763_v28 = vld [vmem:[%s10154_s2 + $0x1284] ss:$16 sps:$4 sm:$0xff]  }
 0x4bb   :  { %4995 = vmatpush1.bf16.msra.mxu0 %v7701_v29  ;;  %5077 = vmatpush1.bf16.msra.mxu1 %v7704_v30  ;;  %v7766_v29 = vld [vmem:[%s10154_s2 + $0x128c] ss:$16 sps:$4 sm:$0xff]   ;;  %v7761_v30 = vld [vmem:[%s10154_s2 + $0x1280] ss:$16 sps:$4 sm:$0xff]  }
 0x4bc   :  { %4996 = vmatprep.subr.bf16.mxu0 %v7709_v10  ;;  %5078 = vmatprep.subr.bf16.mxu1 %v7712_v31  ;;  %v7764_v10 = vld [vmem:[%s10154_s2 + $0x1288] ss:$16 sps:$4 sm:$0xff]   ;;  %v7769_v31 = vld [vmem:[%s10154_s2 + $0x12a4] ss:$16 sps:$4 sm:$0xff]  }
 0x4bf   :  { %4997 = vmatpush1.bf16.msra.mxu0 %v7707_v32  ;;  %5079 = vmatpush1.bf16.msra.mxu1 %v7710_v33  ;;  %v7772_v32 = vld [vmem:[%s10154_s2 + $0x12ac] ss:$16 sps:$4 sm:$0xff]   ;;  %v7767_v33 = vld [vmem:[%s10154_s2 + $0x12a0] ss:$16 sps:$4 sm:$0xff]  }
 0x4c0   :  { %4998 = vmatprep.subr.bf16.mxu0 %v7715_v35  ;;  %5080 = vmatprep.subr.bf16.mxu1 %v7718_v15  ;;  %v7770_v35 = vld [vmem:[%s10154_s2 + $0x12a8] ss:$16 sps:$4 sm:$0xff]   ;;  %v7775_v15 = vld [vmem:[%s10154_s2 + $0x12c4] ss:$16 sps:$4 sm:$0xff]  }
 0x4c3   :  { %4999 = vmatpush1.bf16.msra.mxu0 %v7713_v36  ;;  %5081 = vmatpush1.bf16.msra.mxu1 %v7716_v41  ;;  %v7778_v36 = vld [vmem:[%s10154_s2 + $0x12cc] ss:$16 sps:$4 sm:$0xff]   ;;  %v7773_v41 = vld [vmem:[%s10154_s2 + $0x12c0] ss:$16 sps:$4 sm:$0xff]  }
 0x4c4   :  { %5000 = vmatprep.subr.bf16.mxu0 %v7721_v18  ;;  %5082 = vmatprep.subr.bf16.mxu1 %v7724_v42  ;;  %v7776_v18 = vld [vmem:[%s10154_s2 + $0x12c8] ss:$16 sps:$4 sm:$0xff]   ;;  %v7781_v42 = vld [vmem:[%s10154_s2 + $0x12e4] ss:$16 sps:$4 sm:$0xff]  }
 0x4c7   :  { %5001 = vmatpush1.bf16.msra.mxu0 %v7719_v37  ;;  %5083 = vmatpush1.bf16.msra.mxu1 %v7722_v43  ;;  %v7784_v37 = vld [vmem:[%s10154_s2 + $0x12ec] ss:$16 sps:$4 sm:$0xff]   ;;  %v7779_v43 = vld [vmem:[%s10154_s2 + $0x12e0] ss:$16 sps:$4 sm:$0xff]  }
 0x4c8   :  { %5002 = vmatprep.subr.bf16.mxu0 %v7727_v44  ;;  %5084 = vmatprep.subr.bf16.mxu1 %v7730_v23  ;;  %v7782_v44 = vld [vmem:[%s10154_s2 + $0x12e8] ss:$16 sps:$4 sm:$0xff]   ;;  %v7787_v23 = vld [vmem:[%s10154_s2 + $0x1304] ss:$16 sps:$4 sm:$0xff]  }
 0x4cb   :  { %5003 = vmatpush1.bf16.msra.mxu0 %v7725_v45  ;;  %5085 = vmatpush1.bf16.msra.mxu1 %v7728_v46  ;;  %v7790_v45 = vld [vmem:[%s10154_s2 + $0x130c] ss:$16 sps:$4 sm:$0xff]   ;;  %v7785_v46 = vld [vmem:[%s10154_s2 + $0x1300] ss:$16 sps:$4 sm:$0xff]  }
 0x4cc   :  { %5004 = vmatprep.subr.bf16.mxu0 %v7733_v47  ;;  %5086 = vmatprep.subr.bf16.mxu1 %v7736_v48  ;;  %v7788_v47 = vld [vmem:[%s10154_s2 + $0x1308] ss:$16 sps:$4 sm:$0xff]   ;;  %v7793_v48 = vld [vmem:[%s10154_s2 + $0x1324] ss:$16 sps:$4 sm:$0xff]  }
 0x4cf   :  { %5005 = vmatpush1.bf16.msra.mxu0 %v7731_v49  ;;  %5087 = vmatpush1.bf16.msra.mxu1 %v7734_v50  ;;  %v7796_v49 = vld [vmem:[%s10154_s2 + $0x132c] ss:$16 sps:$4 sm:$0xff]   ;;  %v7791_v50 = vld [vmem:[%s10154_s2 + $0x1320] ss:$16 sps:$4 sm:$0xff]  }
 0x4d0   :  { %5015 = vmatprep.subr.bf16.mxu0 %v7739_v52  ;;  %5097 = vmatprep.subr.bf16.mxu1 %v7742_v53  ;;  %v7794_v52 = vld [vmem:[%s10154_s2 + $0x1328] ss:$16 sps:$4 sm:$0xff]   ;;  %v7799_v53 = vld [vmem:[%s10154_s2 + $0x1344] ss:$16 sps:$4 sm:$0xff]  }
 0x565   :  { %v4085_v59 = vpop.f32.mrb[16].mxu0  ;;  %v9843_v60 = vpop.f32.mrb[16].mxu1 }
 0x566   :  { %v6775_v61 = vadd.f32 %v4085_v59, %v3353_v56  ;;  %v4087_v62 = vpop.f32.mrb[17].mxu0  ;;  %v4169_v63 = vpop.f32.mrb[17].mxu1  ;;  %v7802_v56 = vld [vmem:[%s10154_s2 + $0x134c] ss:$16 sps:$4 sm:$0xff]   ;;  %v7805_v59 = vld [vmem:[%s10154_s2 + $0x1364] ss:$16 sps:$4 sm:$0xff]  }
 0x567   :  { %v6776_v0 = vadd.f32 %v4087_v62, %v3357_v57  ;;  %v6778_v1 = vadd.f32 %v4169_v63, %v3365_v58  ;;  %v4089_v2 = vpop.f32.mrb[18].mxu0  ;;  %v4171_v3 = vpop.f32.mrb[18].mxu1  ;;  %v7797_v57 = vld [vmem:[%s10154_s2 + $0x1340] ss:$16 sps:$4 sm:$0xff]   ;;  %v7800_v58 = vld [vmem:[%s10154_s2 + $0x1348] ss:$16 sps:$4 sm:$0xff]  }
 0x568   :  { %v4174_v39 = vmax.f32 %v6775_v61, 0.0  ;;  %v4090_v4 = vpop.f32.mrb[19].mxu0  ;;  %v4172_v5 = vpop.f32.mrb[19].mxu1  ;;  %v7808_v61 = vld [vmem:[%s10154_s2 + $0x136c] ss:$16 sps:$4 sm:$0xff]  }
 0x569   :  { %v4175_v6 = vmax.f32 %v6776_v0, 0.0  ;;  %v4177_v7 = vmax.f32 %v6778_v1, 0.0  ;;  %v7803_v62 = vld [vmem:[%s10154_s2 + $0x1360] ss:$16 sps:$4 sm:$0xff]   ;;  %v7806_v63 = vld [vmem:[%s10154_s2 + $0x1368] ss:$16 sps:$4 sm:$0xff]  }
 0x56a   :  { %v4178_v11 = vpack.c.bf16 %v4174_v39, %v4174_v39  ;;  %v7811_v0 = vld [vmem:[%s10154_s2 + $0x1384] ss:$16 sps:$4 sm:$0xff]   ;;  %v7814_v1 = vld [vmem:[%s10154_s2 + $0x138c] ss:$16 sps:$4 sm:$0xff]   ;;  %v7809_v2 = vld [vmem:[%s10154_s2 + $0x1380] ss:$16 sps:$4 sm:$0xff]  }
 0x56b   :  { %v4179_v51 = vpack.c.bf16 %v4175_v6, %v4175_v6  ;;  %v4181_v14 = vpack.c.bf16 %v4177_v7, %v4177_v7  ;;  %v7812_v3 = vld [vmem:[%s10154_s2 + $0x1388] ss:$16 sps:$4 sm:$0xff]   ;;  %v7817_v39 = vld [vmem:[%s10154_s2 + $0x13a4] ss:$16 sps:$4 sm:$0xff]   ;;  %v7820_v4 = vld [vmem:[%s10154_s2 + $0x13ac] ss:$16 sps:$4 sm:$0xff]   ;;  %v3361_v7 = vrot.slane %v9835_v54, %v8351_v34 }
 0x56c   :  { %v7815_v5 = vld [vmem:[%s10154_s2 + $0x13a0] ss:$16 sps:$4 sm:$0xff]   ;;  %v7818_v6 = vld [vmem:[%s10154_s2 + $0x13a8] ss:$16 sps:$4 sm:$0xff]  }
 0x56d   :  { %5006 = vmatprep.mubr.bf16.mxu0 %v4179_v51  ;;  %5088 = vmatprep.mubr.bf16.mxu1 %v4179_v51  ;;  %v7823_v51 = vld [vmem:[%s10154_s2 + $0x13c4] ss:$16 sps:$4 sm:$0xff]   ;;  %v7824_v54 = vld [vmem:[%s10154_s2 + $0x13c8] ss:$16 sps:$4 sm:$0xff]  }
 0x56e   :  { %5007 = vmatmul.mubr.bf16.vlgmr.msra.gmra.mrb[20].mxu0 %v4178_v11  ;;  %5089 = vmatmul.mubr.bf16.vlgmr.msra.gmra.mrb[20].mxu1 %v4178_v11  ;;  %v6777_v11 = vadd.f32 %v9843_v60, %v3361_v7  ;;  %v7830_v60 = vld [vmem:[%s10154_s2 + $0x13e8] ss:$16 sps:$4 sm:$0xff]  }
 0x56f   :  { %5016 = vmatpush1.bf16.msra.mxu0 %v7737_v8  ;;  %5098 = vmatpush1.bf16.msra.mxu1 %v7740_v9  ;;  %v7826_v8 = vld [vmem:[%s10154_s2 + $0x13cc] ss:$16 sps:$4 sm:$0xff]   ;;  %v7821_v9 = vld [vmem:[%s10154_s2 + $0x13c0] ss:$16 sps:$4 sm:$0xff]  }
 0x570   :  { %5047 = vmatprep.mubr.bf16.mxu0 %v4181_v14  ;;  %5129 = vmatprep.mubr.bf16.mxu1 %v4181_v14  ;;  %v7827_v14 = vld [vmem:[%s10154_s2 + $0x13e0] ss:$16 sps:$4 sm:$0xff]  }
 0x571   :  { %5017 = vmatprep.subr.bf16.mxu0 %v7745_v12  ;;  %5099 = vmatprep.subr.bf16.mxu1 %v7748_v13  ;;  %v7829_v12 = vld [vmem:[%s10154_s2 + $0x13e4] ss:$16 sps:$4 sm:$0xff]   ;;  %v7832_v13 = vld [vmem:[%s10154_s2 + $0x13ec] ss:$16 sps:$4 sm:$0xff]  }
 0x573   :  { %5018 = vmatpush1.bf16.msra.mxu0 %v7743_v16  ;;  %5100 = vmatpush1.bf16.msra.mxu1 %v7746_v17  ;;  %v4176_v16 = vmax.f32 %v6777_v11, 0.0  ;;  %v7833_v17 = vld [vmem:[%s10155_s3 + $0x40] sm:$0xff]  }
 0x574   :  { %5019 = vmatprep.subr.bf16.mxu0 %v7751_v19  ;;  %5101 = vmatprep.subr.bf16.mxu1 %v7754_v20  ;;  %v7834_v19 = vld [vmem:[%s10155_s3 + $0xc0] sm:$0xff]  }
 0x575   :  { %v7835_v20 = vld [vmem:[%s10155_s3] sm:$0xff]  }
 0x577   :  { %5020 = vmatpush1.bf16.msra.mxu0 %v7749_v21  ;;  %5102 = vmatpush1.bf16.msra.mxu1 %v7752_v22  ;;  %v7836_v21 = vld [vmem:[%s10155_s3 + $0x80] sm:$0xff]   ;;  %v4180_v22 = vpack.c.bf16 %v4176_v16, %v4176_v16 }
 0x578   :  { %5021 = vmatprep.subr.bf16.mxu0 %v7757_v24  ;;  %5103 = vmatprep.subr.bf16.mxu1 %v7760_v25  ;;  %v7837_v24 = vld [vmem:[%s10155_s3 + $0x48] sm:$0xff]  }
 0x579   :  { %v7838_v25 = vld [vmem:[%s10155_s3 + $0xc8] sm:$0xff]  }
 0x57b   :  { %5022 = vmatpush1.bf16.msra.mxu0 %v7755_v26  ;;  %5104 = vmatpush1.bf16.msra.mxu1 %v7758_v27  ;;  %v7839_v26 = vld [vmem:[%s10155_s3 + $0x8] sm:$0xff]  }
 0x57c   :  { %5023 = vmatprep.subr.bf16.mxu0 %v7763_v28  ;;  %5105 = vmatprep.subr.bf16.mxu1 %v7766_v29  ;;  %v7840_v27 = vld [vmem:[%s10155_s3 + $0x88] sm:$0xff]   ;;  %v7841_v28 = vld [vmem:[%s10155_s3 + $0x50] sm:$0xff]  }
 0x57d   :  { %v7842_v29 = vld [vmem:[%s10155_s3 + $0xd0] sm:$0xff]  }
 0x57f   :  { %5024 = vmatpush1.bf16.msra.mxu0 %v7761_v30  ;;  %5106 = vmatpush1.bf16.msra.mxu1 %v7764_v10  ;;  %v7843_v30 = vld [vmem:[%s10155_s3 + $0x10] sm:$0xff]  }
 0x580   :  { %5025 = vmatprep.subr.bf16.mxu0 %v7769_v31  ;;  %5107 = vmatprep.subr.bf16.mxu1 %v7772_v32  ;;  %v7844_v10 = vld [vmem:[%s10155_s3 + $0x90] sm:$0xff]   ;;  %v7845_v31 = vld [vmem:[%s10155_s3 + $0x58] sm:$0xff]  }
 0x581   :  { %v7846_v32 = vld [vmem:[%s10155_s3 + $0xd8] sm:$0xff]  }
 0x583   :  { %5026 = vmatpush1.bf16.msra.mxu0 %v7767_v33  ;;  %5108 = vmatpush1.bf16.msra.mxu1 %v7770_v35  ;;  %v7847_v33 = vld [vmem:[%s10155_s3 + $0x18] sm:$0xff]  }
 0x584   :  { %5027 = vmatprep.subr.bf16.mxu0 %v7775_v15  ;;  %5109 = vmatprep.subr.bf16.mxu1 %v7778_v36  ;;  %v7848_v35 = vld [vmem:[%s10155_s3 + $0x98] sm:$0xff]   ;;  %v7849_v15 = vld [vmem:[%s10155_s3 + $0x60] sm:$0xff]  }
 0x585   :  { %v7850_v36 = vld [vmem:[%s10155_s3 + $0xe0] sm:$0xff]  }
 0x587   :  { %5028 = vmatpush1.bf16.msra.mxu0 %v7773_v41  ;;  %5110 = vmatpush1.bf16.msra.mxu1 %v7776_v18  ;;  %v7851_v41 = vld [vmem:[%s10155_s3 + $0x20] sm:$0xff]  }
 0x588   :  { %5029 = vmatprep.subr.bf16.mxu0 %v7781_v42  ;;  %5111 = vmatprep.subr.bf16.mxu1 %v7784_v37  ;;  %v7852_v18 = vld [vmem:[%s10155_s3 + $0xa0] sm:$0xff]   ;;  %v7853_v42 = vld [vmem:[%s10155_s3 + $0x68] sm:$0xff]  }
 0x589   :  { %v7854_v37 = vld [vmem:[%s10155_s3 + $0xe8] sm:$0xff]  }
 0x58b   :  { %5030 = vmatpush1.bf16.msra.mxu0 %v7779_v43  ;;  %5112 = vmatpush1.bf16.msra.mxu1 %v7782_v44  ;;  %v7855_v43 = vld [vmem:[%s10155_s3 + $0x28] sm:$0xff]  }
 0x58c   :  { %5031 = vmatprep.subr.bf16.mxu0 %v7787_v23  ;;  %5113 = vmatprep.subr.bf16.mxu1 %v7790_v45  ;;  %v7856_v44 = vld [vmem:[%s10155_s3 + $0xa8] sm:$0xff]   ;;  %v7857_v23 = vld [vmem:[%s10155_s3 + $0x70] sm:$0xff]  }
 0x58d   :  { %v7858_v45 = vld [vmem:[%s10155_s3 + $0xf0] sm:$0xff]  }
 0x58f   :  { %5032 = vmatpush1.bf16.msra.mxu0 %v7785_v46  ;;  %5114 = vmatpush1.bf16.msra.mxu1 %v7788_v47  ;;  %v7859_v46 = vld [vmem:[%s10155_s3 + $0x30] sm:$0xff]  }
 0x590   :  { %5033 = vmatprep.subr.bf16.mxu0 %v7793_v48  ;;  %5115 = vmatprep.subr.bf16.mxu1 %v7796_v49  ;;  %v7860_v47 = vld [vmem:[%s10155_s3 + $0xb0] sm:$0xff]   ;;  %v7861_v48 = vld [vmem:[%s10155_s3 + $0x78] sm:$0xff]  }
 0x591   :  { %v7862_v49 = vld [vmem:[%s10155_s3 + $0xf8] sm:$0xff]  }
 0x593   :  { %5034 = vmatpush1.bf16.msra.mxu0 %v7791_v50  ;;  %5116 = vmatpush1.bf16.msra.mxu1 %v7794_v52  ;;  %v7863_v50 = vld [vmem:[%s10155_s3 + $0x38] sm:$0xff]  }
 0x594   :  { %5035 = vmatprep.subr.bf16.mxu0 %v7799_v53  ;;  %5117 = vmatprep.subr.bf16.mxu1 %v7802_v56  ;;  %v7864_v52 = vld [vmem:[%s10155_s3 + $0xb8] sm:$0xff]  }
 0x595   :  { %v6558_v53 = vld [vmem:[%s10156_s4 + $0x5] ss:$8 sm:$0xf] }
 0x596   :  { %v4317_v56 = vrot.slane %v6558_v53, %v8221_v38 }
 0x597   :  { %5036 = vmatpush1.bf16.msra.mxu0 %v7797_v57  ;;  %5118 = vmatpush1.bf16.msra.mxu1 %v7800_v58  ;;  %v4325_v57 = vrot.slane %v6558_v53, %v8351_v34  ;;  %v4321_v58 = vrot.slane %v6558_v53, %v8229_v40 }
 0x598   :  { %5037 = vmatprep.subr.bf16.mxu0 %v7805_v59  ;;  %5119 = vmatprep.subr.bf16.mxu1 %v7808_v61  ;;  %v4329_v59 = vrot.slane %v6558_v53, %v8248_v55 }
 0x59b   :  { %5038 = vmatpush1.bf16.msra.mxu0 %v7803_v62  ;;  %5120 = vmatpush1.bf16.msra.mxu1 %v7806_v63 }
 0x59c   :  { %5039 = vmatprep.subr.bf16.mxu0 %v7811_v0  ;;  %5121 = vmatprep.subr.bf16.mxu1 %v7814_v1 }
 0x59f   :  { %5040 = vmatpush1.bf16.msra.mxu0 %v7809_v2  ;;  %5122 = vmatpush1.bf16.msra.mxu1 %v7812_v3 }
 0x5a0   :  { %5041 = vmatprep.subr.bf16.mxu0 %v7817_v39  ;;  %5123 = vmatprep.subr.bf16.mxu1 %v7820_v4 }
 0x5a3   :  { %5042 = vmatpush1.bf16.msra.mxu0 %v7815_v5  ;;  %5124 = vmatpush1.bf16.msra.mxu1 %v7818_v6 }
 0x5a4   :  { %5043 = vmatprep.subr.bf16.mxu0 %v7823_v51  ;;  %5125 = vmatprep.subr.bf16.mxu1 %v7826_v8 }
 0x5a7   :  { %5044 = vmatpush1.bf16.msra.mxu0 %v7821_v9  ;;  %5126 = vmatpush1.bf16.msra.mxu1 %v7824_v54 }
 0x5a8   :  { %5045 = vmatprep.subr.bf16.mxu0 %v7829_v12  ;;  %5127 = vmatprep.subr.bf16.mxu1 %v7832_v13  ;;  %v5210_v13 = vld [vmem:[%s10156_s4 + $0x6] ss:$0 sm:$0xff] }
 0x5ab   :  { %5046 = vmatpush1.bf16.msra.mxu0 %v7827_v14  ;;  %5128 = vmatpush1.bf16.msra.mxu1 %v7830_v60 }
 0x5ac   :  { %6719 = vmatprep.subr.bf16.mxu0 %v7833_v17  ;;  %6741 = vmatprep.subr.bf16.mxu1 %v7834_v19 }
 0x5ae   :  { %5048 = vmatmul.mubr.bf16.vlgmr.msra.gmra.mrb[20].mxu0 %v4180_v22  ;;  %5130 = vmatmul.mubr.bf16.vlgmr.msra.gmra.mrb[20].mxu1 %v4180_v22 }
 0x5af   :  { %6720 = vmatpush3.bf16.msra.mxu0 %v7835_v20  ;;  %6742 = vmatpush3.bf16.msra.mxu1 %v7836_v21 }
 0x5b0   :  { %6721 = vmatprep.subr.bf16.mxu0 %v7837_v24  ;;  %6743 = vmatprep.subr.bf16.mxu1 %v7838_v25 }
 0x5b3   :  { %6722 = vmatpush3.bf16.msra.mxu0 %v7839_v26  ;;  %6744 = vmatpush3.bf16.msra.mxu1 %v7840_v27 }
 0x5b4   :  { %6723 = vmatprep.subr.bf16.mxu0 %v7841_v28  ;;  %6745 = vmatprep.subr.bf16.mxu1 %v7842_v29 }
 0x5b7   :  { %6724 = vmatpush3.bf16.msra.mxu0 %v7843_v30  ;;  %6746 = vmatpush3.bf16.msra.mxu1 %v7844_v10 }
 0x5b8   :  { %6725 = vmatprep.subr.bf16.mxu0 %v7845_v31  ;;  %6747 = vmatprep.subr.bf16.mxu1 %v7846_v32 }
 0x5bb   :  { %6726 = vmatpush3.bf16.msra.mxu0 %v7847_v33  ;;  %6748 = vmatpush3.bf16.msra.mxu1 %v7848_v35 }
 0x5bc   :  { %6727 = vmatprep.subr.bf16.mxu0 %v7849_v15  ;;  %6749 = vmatprep.subr.bf16.mxu1 %v7850_v36 }
 0x5bf   :  { %6728 = vmatpush3.bf16.msra.mxu0 %v7851_v41  ;;  %6750 = vmatpush3.bf16.msra.mxu1 %v7852_v18 }
 0x5c0   :  { %6729 = vmatprep.subr.bf16.mxu0 %v7853_v42  ;;  %6751 = vmatprep.subr.bf16.mxu1 %v7854_v37 }
 0x5c3   :  { %6730 = vmatpush3.bf16.msra.mxu0 %v7855_v43  ;;  %6752 = vmatpush3.bf16.msra.mxu1 %v7856_v44 }
 0x5c4   :  { %6731 = vmatprep.subr.bf16.mxu0 %v7857_v23  ;;  %6753 = vmatprep.subr.bf16.mxu1 %v7858_v45 }
 0x5c7   :  { %6732 = vmatpush3.bf16.msra.mxu0 %v7859_v46  ;;  %6754 = vmatpush3.bf16.msra.mxu1 %v7860_v47 }
 0x5c8   :  { %6733 = vmatprep.subr.bf16.mxu0 %v7861_v48  ;;  %6755 = vmatprep.subr.bf16.mxu1 %v7862_v49 }
 0x5cb   :  { %6734 = vmatpush3.bf16.msra.mxu0 %v7863_v50  ;;  %6756 = vmatpush3.bf16.msra.mxu1 %v7864_v52 }
 0x681   :  { %v5049_v61 = vpop.f32.mrb[20].mxu0  ;;  %v5131_v62 = vpop.f32.mrb[20].mxu1 }
 0x682   :  { %v6779_v63 = vadd.f32 %v5049_v61, %v4317_v56  ;;  %v6781_v0 = vadd.f32 %v5131_v62, %v4325_v57  ;;  %v5051_v1 = vpop.f32.mrb[21].mxu0  ;;  %v5133_v2 = vpop.f32.mrb[21].mxu1 }
 0x683   :  { %v6780_v3 = vadd.f32 %v5051_v1, %v4321_v58  ;;  %v6782_v39 = vadd.f32 %v5133_v2, %v4329_v59  ;;  %v5053_v4 = vpop.f32.mrb[22].mxu0  ;;  %v5135_v5 = vpop.f32.mrb[22].mxu1 }
 0x684   :  { %v5138_v6 = vmax.f32 %v6779_v63, 0.0  ;;  %v5140_v7 = vmax.f32 %v6781_v0, 0.0  ;;  %v5054_v51 = vpop.f32.mrb[23].mxu0  ;;  %v5136_v38 = vpop.f32.mrb[23].mxu1 }
 0x685   :  { %v5139_v8 = vmax.f32 %v6780_v3, 0.0  ;;  %v5141_v34 = vmax.f32 %v6782_v39, 0.0 }
 0x686   :  { %v5142_v54 = vpack.c.bf16 %v5138_v6, %v5138_v6  ;;  %v5144_v55 = vpack.c.bf16 %v5140_v7, %v5140_v7 }
 0x687   :  { %v5143_v9 = vpack.c.bf16 %v5139_v8, %v5139_v8  ;;  %v5145_v40 = vpack.c.bf16 %v5141_v34, %v5141_v34 }
 0x689   :  { %5435 = vmatprep.mubr.bf16.mxu0 %v5143_v9  ;;  %5475 = vmatprep.mubr.bf16.mxu1 %v5145_v40 }
 0x68a   :  { %5436 = vmatmul.mubr.bf16.vlgmr.msra.gmra.mrb[24].mxu0 %v5142_v54  ;;  %5476 = vmatmul.mubr.bf16.vlgmr.msra.gmra.mrb[24].mxu1 %v5144_v55 }
 0x75d   :  { %v6735_v11 = vpop.f32.mrb[24].mxu0  ;;  %v6757_v12 = vpop.f32.mrb[24].mxu1 }
 0x75e   :  { %v6736_v14 = vpop.f32.mrb[25].mxu0  ;;  %v6758_v60 = vpop.f32.mrb[25].mxu1 }
 0x75f   :  { %v6737_v16 = vadd.f32 %v6736_v14, %v6735_v11  ;;  %v6759_v17 = vadd.f32 %v6758_v60, %v6757_v12  ;;  %v6738_v19 = vpop.f32.mrb[26].mxu0  ;;  %v6760_v20 = vpop.f32.mrb[26].mxu1 }
 0x760   :  { %v6739_v21 = vpop.f32.mrb[27].mxu0  ;;  %v6761_v22 = vpop.f32.mrb[27].mxu1 }
 0x761   :  { %v5438_v24 = vadd.f32 %v6737_v16, %v5210_v13 }
 0x763   :  { %v5478_v25 = vadd.f32 %v6759_v17, %v5438_v24 }
 0x765   :  { %5483 = vst [vmem:[#allocation2] sm:$0xff] %v5478_v25 }
 0x766   :  { %7876 = shalt.err (!%p7873_p4)
}
 0x767   :  { %s7877_s16 = scalar_lea.hbm %s10157_s5, 128 }
 0x768   :  { %p7878_p5 = scmp.ne.s32.totalorder %s10157_s5, %s7877_s16  ;;  %p7881_p6 = scmp.lt.u32.totalorder %s7877_s16, %s10157_s5 }
 0x76a   :  { %p7883_p7 = pnand %p7881_p6, %p7878_p5 }
 0x76c   :  { %7886 = shalt.err (!%p7883_p7)
}
 0x76d   :  { %5493 = dma.vmem_to_hbm [thread:$0]  %s5491_s13, 128, %s10157_s5, [#allocation3]  }
 0x76e   :  { %7887 = dma.done.wait [#allocation3], 128  }
 0x76f   :  { %7888 = vsyncadd [#allocation3], 4294967168 }
 0x770   :  { %5497 = vsyncpa [#allocation3], 1 }

</bundles_post_ra>
